<compile_context>
chip_gen: v5e
topology: v5e:2x2
jax: 0.10.0
libtpu: 0.0.40
codegen_flags: <defaults>
</compile_context>

<pallas_src>
import functools

import jax
import jax.numpy as jnp
from jax.experimental import pallas as pl
from jax.experimental.pallas import tpu as pltpu


# ----------------------------- small helpers ------------------------------- #

@functools.lru_cache(maxsize=None)
def _vmem_limit_bytes():
    """Per-generation VMEM limit: ~3/4 of physical VMEM, capped at 96 MiB."""
    cap = None
    try:
        cap = getattr(pltpu.get_tpu_info(), "vmem_capacity_bytes", None)
    except Exception:
        cap = None
    if not cap:
        cap = 64 * 1024 * 1024          # conservative (v7x per-TC) fallback
    return int(min(cap * 3 // 4, 96 * 1024 * 1024))


def _pick_tile(dim, cap, unit):
    """Largest multiple-of-`unit` divisor of `dim` that is <= cap; else `dim` (full)."""
    if dim >= unit and dim % unit == 0:
        t = (min(cap, dim) // unit) * unit
        while dim % t:
            t -= unit
        return t
    return dim


def _pad_and_tile_tokens(n):
    """Pick (n_pad, token_tile): tile divides n_pad, waste kept small (<=~15%)."""
    for g in (256, 128, 64, 32, 16):
        n_pad = ((n + g - 1) // g) * g
        if (n_pad - n) <= max(8, int(0.15 * n)):
            return n_pad, _pick_tile(n_pad, 256, 8)
    n_pad = ((n + 7) // 8) * 8
    return n_pad, _pick_tile(n_pad, 256, 8)


def _pick_head_group(n_heads, head_dim):
    """Smallest head group whose width is a 128-lane multiple (prefer >=256 lanes)."""
    for min_width in (256, 128):
        for hg in range(1, n_heads + 1):
            if (n_heads % hg == 0 and (hg * head_dim) % 128 == 0
                    and hg * head_dim >= min_width):
                return hg
    return n_heads


def _erf_f32(x):
    # Abramowitz & Stegun 7.1.26 polynomial (|err| < 1.5e-7); only exp/mul/add/where,
    # so the exact-erf GELU can be fused into the matmul epilogue.
    a1, a2, a3, a4, a5 = (0.254829592, -0.284496736, 1.421413741,
                          -1.453152027, 1.061405429)
    p = 0.3275911
    sgn = jnp.where(x < 0.0, -1.0, 1.0)
    z = jnp.abs(x)
    t = 1.0 / (1.0 + p * z)
    poly = ((((a5 * t + a4) * t + a3) * t + a2) * t + a1) * t
    return sgn * (1.0 - poly * jnp.exp(-z * z))


def _gelu_exact(x):
    return 0.5 * x * (1.0 + _erf_f32(x * 0.7071067811865476))


# --------------------------- fused tiled matmul ----------------------------- #

def _fused_matmul_kernel(*refs, has_bias, has_res, ln_in_eps, ln_out_eps,
                         activation, single_k):
    it = iter(refs)
    x_ref = next(it)
    w_ref = next(it)
    b_ref = next(it) if has_bias else None
    r_ref = next(it) if has_res else None
    gi_ref = next(it) if ln_in_eps is not None else None
    bi_ref = next(it) if ln_in_eps is not None else None
    go_ref = next(it) if ln_out_eps is not None else None
    bo_ref = next(it) if ln_out_eps is not None else None
    o_ref = next(it)
    acc_ref = None if single_k else next(it)

    def epilogue(y):
        if has_bias:
            y = y + b_ref[...]
        if activation == "gelu":
            y = _gelu_exact(y)
        if ln_out_eps is not None:
            mu = jnp.mean(y, axis=-1, keepdims=True)
            yc = y - mu
            var = jnp.mean(yc * yc, axis=-1, keepdims=True)
            y = yc * jax.lax.rsqrt(var + ln_out_eps) * go_ref[...] + bo_ref[...]
        if has_res:
            y = y + r_ref[...].astype(jnp.float32)
        return y.astype(o_ref.dtype)

    x = x_ref[...]
    if ln_in_eps is not None:                       # input LayerNorm, f32 statistics
        xf = x.astype(jnp.float32)
        mu = jnp.mean(xf, axis=-1, keepdims=True)
        xc = xf - mu
        var = jnp.mean(xc * xc, axis=-1, keepdims=True)
        x = xc * jax.lax.rsqrt(var + ln_in_eps) * gi_ref[...] + bi_ref[...]

    if single_k:
        y = jnp.dot(x.astype(jnp.bfloat16), w_ref[...],
                    preferred_element_type=jnp.float32)
        o_ref[...] = epilogue(y)
    else:
        k = pl.program_id(2)

        @pl.when(k == 0)
        def _():
            acc_ref[...] = jnp.zeros_like(acc_ref)

        acc_ref[...] += jnp.dot(x.astype(jnp.bfloat16), w_ref[...],
                                preferred_element_type=jnp.float32)

        @pl.when(k == pl.num_programs(2) - 1)
        def _():
            o_ref[...] = epilogue(acc_ref[...])


def fused_matmul(x, w, bias=None, *, residual=None, ln_in=None, ln_out=None,
                 activation=None, out_dtype=jnp.float32,
                 tm_cap=512, tn_cap=512, tk_cap=1024):
    """out = (+residual)( LN_out( act( LN_in(x) @ w (+bias) ) ) )   -- all fused.

    x:(M,K) f32/bf16, w:(K,N) bf16.  K-innermost reduction grid; when a single K tile
    suffices (nk == 1) the accumulator scratch is bypassed entirely.
    """
    M, K = x.shape
    Kw, N = w.shape
    assert K == Kw
    tm = _pick_tile(M, tm_cap, 8)
    tn = _pick_tile(N, tn_cap, 128)
    tk = K if ln_in is not None else _pick_tile(K, tk_cap, 128)  # LN needs full rows
    assert M % tm == 0 and N % tn == 0 and K % tk == 0
    if ln_out is not None:
        assert tn == N, "fused output LayerNorm needs the full feature dim per tile"
    nm, nn, nk = M // tm, N // tn, K // tk
    single_k = (nk == 1)

    if single_k:
        im_x = lambda i, j: (i, 0)
        im_w = lambda i, j: (0, j)
        im_mn = lambda i, j: (i, j)
        im_vn = lambda i, j: (0, j)
        im_vk = lambda i, j: (0, 0)
        grid = (nm, nn)
        dims = ("parallel", "parallel")
        scratch = []
    else:
        im_x = lambda i, j, k: (i, k)
        im_w = lambda i, j, k: (k, j)
        im_mn = lambda i, j, k: (i, j)
        im_vn = lambda i, j, k: (0, j)
        im_vk = lambda i, j, k: (0, k)
        grid = (nm, nn, nk)
        dims = ("parallel", "parallel", "arbitrary")
        scratch = [pltpu.VMEM((tm, tn), jnp.float32)]

    in_specs = [pl.BlockSpec((tm, tk), im_x), pl.BlockSpec((tk, tn), im_w)]
    operands = [x, w]
    if bias is not None:
        in_specs.append(pl.BlockSpec((1, tn), im_vn))
        operands.append(bias.reshape(1, N))
    if residual is not None:
        in_specs.append(pl.BlockSpec((tm, tn), im_mn))
        operands.append(residual)
    ln_in_eps = None
    if ln_in is not None:
        g, b, ln_in_eps = ln_in
        in_specs += [pl.BlockSpec((1, tk), im_vk), pl.BlockSpec((1, tk), im_vk)]
        operands += [g.reshape(1, K), b.reshape(1, K)]
    ln_out_eps = None
    if ln_out is not None:
        g, b, ln_out_eps = ln_out
        in_specs += [pl.BlockSpec((1, tn), im_vn), pl.BlockSpec((1, tn), im_vn)]
        operands += [g.reshape(1, N), b.reshape(1, N)]

    kernel = functools.partial(
        _fused_matmul_kernel,
        has_bias=bias is not None, has_res=residual is not None,
        ln_in_eps=ln_in_eps, ln_out_eps=ln_out_eps, activation=activation,
        single_k=single_k)

    return pl.pallas_call(
        kernel,
        out_shape=jax.ShapeDtypeStruct((M, N), out_dtype),
        grid=grid,
        in_specs=in_specs,
        out_specs=pl.BlockSpec((tm, tn), im_mn),
        scratch_shapes=scratch,
        compiler_params=pltpu.CompilerParams(
            dimension_semantics=dims, vmem_limit_bytes=_vmem_limit_bytes()),
    )(*operands)


# ------------------------- flash attention (head groups) -------------------- #

def _flash_attention_kernel(q_ref, k_ref, v_ref, o_ref, m_ref, l_ref, acc_ref,
                            *, scale, n_valid, n_tokens, hg):
    ki = pl.program_id(3)
    tq = q_ref.shape[0]
    tkv = k_ref.shape[0]

    @pl.when(ki == 0)
    def _():
        m_ref[...] = jnp.full(m_ref.shape, -jnp.inf, m_ref.dtype)
        l_ref[...] = jnp.zeros(l_ref.shape, l_ref.dtype)
        acc_ref[...] = jnp.zeros(acc_ref.shape, acc_ref.dtype)

    def process(masked):
        if masked:
            col = ki * tkv + jax.lax.broadcasted_iota(jnp.int32, (tq, tkv), 1)
            kv_mask = col < n_valid
        for h in range(hg):                         # small static loop (1-4 heads)
            q = q_ref[:, h, :]                      # (tq, Dh) bf16
            k = k_ref[:, h, :]                      # (tkv, Dh)
            v = v_ref[:, h, :]
            s = jax.lax.dot_general(q, k, (((1,), (1,)), ((), ())),
                                    preferred_element_type=jnp.float32) * scale
            if masked:
                s = jnp.where(kv_mask, s, jnp.float32(-1e30))
            m_prev = m_ref[h]
            m_new = jnp.maximum(m_prev, jnp.max(s, axis=-1, keepdims=True))
            alpha = jnp.exp(m_prev - m_new)
            p = jnp.exp(s - m_new)
            l_ref[h] = alpha * l_ref[h] + jnp.sum(p, axis=-1, keepdims=True)
            acc_ref[h] = alpha * acc_ref[h] + jax.lax.dot_general(
                p.astype(v.dtype), v, (((1,), (0,)), ((), ())),
                preferred_element_type=jnp.float32)
            m_ref[h] = m_new

    # Apply the KV padding mask only on tiles that can actually contain padding.
    full_tiles = n_valid // tkv
    if n_valid >= n_tokens:
        process(False)
    elif full_tiles == 0:
        process(True)
    else:
        @pl.when(ki < full_tiles)
        def _():
            process(False)

        @pl.when(ki >= full_tiles)
        def _():
            process(True)

    @pl.when(ki == pl.num_programs(3) - 1)
    def _():
        outs = []
        for h in range(hg):
            inv = pl.reciprocal(l_ref[h], approx=True)        # (tq, 1)
            outs.append(acc_ref[h] * inv)                     # (tq, Dh) f32
        out = outs[0] if hg == 1 else jnp.concatenate(outs, axis=-1)
        o_ref[...] = out.astype(o_ref.dtype)                  # single lane-dense store


def flash_attention(qkv, *, batch, n_heads, n_tokens, head_dim, n_valid, scale,
                    token_tile, out_dtype=jnp.bfloat16):
    """qkv: (batch*n_tokens, 3*n_heads*head_dim) slab, column layout (qkv, head, dh).

    Heads are processed in lane-aligned groups via a grid axis; q/k/v are read
    straight off the slab through BlockSpec index maps and the output is one
    lane-dense (tq, group_width) block per grid step, laid out head-concatenated.
    """
    D = n_heads * head_dim
    hg = _pick_head_group(n_heads, head_dim)
    ng = n_heads // hg
    gw = hg * head_dim
    tq = tkv = min(token_tile, n_tokens)
    assert n_tokens % tq == 0 and n_tokens % tkv == 0

    qkv5 = qkv.reshape(batch, n_tokens, 3 * ng, hg, head_dim)   # free reshape
    grid = (batch, ng, n_tokens // tq, n_tokens // tkv)

    q_spec = pl.BlockSpec((None, tq, None, hg, head_dim),
                          lambda b, g, qi, ki: (b, qi, g, 0, 0))
    k_spec = pl.BlockSpec((None, tkv, None, hg, head_dim),
                          lambda b, g, qi, ki: (b, ki, ng + g, 0, 0))
    v_spec = pl.BlockSpec((None, tkv, None, hg, head_dim),
                          lambda b, g, qi, ki: (b, ki, 2 * ng + g, 0, 0))
    o_spec = pl.BlockSpec((None, tq, gw), lambda b, g, qi, ki: (b, qi, g))

    return pl.pallas_call(
        functools.partial(_flash_attention_kernel, scale=scale,
                          n_valid=n_valid, n_tokens=n_tokens, hg=hg),
        out_shape=jax.ShapeDtypeStruct((batch, n_tokens, D), out_dtype),
        grid=grid,
        in_specs=[q_spec, k_spec, v_spec],
        out_specs=o_spec,
        scratch_shapes=[pltpu.VMEM((hg, tq, 1), jnp.float32),
                        pltpu.VMEM((hg, tq, 1), jnp.float32),
                        pltpu.VMEM((hg, tq, head_dim), jnp.float32)],
        compiler_params=pltpu.CompilerParams(
            dimension_semantics=("parallel", "parallel", "parallel", "arbitrary"),
            vmem_limit_bytes=_vmem_limit_bytes()),
    )(qkv5, qkv5, qkv5)


# ---------------- neck 3x3 conv (blocked rows) + LayerNorm2d ----------------- #

def _neck_conv2_kernel(x_ref, w_ref, g_ref, b_ref, o_ref, *, eps, hb, wn):
    wp = wn + 2
    xm = x_ref[...]                                  # (hb*(wn+2), 3*OC) bf16
    # One matmul per kw tap; the three kh taps are folded into the K dimension.
    z = [jnp.dot(xm, w_ref[kw], preferred_element_type=jnp.float32)
         for kw in range(3)]
    g = g_ref[...]                                   # (1, OC)
    b = b_ref[...]
    for r in range(hb):                              # static loop over output rows
        base = r * wp
        row = (z[0][base:base + wn, :]
               + z[1][base + 1:base + 1 + wn, :]
               + z[2][base + 2:base + 2 + wn, :])    # (wn, OC) f32
        mu = jnp.mean(row, axis=-1, keepdims=True)
        rc = row - mu
        var = jnp.mean(rc * rc, axis=-1, keepdims=True)
        o_ref[r] = (rc * jax.lax.rsqrt(var + eps) * g + b).astype(o_ref.dtype)


def _pick_row_block(hn, wn):
    for hb in range(min(hn, 8), 0, -1):
        if hn % hb == 0 and (hb == hn or (hb * (wn + 2)) % 8 == 0):
            return hb
    return hn


def neck_conv3x3_ln(y, w9, gamma, beta, *, hn, wn, oc, eps, out_dtype=jnp.float32):
    """3x3 'same' conv (no bias) + LayerNorm2d; kh taps folded into K, hb rows/step."""
    B = y.shape[0]
    hb = _pick_row_block(hn, wn)
    yp = jnp.pad(y, ((0, 0), (1, 1), (1, 1), (0, 0)))            # (B, hn+2, wn+2, OC)
    # Fold the three kh taps into channels: (B, hn, wn+2, 3*OC), flattened rows.
    xcat = jnp.concatenate([yp[:, kh:kh + hn] for kh in range(3)], axis=-1)
    xflat = xcat.reshape(B, hn * (wn + 2), 3 * oc)
    # Weight per kw tap, stacked over kh along the input-channel dim: (3, 3*OC, OC).
    wcat = jnp.stack(
        [jnp.concatenate([w9[3 * kh + kw] for kh in range(3)], axis=0)
         for kw in range(3)], axis=0)

    return pl.pallas_call(
        functools.partial(_neck_conv2_kernel, eps=eps, hb=hb, wn=wn),
        out_shape=jax.ShapeDtypeStruct((B, hn, wn, oc), out_dtype),
        grid=(B, hn // hb),
        in_specs=[
            pl.BlockSpec((None, hb * (wn + 2), 3 * oc), lambda b, h: (b, h, 0)),
            pl.BlockSpec((3, 3 * oc, oc), lambda b, h: (0, 0, 0)),
            pl.BlockSpec((1, oc), lambda b, h: (0, 0)),
            pl.BlockSpec((1, oc), lambda b, h: (0, 0)),
        ],
        out_specs=pl.BlockSpec((None, hb, wn, oc), lambda b, h: (b, h, 0, 0)),
        compiler_params=pltpu.CompilerParams(
            dimension_semantics=("parallel", "parallel"),
            vmem_limit_bytes=_vmem_limit_bytes()),
    )(xflat, wcat, gamma.reshape(1, oc), beta.reshape(1, oc))


# ------------------------------ parameters ---------------------------------- #

def init_params(key, cfg):
    D = cfg["hidden_size"]
    P = cfg["patch_size"]
    C = cfg["num_channels"]
    MLP = int(cfg["mlp_ratio"] * D)
    OC = cfg["output_channels"]
    n_patches = (cfg["image_size"] // P) ** 2

    keys = iter(jax.random.split(key, 8 + 8 * cfg["num_hidden_layers"]))

    def nrm(shape, std=0.02, dtype=jnp.bfloat16):
        return (std * jax.random.normal(next(keys), shape)).astype(dtype)

    params = {
        # Conv2d(C, D, kernel=P, stride=P) stored as (C*P*P, D) bf16 matmul weight.
        "patch_w": nrm((C * P * P, D)),
        "patch_b": jnp.zeros((D,), jnp.float32),
        "cls_token": nrm((1, 1, D), dtype=jnp.float32),
        "pos_embed": nrm((1, n_patches + 1, D), dtype=jnp.float32),
        "norm_g": jnp.ones((D,), jnp.float32),
        "norm_b": jnp.zeros((D,), jnp.float32),
        # SamVisionNeck: conv1 1x1 (D->OC, no bias); conv2 3x3 pad 1 (OC->OC, no bias)
        # stored per-tap as (kh*3 + kw, c_in, c_out).
        "neck_conv1_w": nrm((D, OC)),
        "neck_conv2_w": nrm((9, OC, OC)),
        "neck_ln1_g": jnp.ones((OC,), jnp.float32),
        "neck_ln1_b": jnp.zeros((OC,), jnp.float32),
        "neck_ln2_g": jnp.ones((OC,), jnp.float32),
        "neck_ln2_b": jnp.zeros((OC,), jnp.float32),
        "blocks": [],
    }
    for _ in range(cfg["num_hidden_layers"]):
        params["blocks"].append({
            "ln1_g": jnp.ones((D,), jnp.float32),
            "ln1_b": jnp.zeros((D,), jnp.float32),
            "qkv_w": nrm((D, 3 * D)),
            "qkv_b": jnp.zeros((3 * D,), jnp.float32),
            "proj_w": nrm((D, D)),
            "proj_b": jnp.zeros((D,), jnp.float32),
            "ln2_g": jnp.ones((D,), jnp.float32),
            "ln2_b": jnp.zeros((D,), jnp.float32),
            "fc1_w": nrm((D, MLP)),
            "fc1_b": jnp.zeros((MLP,), jnp.float32),
            "fc2_w": nrm((MLP, D)),
            "fc2_b": jnp.zeros((D,), jnp.float32),
        })
    return params


# -------------------------------- forward ----------------------------------- #

def image_embedding_mae(params, image, cfg):
    """image: (B, C, H, W) NCHW f32 -> (B, output_channels, H/p, W/p) NCHW f32."""
    B, C, Himg, Wimg = image.shape
    P = cfg["patch_size"]
    D = cfg["hidden_size"]
    nH = cfg["num_attention_heads"]
    Dh = D // nH
    OC = cfg["output_channels"]
    hn, wn = Himg // P, Wimg // P
    Np = hn * wn
    N = Np + 1
    N_pad, tok_tile = _pad_and_tile_tokens(N)        # pad to the attention tile

    # ---- patch embedding (strided conv == per-patch matmul), pos-embed add fused ----
    patches = image.reshape(B, C, hn, P, wn, P).transpose(0, 2, 4, 1, 3, 5)
    patches = patches.reshape(B * Np, C * P * P)
    pos_patch = jnp.broadcast_to(params["pos_embed"][:, 1:, :],
                                 (B, Np, D)).reshape(B * Np, D)
    tok = fused_matmul(patches, params["patch_w"], params["patch_b"],
                       residual=pos_patch)
    tok = tok.reshape(B, Np, D)

    cls = jnp.broadcast_to(params["cls_token"] + params["pos_embed"][:, :1, :],
                           (B, 1, D))
    x = jnp.concatenate([cls, tok], axis=1)                 # (B, N, D)
    x = jnp.pad(x, ((0, 0), (0, N_pad - N), (0, 0)))        # zero-pad tokens once
    x = x.reshape(B * N_pad, D)                             # f32 residual stream

    # ---- transformer blocks: 4 fused matmuls + 1 flash-attention call per block ----
    scale = Dh ** -0.5
    for blk in params["blocks"]:
        qkv = fused_matmul(x, blk["qkv_w"], blk["qkv_b"],
                           ln_in=(blk["ln1_g"], blk["ln1_b"], 1e-5),
                           out_dtype=jnp.bfloat16)          # LN1 + qkv  (B*Npad, 3D)
        attn = flash_attention(qkv, batch=B, n_heads=nH, n_tokens=N_pad,
                               head_dim=Dh, n_valid=N, scale=scale,
                               token_tile=tok_tile)
        attn = attn.reshape(B * N_pad, D)                   # head-concat, free reshape
        x = fused_matmul(attn, blk["proj_w"], blk["proj_b"], residual=x)
        h = fused_matmul(x, blk["fc1_w"], blk["fc1_b"],
                         ln_in=(blk["ln2_g"], blk["ln2_b"], 1e-5),
                         activation="gelu", out_dtype=jnp.bfloat16)  # LN2 + fc1 + GELU
        x = fused_matmul(h, blk["fc2_w"], blk["fc2_b"], residual=x)

    # ---- drop cls + padding; SAM vision neck ----
    lat = x.reshape(B, N_pad, D)[:, 1:1 + Np, :].reshape(B * Np, D)
    # final ViT LayerNorm + 1x1 conv (no bias) + LayerNorm2d in one fused call
    y = fused_matmul(lat, params["neck_conv1_w"],
                     ln_in=(params["norm_g"], params["norm_b"], 1e-5),
                     ln_out=(params["neck_ln1_g"], params["neck_ln1_b"], 1e-6),
                     out_dtype=jnp.bfloat16)
    y = y.reshape(B, hn, wn, OC)
    out = neck_conv3x3_ln(y, params["neck_conv2_w"],
                          params["neck_ln2_g"], params["neck_ln2_b"],
                          hn=hn, wn=wn, oc=OC, eps=1e-6)     # conv2 + LayerNorm2d
    return out.transpose(0, 3, 1, 2)                         # NCHW like SamVisionNeck


# ---------------------------------- main ------------------------------------ #

if __name__ == "__main__":
    cfg = dict(
        image_size=16,
        patch_size=8,
        num_channels=1,       # GrayImageTensor: (bs, 1, h, w)
        hidden_size=32,
        num_hidden_layers=2,
        num_attention_heads=2,
        mlp_ratio=4,
        output_channels=64,
    )

    key = jax.random.PRNGKey(0)
    pkey, xkey = jax.random.split(key)
    params = init_params(pkey, cfg)
    image = jax.random.normal(xkey, (2, 1, 16, 16), dtype=jnp.float32)

    fwd = jax.jit(functools.partial(image_embedding_mae, cfg=cfg))
    out = jax.block_until_ready(fwd(params, image))

    expected = (2, cfg["output_channels"],
                cfg["image_size"] // cfg["patch_size"],
                cfg["image_size"] // cfg["patch_size"])
    assert out.shape == expected, (out.shape, expected)
    assert bool(jnp.all(jnp.isfinite(out)))
    print("KERNEL_OK")
</pallas_src>

<mosaic_0001>
module attributes {stable_mosaic.version = 11 : i64} {
  func.func @_fused_matmul_kernel(%arg0: i32, %arg1: i32, %arg2: memref<8x64xf32, #tpu.memory_space<vmem>>, %arg3: memref<64x32xbf16, #tpu.memory_space<vmem>>, %arg4: memref<1x32xf32, #tpu.memory_space<vmem>>, %arg5: memref<8x32xf32, #tpu.memory_space<vmem>>, %arg6: memref<8x32xf32, #tpu.memory_space<vmem>>) attributes {dimension_semantics = [#tpu.dimension_semantics<parallel>, #tpu.dimension_semantics<parallel>], iteration_bounds = array<i64: 1, 1>, scalar_prefetch = 0 : i64, scratch_operands = 0 : i64, tpu.core_type = #tpu.core_type<tc>, window_params = [{transform_indices = @transform_0, window_bounds = array<i64: 8, 64>}, {transform_indices = @transform_1, window_bounds = array<i64: 64, 32>}, {transform_indices = @transform_2, window_bounds = array<i64: 1, 32>}, {transform_indices = @transform_3, window_bounds = array<i64: 8, 32>}, {transform_indices = @transform_4, window_bounds = array<i64: 8, 32>}]} {
    %c0 = arith.constant 0 : index
    %c0_0 = arith.constant 0 : index
    %0 = vector.load %arg2[%c0, %c0_0] : memref<8x64xf32, #tpu.memory_space<vmem>>, vector<8x64xf32>
    %1 = arith.truncf %0 : vector<8x64xf32> to vector<8x64xbf16>
    %c0_1 = arith.constant 0 : index
    %c0_2 = arith.constant 0 : index
    %2 = vector.load %arg3[%c0_1, %c0_2] : memref<64x32xbf16, #tpu.memory_space<vmem>>, vector<64x32xbf16>
    %cst = arith.constant dense<0.000000e+00> : vector<8x32xf32>
    %3 = tpu.matmul %1, %2, %cst {dimension_numbers = #tpu.dot_dimension_numbers<[1], [0], [0], [1], [0, 0, 1, 1], [], []>} : vector<8x64xbf16>, vector<64x32xbf16>, vector<8x32xf32> -> vector<8x32xf32>
    %c0_3 = arith.constant 0 : index
    %c0_4 = arith.constant 0 : index
    %4 = vector.load %arg4[%c0_3, %c0_4] : memref<1x32xf32, #tpu.memory_space<vmem>>, vector<1x32xf32>
    %5 = vector.broadcast %4 : vector<1x32xf32> to vector<8x32xf32>
    %6 = arith.addf %3, %5 : vector<8x32xf32>
    %c0_5 = arith.constant 0 : index
    %c0_6 = arith.constant 0 : index
    %7 = vector.load %arg5[%c0_5, %c0_6] : memref<8x32xf32, #tpu.memory_space<vmem>>, vector<8x32xf32>
    %8 = arith.addf %6, %7 : vector<8x32xf32>
    %c0_7 = arith.constant 0 : index
    %c0_8 = arith.constant 0 : index
    %9 = vector.load %arg6[%c0_7, %c0_8] : memref<8x32xf32, #tpu.memory_space<vmem>>, vector<8x32xf32>
    tpu.vector_store %arg6[%c0_7, %c0_8], %8 {strides = array<i32>} : memref<8x32xf32, #tpu.memory_space<vmem>>, vector<8x32xf32>,
    return
  }
  func.func @transform_0(%arg0: i32, %arg1: i32) -> (i32, i32) {
    %c0_i32 = arith.constant 0 : i32
    %c0_i32_0 = arith.constant 0 : i32
    return %arg0, %c0_i32 : i32, i32
  }
  func.func @transform_1(%arg0: i32, %arg1: i32) -> (i32, i32) {
    %c0_i32 = arith.constant 0 : i32
    %c0_i32_0 = arith.constant 0 : i32
    return %c0_i32, %arg1 : i32, i32
  }
  func.func @transform_2(%arg0: i32, %arg1: i32) -> (i32, i32) {
    %c0_i32 = arith.constant 0 : i32
    %c0_i32_0 = arith.constant 0 : i32
    return %c0_i32, %arg1 : i32, i32
  }
  func.func @transform_3(%arg0: i32, %arg1: i32) -> (i32, i32) {
    %c0_i32 = arith.constant 0 : i32
    return %arg0, %arg1 : i32, i32
  }
  func.func @transform_4(%arg0: i32, %arg1: i32) -> (i32, i32) {
    %c0_i32 = arith.constant 0 : i32
    return %arg0, %arg1 : i32, i32
  }
}

module attributes {stable_mosaic.version = 11 : i64} {
  func.func @_fused_matmul_kernel(%arg0: i32, %arg1: i32, %arg2: memref<16x32xf32, #tpu.memory_space<vmem>>, %arg3: memref<32x96xbf16, #tpu.memory_space<vmem>>, %arg4: memref<1x96xf32, #tpu.memory_space<vmem>>, %arg5: memref<1x32xf32, #tpu.memory_space<vmem>>, %arg6: memref<1x32xf32, #tpu.memory_space<vmem>>, %arg7: memref<16x96xbf16, #tpu.memory_space<vmem>>) attributes {dimension_semantics = [#tpu.dimension_semantics<parallel>, #tpu.dimension_semantics<parallel>], iteration_bounds = array<i64: 1, 1>, scalar_prefetch = 0 : i64, scratch_operands = 0 : i64, tpu.core_type = #tpu.core_type<tc>, window_params = [{transform_indices = @transform_0, window_bounds = array<i64: 16, 32>}, {transform_indices = @transform_1, window_bounds = array<i64: 32, 96>}, {transform_indices = @transform_2, window_bounds = array<i64: 1, 96>}, {pipeline_mode = #tpu.pipeline_mode<synchronous>, transform_indices = @transform_3, window_bounds = array<i64: 1, 32>}, {pipeline_mode = #tpu.pipeline_mode<synchronous>, transform_indices = @transform_4, window_bounds = array<i64: 1, 32>}, {transform_indices = @transform_5, window_bounds = array<i64: 16, 96>}]} {
    %c0 = arith.constant 0 : index
    %c0_0 = arith.constant 0 : index
    %0 = vector.load %arg2[%c0, %c0_0] : memref<16x32xf32, #tpu.memory_space<vmem>>, vector<16x32xf32>
    %cst = arith.constant dense<0.000000e+00> : vector<16xf32>
    %1 = vector.multi_reduction <add>, %0, %cst [1] : vector<16x32xf32> to vector<16xf32>
    %2 = vector.shape_cast %1 : vector<16xf32> to vector<16x1xf32>
    %cst_1 = arith.constant 3.200000e+01 : f32
    %3 = vector.broadcast %cst_1 : f32 to vector<16x1xf32>
    %4 = arith.divf %2, %3 : vector<16x1xf32>
    %5 = vector.broadcast %4 : vector<16x1xf32> to vector<16x32xf32>
    %6 = arith.subf %0, %5 : vector<16x32xf32>
    %7 = arith.mulf %6, %6 : vector<16x32xf32>
    %cst_2 = arith.constant dense<0.000000e+00> : vector<16xf32>
    %8 = vector.multi_reduction <add>, %7, %cst_2 [1] : vector<16x32xf32> to vector<16xf32>
    %9 = vector.shape_cast %8 : vector<16xf32> to vector<16x1xf32>
    %cst_3 = arith.constant 3.200000e+01 : f32
    %10 = vector.broadcast %cst_3 : f32 to vector<16x1xf32>
    %11 = arith.divf %9, %10 : vector<16x1xf32>
    %cst_4 = arith.constant 9.99999974E-6 : f32
    %12 = vector.broadcast %cst_4 : f32 to vector<16x1xf32>
    %13 = arith.addf %11, %12 : vector<16x1xf32>
    %14 = math.rsqrt %13 : vector<16x1xf32>
    %15 = vector.broadcast %14 : vector<16x1xf32> to vector<16x32xf32>
    %16 = arith.mulf %6, %15 : vector<16x32xf32>
    %c0_5 = arith.constant 0 : index
    %c0_6 = arith.constant 0 : index
    %17 = vector.load %arg5[%c0_5, %c0_6] : memref<1x32xf32, #tpu.memory_space<vmem>>, vector<1x32xf32>
    %18 = vector.broadcast %17 : vector<1x32xf32> to vector<16x32xf32>
    %19 = arith.mulf %16, %18 : vector<16x32xf32>
    %c0_7 = arith.constant 0 : index
    %c0_8 = arith.constant 0 : index
    %20 = vector.load %arg6[%c0_7, %c0_8] : memref<1x32xf32, #tpu.memory_space<vmem>>, vector<1x32xf32>
    %21 = vector.broadcast %20 : vector<1x32xf32> to vector<16x32xf32>
    %22 = arith.addf %19, %21 : vector<16x32xf32>
    %23 = arith.truncf %22 : vector<16x32xf32> to vector<16x32xbf16>
    %c0_9 = arith.constant 0 : index
    %c0_10 = arith.constant 0 : index
    %24 = vector.load %arg3[%c0_9, %c0_10] : memref<32x96xbf16, #tpu.memory_space<vmem>>, vector<32x96xbf16>
    %cst_11 = arith.constant dense<0.000000e+00> : vector<16x96xf32>
    %25 = tpu.matmul %23, %24, %cst_11 {dimension_numbers = #tpu.dot_dimension_numbers<[1], [0], [0], [1], [0, 0, 1, 1], [], []>} : vector<16x32xbf16>, vector<32x96xbf16>, vector<16x96xf32> -> vector<16x96xf32>
    %c0_12 = arith.constant 0 : index
    %c0_13 = arith.constant 0 : index
    %26 = vector.load %arg4[%c0_12, %c0_13] : memref<1x96xf32, #tpu.memory_space<vmem>>, vector<1x96xf32>
    %27 = vector.broadcast %26 : vector<1x96xf32> to vector<16x96xf32>
    %28 = arith.addf %25, %27 : vector<16x96xf32>
    %29 = arith.truncf %28 : vector<16x96xf32> to vector<16x96xbf16>
    %c0_14 = arith.constant 0 : index
    %c0_15 = arith.constant 0 : index
    %30 = vector.load %arg7[%c0_14, %c0_15] : memref<16x96xbf16, #tpu.memory_space<vmem>>, vector<16x96xbf16>
    tpu.vector_store %arg7[%c0_14, %c0_15], %29 {strides = array<i32>} : memref<16x96xbf16, #tpu.memory_space<vmem>>, vector<16x96xbf16>,
    return
  }
  func.func @transform_0(%arg0: i32, %arg1: i32) -> (i32, i32) {
    %c0_i32 = arith.constant 0 : i32
    %c0_i32_0 = arith.constant 0 : i32
    return %arg0, %c0_i32 : i32, i32
  }
  func.func @transform_1(%arg0: i32, %arg1: i32) -> (i32, i32) {
    %c0_i32 = arith.constant 0 : i32
    %c0_i32_0 = arith.constant 0 : i32
    return %c0_i32, %arg1 : i32, i32
  }
  func.func @transform_2(%arg0: i32, %arg1: i32) -> (i32, i32) {
    %c0_i32 = arith.constant 0 : i32
    %c0_i32_0 = arith.constant 0 : i32
    return %c0_i32, %arg1 : i32, i32
  }
  func.func @transform_3(%arg0: i32, %arg1: i32) -> (i32, i32) {
    %c0_i32 = arith.constant 0 : i32
    %c0_i32_0 = arith.constant 0 : i32
    %c0_i32_1 = arith.constant 0 : i32
    return %c0_i32, %c0_i32_0 : i32, i32
  }
  func.func @transform_4(%arg0: i32, %arg1: i32) -> (i32, i32) {
    %c0_i32 = arith.constant 0 : i32
    %c0_i32_0 = arith.constant 0 : i32
    %c0_i32_1 = arith.constant 0 : i32
    return %c0_i32, %c0_i32_0 : i32, i32
  }
  func.func @transform_5(%arg0: i32, %arg1: i32) -> (i32, i32) {
    %c0_i32 = arith.constant 0 : i32
    return %arg0, %arg1 : i32, i32
  }
}

module attributes {stable_mosaic.version = 11 : i64} {
  func.func @_flash_attention_kernel(%arg0: i32, %arg1: i32, %arg2: i32, %arg3: i32, %arg4: memref<1x8x1x2x16xbf16, #tpu.memory_space<vmem>>, %arg5: memref<1x8x1x2x16xbf16, #tpu.memory_space<vmem>>, %arg6: memref<1x8x1x2x16xbf16, #tpu.memory_space<vmem>>, %arg7: memref<1x8x32xbf16, #tpu.memory_space<vmem>>, %arg8: memref<2x8x1xf32, #tpu.memory_space<vmem>>, %arg9: memref<2x8x1xf32, #tpu.memory_space<vmem>>, %arg10: memref<2x8x16xf32, #tpu.memory_space<vmem>>) attributes {dimension_semantics = [#tpu.dimension_semantics<parallel>, #tpu.dimension_semantics<parallel>, #tpu.dimension_semantics<parallel>, #tpu.dimension_semantics<arbitrary>], iteration_bounds = array<i64: 2, 1, 1, 1>, scalar_prefetch = 0 : i64, scratch_operands = 3 : i64, tpu.core_type = #tpu.core_type<tc>, window_params = [{transform_indices = @transform_0, window_bounds = array<i64: 1, 8, 1, 2, 16>}, {transform_indices = @transform_1, window_bounds = array<i64: 1, 8, 1, 2, 16>}, {transform_indices = @transform_2, window_bounds = array<i64: 1, 8, 1, 2, 16>}, {transform_indices = @transform_3, window_bounds = array<i64: 1, 8, 32>}]} {
    %c0_i32 = arith.constant 0 : i32
    %0 = arith.cmpi eq, %arg3, %c0_i32 : i32
    %1 = arith.extui %0 : i1 to i32
    %c0_i32_0 = arith.constant 0 : i32
    %2 = arith.cmpi ne, %1, %c0_i32_0 : i32
    scf.if %2 {
      %cst_78 = arith.constant 0xFF800000 : f32
      %98 = vector.broadcast %cst_78 : f32 to vector<2x8x1xf32>
      %c0_79 = arith.constant 0 : index
      %c0_80 = arith.constant 0 : index
      %c0_81 = arith.constant 0 : index
      %99 = vector.load %arg8[%c0_79, %c0_80, %c0_81] : memref<2x8x1xf32, #tpu.memory_space<vmem>>, vector<2x8x1xf32>
      tpu.vector_store %arg8[%c0_79, %c0_80, %c0_81], %98 {strides = array<i32>} : memref<2x8x1xf32, #tpu.memory_space<vmem>>, vector<2x8x1xf32>,
      %cst_82 = arith.constant 0.000000e+00 : f32
      %100 = vector.broadcast %cst_82 : f32 to vector<2x8x1xf32>
      %c0_83 = arith.constant 0 : index
      %c0_84 = arith.constant 0 : index
      %c0_85 = arith.constant 0 : index
      %101 = vector.load %arg9[%c0_83, %c0_84, %c0_85] : memref<2x8x1xf32, #tpu.memory_space<vmem>>, vector<2x8x1xf32>
      tpu.vector_store %arg9[%c0_83, %c0_84, %c0_85], %100 {strides = array<i32>} : memref<2x8x1xf32, #tpu.memory_space<vmem>>, vector<2x8x1xf32>,
      %cst_86 = arith.constant 0.000000e+00 : f32
      %102 = vector.broadcast %cst_86 : f32 to vector<2x8x16xf32>
      %c0_87 = arith.constant 0 : index
      %c0_88 = arith.constant 0 : index
      %c0_89 = arith.constant 0 : index
      %103 = vector.load %arg10[%c0_87, %c0_88, %c0_89] : memref<2x8x16xf32, #tpu.memory_space<vmem>>, vector<2x8x16xf32>
      tpu.vector_store %arg10[%c0_87, %c0_88, %c0_89], %102 {strides = array<i32>} : memref<2x8x16xf32, #tpu.memory_space<vmem>>, vector<2x8x16xf32>,
    } else {
    }
    %c8_i32 = arith.constant 8 : i32
    %3 = arith.muli %arg3, %c8_i32 : i32
    %4 = tpu.iota {dimensions = array<i32: 1>} : vector<8x8xi32>
    %5 = vector.broadcast %3 : i32 to vector<8x8xi32>
    %6 = arith.addi %5, %4 : vector<8x8xi32>
    %c5_i32 = arith.constant 5 : i32
    %7 = vector.broadcast %c5_i32 : i32 to vector<8x8xi32>
    %8 = arith.cmpi slt, %6, %7 : vector<8x8xi32>
    %c0 = arith.constant 0 : index
    %c0_1 = arith.constant 0 : index
    %c0_2 = arith.constant 0 : index
    %c0_3 = arith.constant 0 : index
    %c0_4 = arith.constant 0 : index
    %9 = vector.load %arg4[%c0, %c0_1, %c0_2, %c0_3, %c0_4] : memref<1x8x1x2x16xbf16, #tpu.memory_space<vmem>>, vector<1x8x1x1x16xbf16>
    %10 = vector.shape_cast %9 : vector<1x8x1x1x16xbf16> to vector<8x16xbf16>
    %c0_5 = arith.constant 0 : index
    %c0_6 = arith.constant 0 : index
    %c0_7 = arith.constant 0 : index
    %c0_8 = arith.constant 0 : index
    %c0_9 = arith.constant 0 : index
    %11 = vector.load %arg5[%c0_5, %c0_6, %c0_7, %c0_8, %c0_9] : memref<1x8x1x2x16xbf16, #tpu.memory_space<vmem>>, vector<1x8x1x1x16xbf16>
    %12 = vector.shape_cast %11 : vector<1x8x1x1x16xbf16> to vector<8x16xbf16>
    %c0_10 = arith.constant 0 : index
    %c0_11 = arith.constant 0 : index
    %c0_12 = arith.constant 0 : index
    %c0_13 = arith.constant 0 : index
    %c0_14 = arith.constant 0 : index
    %13 = vector.load %arg6[%c0_10, %c0_11, %c0_12, %c0_13, %c0_14] : memref<1x8x1x2x16xbf16, #tpu.memory_space<vmem>>, vector<1x8x1x1x16xbf16>
    %14 = vector.shape_cast %13 : vector<1x8x1x1x16xbf16> to vector<8x16xbf16>
    %cst = arith.constant dense<0.000000e+00> : vector<8x8xf32>
    %15 = tpu.matmul %10, %12, %cst {dimension_numbers = #tpu.dot_dimension_numbers<[1], [1], [0], [0], [0, 0, 1, 0], [], []>} : vector<8x16xbf16>, vector<8x16xbf16>, vector<8x8xf32> -> vector<8x8xf32>
    %cst_15 = arith.constant 2.500000e-01 : f32
    %16 = vector.broadcast %cst_15 : f32 to vector<8x8xf32>
    %17 = arith.mulf %15, %16 : vector<8x8xf32>
    %cst_16 = arith.constant -1.000000e+30 : f32
    %18 = vector.broadcast %cst_16 : f32 to vector<8x8xf32>
    %19 = arith.select %8, %17, %18 : vector<8x8xi1>, vector<8x8xf32>
    %c0_17 = arith.constant 0 : index
    %c0_18 = arith.constant 0 : index
    %c0_19 = arith.constant 0 : index
    %20 = vector.load %arg8[%c0_17, %c0_18, %c0_19] : memref<2x8x1xf32, #tpu.memory_space<vmem>>, vector<1x8x1xf32>
    %21 = vector.shape_cast %20 : vector<1x8x1xf32> to vector<8x1xf32>
    %cst_20 = arith.constant dense<0xFF800000> : vector<8xf32>
    %22 = vector.multi_reduction <maximumf>, %19, %cst_20 [1] : vector<8x8xf32> to vector<8xf32>
    %23 = vector.shape_cast %22 : vector<8xf32> to vector<8x1xf32>
    %24 = arith.maximumf %21, %23 : vector<8x1xf32>
    %25 = arith.subf %21, %24 : vector<8x1xf32>
    %26 = math.exp %25 : vector<8x1xf32>
    %27 = vector.broadcast %24 : vector<8x1xf32> to vector<8x8xf32>
    %28 = arith.subf %19, %27 : vector<8x8xf32>
    %29 = math.exp %28 : vector<8x8xf32>
    %c0_21 = arith.constant 0 : index
    %c0_22 = arith.constant 0 : index
    %c0_23 = arith.constant 0 : index
    %30 = vector.load %arg9[%c0_21, %c0_22, %c0_23] : memref<2x8x1xf32, #tpu.memory_space<vmem>>, vector<1x8x1xf32>
    %31 = vector.shape_cast %30 : vector<1x8x1xf32> to vector<8x1xf32>
    %32 = arith.mulf %26, %31 : vector<8x1xf32>
    %cst_24 = arith.constant dense<0.000000e+00> : vector<8xf32>
    %33 = vector.multi_reduction <add>, %29, %cst_24 [1] : vector<8x8xf32> to vector<8xf32>
    %34 = vector.shape_cast %33 : vector<8xf32> to vector<8x1xf32>
    %35 = arith.addf %32, %34 : vector<8x1xf32>
    %c0_25 = arith.constant 0 : index
    %c0_26 = arith.constant 0 : index
    %c0_27 = arith.constant 0 : index
    %36 = vector.load %arg9[%c0_25, %c0_26, %c0_27] : memref<2x8x1xf32, #tpu.memory_space<vmem>>, vector<1x8x1xf32>
    %37 = vector.shape_cast %36 : vector<1x8x1xf32> to vector<8x1xf32>
    %38 = vector.shape_cast %35 : vector<8x1xf32> to vector<1x8x1xf32>
    tpu.vector_store %arg9[%c0_25, %c0_26, %c0_27], %38 {strides = array<i32>} : memref<2x8x1xf32, #tpu.memory_space<vmem>>, vector<1x8x1xf32>,
    %c0_28 = arith.constant 0 : index
    %c0_29 = arith.constant 0 : index
    %c0_30 = arith.constant 0 : index
    %39 = vector.load %arg10[%c0_28, %c0_29, %c0_30] : memref<2x8x16xf32, #tpu.memory_space<vmem>>, vector<1x8x16xf32>
    %40 = vector.shape_cast %39 : vector<1x8x16xf32> to vector<8x16xf32>
    %41 = vector.broadcast %26 : vector<8x1xf32> to vector<8x16xf32>
    %42 = arith.mulf %41, %40 : vector<8x16xf32>
    %43 = arith.truncf %29 : vector<8x8xf32> to vector<8x8xbf16>
    %cst_31 = arith.constant dense<0.000000e+00> : vector<8x16xf32>
    %44 = tpu.matmul %43, %14, %cst_31 {dimension_numbers = #tpu.dot_dimension_numbers<[1], [0], [0], [1], [0, 0, 1, 1], [], []>} : vector<8x8xbf16>, vector<8x16xbf16>, vector<8x16xf32> -> vector<8x16xf32>
    %45 = arith.addf %42, %44 : vector<8x16xf32>
    %c0_32 = arith.constant 0 : index
    %c0_33 = arith.constant 0 : index
    %c0_34 = arith.constant 0 : index
    %46 = vector.load %arg10[%c0_32, %c0_33, %c0_34] : memref<2x8x16xf32, #tpu.memory_space<vmem>>, vector<1x8x16xf32>
    %47 = vector.shape_cast %46 : vector<1x8x16xf32> to vector<8x16xf32>
    %48 = vector.shape_cast %45 : vector<8x16xf32> to vector<1x8x16xf32>
    tpu.vector_store %arg10[%c0_32, %c0_33, %c0_34], %48 {strides = array<i32>} : memref<2x8x16xf32, #tpu.memory_space<vmem>>, vector<1x8x16xf32>,
    %c0_35 = arith.constant 0 : index
    %c0_36 = arith.constant 0 : index
    %c0_37 = arith.constant 0 : index
    %49 = vector.load %arg8[%c0_35, %c0_36, %c0_37] : memref<2x8x1xf32, #tpu.memory_space<vmem>>, vector<1x8x1xf32>
    %50 = vector.shape_cast %49 : vector<1x8x1xf32> to vector<8x1xf32>
    %51 = vector.shape_cast %24 : vector<8x1xf32> to vector<1x8x1xf32>
    tpu.vector_store %arg8[%c0_35, %c0_36, %c0_37], %51 {strides = array<i32>} : memref<2x8x1xf32, #tpu.memory_space<vmem>>, vector<1x8x1xf32>,
    %c0_38 = arith.constant 0 : index
    %c0_39 = arith.constant 0 : index
    %c0_40 = arith.constant 0 : index
    %c1 = arith.constant 1 : index
    %c0_41 = arith.constant 0 : index
    %52 = vector.load %arg4[%c0_38, %c0_39, %c0_40, %c1, %c0_41] : memref<1x8x1x2x16xbf16, #tpu.memory_space<vmem>>, vector<1x8x1x1x16xbf16>
    %53 = vector.shape_cast %52 : vector<1x8x1x1x16xbf16> to vector<8x16xbf16>
    %c0_42 = arith.constant 0 : index
    %c0_43 = arith.constant 0 : index
    %c0_44 = arith.constant 0 : index
    %c1_45 = arith.constant 1 : index
    %c0_46 = arith.constant 0 : index
    %54 = vector.load %arg5[%c0_42, %c0_43, %c0_44, %c1_45, %c0_46] : memref<1x8x1x2x16xbf16, #tpu.memory_space<vmem>>, vector<1x8x1x1x16xbf16>
    %55 = vector.shape_cast %54 : vector<1x8x1x1x16xbf16> to vector<8x16xbf16>
    %c0_47 = arith.constant 0 : index
    %c0_48 = arith.constant 0 : index
    %c0_49 = arith.constant 0 : index
    %c1_50 = arith.constant 1 : index
    %c0_51 = arith.constant 0 : index
    %56 = vector.load %arg6[%c0_47, %c0_48, %c0_49, %c1_50, %c0_51] : memref<1x8x1x2x16xbf16, #tpu.memory_space<vmem>>, vector<1x8x1x1x16xbf16>
    %57 = vector.shape_cast %56 : vector<1x8x1x1x16xbf16> to vector<8x16xbf16>
    %cst_52 = arith.constant dense<0.000000e+00> : vector<8x8xf32>
    %58 = tpu.matmul %53, %55, %cst_52 {dimension_numbers = #tpu.dot_dimension_numbers<[1], [1], [0], [0], [0, 0, 1, 0], [], []>} : vector<8x16xbf16>, vector<8x16xbf16>, vector<8x8xf32> -> vector<8x8xf32>
    %cst_53 = arith.constant 2.500000e-01 : f32
    %59 = vector.broadcast %cst_53 : f32 to vector<8x8xf32>
    %60 = arith.mulf %58, %59 : vector<8x8xf32>
    %cst_54 = arith.constant -1.000000e+30 : f32
    %61 = vector.broadcast %cst_54 : f32 to vector<8x8xf32>
    %62 = arith.select %8, %60, %61 : vector<8x8xi1>, vector<8x8xf32>
    %c1_55 = arith.constant 1 : index
    %c0_56 = arith.constant 0 : index
    %c0_57 = arith.constant 0 : index
    %63 = vector.load %arg8[%c1_55, %c0_56, %c0_57] : memref<2x8x1xf32, #tpu.memory_space<vmem>>, vector<1x8x1xf32>
    %64 = vector.shape_cast %63 : vector<1x8x1xf32> to vector<8x1xf32>
    %cst_58 = arith.constant dense<0xFF800000> : vector<8xf32>
    %65 = vector.multi_reduction <maximumf>, %62, %cst_58 [1] : vector<8x8xf32> to vector<8xf32>
    %66 = vector.shape_cast %65 : vector<8xf32> to vector<8x1xf32>
    %67 = arith.maximumf %64, %66 : vector<8x1xf32>
    %68 = arith.subf %64, %67 : vector<8x1xf32>
    %69 = math.exp %68 : vector<8x1xf32>
    %70 = vector.broadcast %67 : vector<8x1xf32> to vector<8x8xf32>
    %71 = arith.subf %62, %70 : vector<8x8xf32>
    %72 = math.exp %71 : vector<8x8xf32>
    %c1_59 = arith.constant 1 : index
    %c0_60 = arith.constant 0 : index
    %c0_61 = arith.constant 0 : index
    %73 = vector.load %arg9[%c1_59, %c0_60, %c0_61] : memref<2x8x1xf32, #tpu.memory_space<vmem>>, vector<1x8x1xf32>
    %74 = vector.shape_cast %73 : vector<1x8x1xf32> to vector<8x1xf32>
    %75 = arith.mulf %69, %74 : vector<8x1xf32>
    %cst_62 = arith.constant dense<0.000000e+00> : vector<8xf32>
    %76 = vector.multi_reduction <add>, %72, %cst_62 [1] : vector<8x8xf32> to vector<8xf32>
    %77 = vector.shape_cast %76 : vector<8xf32> to vector<8x1xf32>
    %78 = arith.addf %75, %77 : vector<8x1xf32>
    %c1_63 = arith.constant 1 : index
    %c0_64 = arith.constant 0 : index
    %c0_65 = arith.constant 0 : index
    %79 = vector.load %arg9[%c1_63, %c0_64, %c0_65] : memref<2x8x1xf32, #tpu.memory_space<vmem>>, vector<1x8x1xf32>
    %80 = vector.shape_cast %79 : vector<1x8x1xf32> to vector<8x1xf32>
    %81 = vector.shape_cast %78 : vector<8x1xf32> to vector<1x8x1xf32>
    tpu.vector_store %arg9[%c1_63, %c0_64, %c0_65], %81 {strides = array<i32>} : memref<2x8x1xf32, #tpu.memory_space<vmem>>, vector<1x8x1xf32>,
    %c1_66 = arith.constant 1 : index
    %c0_67 = arith.constant 0 : index
    %c0_68 = arith.constant 0 : index
    %82 = vector.load %arg10[%c1_66, %c0_67, %c0_68] : memref<2x8x16xf32, #tpu.memory_space<vmem>>, vector<1x8x16xf32>
    %83 = vector.shape_cast %82 : vector<1x8x16xf32> to vector<8x16xf32>
    %84 = vector.broadcast %69 : vector<8x1xf32> to vector<8x16xf32>
    %85 = arith.mulf %84, %83 : vector<8x16xf32>
    %86 = arith.truncf %72 : vector<8x8xf32> to vector<8x8xbf16>
    %cst_69 = arith.constant dense<0.000000e+00> : vector<8x16xf32>
    %87 = tpu.matmul %86, %57, %cst_69 {dimension_numbers = #tpu.dot_dimension_numbers<[1], [0], [0], [1], [0, 0, 1, 1], [], []>} : vector<8x8xbf16>, vector<8x16xbf16>, vector<8x16xf32> -> vector<8x16xf32>
    %88 = arith.addf %85, %87 : vector<8x16xf32>
    %c1_70 = arith.constant 1 : index
    %c0_71 = arith.constant 0 : index
    %c0_72 = arith.constant 0 : index
    %89 = vector.load %arg10[%c1_70, %c0_71, %c0_72] : memref<2x8x16xf32, #tpu.memory_space<vmem>>, vector<1x8x16xf32>
    %90 = vector.shape_cast %89 : vector<1x8x16xf32> to vector<8x16xf32>
    %91 = vector.shape_cast %88 : vector<8x16xf32> to vector<1x8x16xf32>
    tpu.vector_store %arg10[%c1_70, %c0_71, %c0_72], %91 {strides = array<i32>} : memref<2x8x16xf32, #tpu.memory_space<vmem>>, vector<1x8x16xf32>,
    %c1_73 = arith.constant 1 : index
    %c0_74 = arith.constant 0 : index
    %c0_75 = arith.constant 0 : index
    %92 = vector.load %arg8[%c1_73, %c0_74, %c0_75] : memref<2x8x1xf32, #tpu.memory_space<vmem>>, vector<1x8x1xf32>
    %93 = vector.shape_cast %92 : vector<1x8x1xf32> to vector<8x1xf32>
    %94 = vector.shape_cast %67 : vector<8x1xf32> to vector<1x8x1xf32>
    tpu.vector_store %arg8[%c1_73, %c0_74, %c0_75], %94 {strides = array<i32>} : memref<2x8x1xf32, #tpu.memory_space<vmem>>, vector<1x8x1xf32>,
    %c0_i32_76 = arith.constant 0 : i32
    %95 = arith.cmpi eq, %arg3, %c0_i32_76 : i32
    %96 = arith.extui %95 : i1 to i32
    %c0_i32_77 = arith.constant 0 : i32
    %97 = arith.cmpi ne, %96, %c0_i32_77 : i32
    scf.if %97 {
      %c0_78 = arith.constant 0 : index
      %c0_79 = arith.constant 0 : index
      %c0_80 = arith.constant 0 : index
      %98 = vector.load %arg9[%c0_78, %c0_79, %c0_80] : memref<2x8x1xf32, #tpu.memory_space<vmem>>, vector<1x8x1xf32>
      %99 = vector.shape_cast %98 : vector<1x8x1xf32> to vector<8x1xf32>
      %100 = tpu.reciprocal %99 {approx = true} : vector<8x1xf32> -> vector<8x1xf32>
      %c0_81 = arith.constant 0 : index
      %c0_82 = arith.constant 0 : index
      %c0_83 = arith.constant 0 : index
      %101 = vector.load %arg10[%c0_81, %c0_82, %c0_83] : memref<2x8x16xf32, #tpu.memory_space<vmem>>, vector<1x8x16xf32>
      %102 = vector.shape_cast %101 : vector<1x8x16xf32> to vector<8x16xf32>
      %103 = vector.broadcast %100 : vector<8x1xf32> to vector<8x16xf32>
      %104 = arith.mulf %102, %103 : vector<8x16xf32>
      %c1_84 = arith.constant 1 : index
      %c0_85 = arith.constant 0 : index
      %c0_86 = arith.constant 0 : index
      %105 = vector.load %arg9[%c1_84, %c0_85, %c0_86] : memref<2x8x1xf32, #tpu.memory_space<vmem>>, vector<1x8x1xf32>
      %106 = vector.shape_cast %105 : vector<1x8x1xf32> to vector<8x1xf32>
      %107 = tpu.reciprocal %106 {approx = true} : vector<8x1xf32> -> vector<8x1xf32>
      %c1_87 = arith.constant 1 : index
      %c0_88 = arith.constant 0 : index
      %c0_89 = arith.constant 0 : index
      %108 = vector.load %arg10[%c1_87, %c0_88, %c0_89] : memref<2x8x16xf32, #tpu.memory_space<vmem>>, vector<1x8x16xf32>
      %109 = vector.shape_cast %108 : vector<1x8x16xf32> to vector<8x16xf32>
      %110 = vector.broadcast %107 : vector<8x1xf32> to vector<8x16xf32>
      %111 = arith.mulf %109, %110 : vector<8x16xf32>
      %112 = tpu.concatenate %104, %111 in 1 : vector<8x16xf32>, vector<8x16xf32> -> vector<8x32xf32>
      %113 = arith.truncf %112 : vector<8x32xf32> to vector<8x32xbf16>
      %c0_90 = arith.constant 0 : index
      %c0_91 = arith.constant 0 : index
      %c0_92 = arith.constant 0 : index
      %114 = vector.load %arg7[%c0_90, %c0_91, %c0_92] : memref<1x8x32xbf16, #tpu.memory_space<vmem>>, vector<1x8x32xbf16>
      %115 = vector.shape_cast %114 : vector<1x8x32xbf16> to vector<8x32xbf16>
      %116 = vector.shape_cast %113 : vector<8x32xbf16> to vector<1x8x32xbf16>
      tpu.vector_store %arg7[%c0_90, %c0_91, %c0_92], %116 {strides = array<i32>} : memref<1x8x32xbf16, #tpu.memory_space<vmem>>, vector<1x8x32xbf16>,
    } else {
    }
    return
  }
  func.func @transform_0(%arg0: i32, %arg1: i32, %arg2: i32, %arg3: i32) -> (i32, i32, i32, i32, i32) {
    %c0_i32 = arith.constant 0 : i32
    %c0_i32_0 = arith.constant 0 : i32
    %c0_i32_1 = arith.constant 0 : i32
    return %arg0, %arg2, %arg1, %c0_i32, %c0_i32_0 : i32, i32, i32, i32, i32
  }
  func.func @transform_1(%arg0: i32, %arg1: i32, %arg2: i32, %arg3: i32) -> (i32, i32, i32, i32, i32) {
    %c1_i32 = arith.constant 1 : i32
    %0 = arith.addi %c1_i32, %arg1 : i32
    %c0_i32 = arith.constant 0 : i32
    %c0_i32_0 = arith.constant 0 : i32
    %c0_i32_1 = arith.constant 0 : i32
    return %arg0, %arg3, %0, %c0_i32, %c0_i32_0 : i32, i32, i32, i32, i32
  }
  func.func @transform_2(%arg0: i32, %arg1: i32, %arg2: i32, %arg3: i32) -> (i32, i32, i32, i32, i32) {
    %c2_i32 = arith.constant 2 : i32
    %0 = arith.addi %c2_i32, %arg1 : i32
    %c0_i32 = arith.constant 0 : i32
    %c0_i32_0 = arith.constant 0 : i32
    %c0_i32_1 = arith.constant 0 : i32
    return %arg0, %arg3, %0, %c0_i32, %c0_i32_0 : i32, i32, i32, i32, i32
  }
  func.func @transform_3(%arg0: i32, %arg1: i32, %arg2: i32, %arg3: i32) -> (i32, i32, i32) {
    %c0_i32 = arith.constant 0 : i32
    return %arg0, %arg2, %arg1 : i32, i32, i32
  }
}

module attributes {stable_mosaic.version = 11 : i64} {
  func.func @_fused_matmul_kernel(%arg0: i32, %arg1: i32, %arg2: memref<16x32xbf16, #tpu.memory_space<vmem>>, %arg3: memref<32x32xbf16, #tpu.memory_space<vmem>>, %arg4: memref<1x32xf32, #tpu.memory_space<vmem>>, %arg5: memref<16x32xf32, #tpu.memory_space<vmem>>, %arg6: memref<16x32xf32, #tpu.memory_space<vmem>>) attributes {dimension_semantics = [#tpu.dimension_semantics<parallel>, #tpu.dimension_semantics<parallel>], iteration_bounds = array<i64: 1, 1>, scalar_prefetch = 0 : i64, scratch_operands = 0 : i64, tpu.core_type = #tpu.core_type<tc>, window_params = [{transform_indices = @transform_0, window_bounds = array<i64: 16, 32>}, {transform_indices = @transform_1, window_bounds = array<i64: 32, 32>}, {transform_indices = @transform_2, window_bounds = array<i64: 1, 32>}, {transform_indices = @transform_3, window_bounds = array<i64: 16, 32>}, {transform_indices = @transform_4, window_bounds = array<i64: 16, 32>}]} {
    %c0 = arith.constant 0 : index
    %c0_0 = arith.constant 0 : index
    %0 = vector.load %arg2[%c0, %c0_0] : memref<16x32xbf16, #tpu.memory_space<vmem>>, vector<16x32xbf16>
    %c0_1 = arith.constant 0 : index
    %c0_2 = arith.constant 0 : index
    %1 = vector.load %arg3[%c0_1, %c0_2] : memref<32x32xbf16, #tpu.memory_space<vmem>>, vector<32x32xbf16>
    %cst = arith.constant dense<0.000000e+00> : vector<16x32xf32>
    %2 = tpu.matmul %0, %1, %cst {dimension_numbers = #tpu.dot_dimension_numbers<[1], [0], [0], [1], [0, 0, 1, 1], [], []>} : vector<16x32xbf16>, vector<32x32xbf16>, vector<16x32xf32> -> vector<16x32xf32>
    %c0_3 = arith.constant 0 : index
    %c0_4 = arith.constant 0 : index
    %3 = vector.load %arg4[%c0_3, %c0_4] : memref<1x32xf32, #tpu.memory_space<vmem>>, vector<1x32xf32>
    %4 = vector.broadcast %3 : vector<1x32xf32> to vector<16x32xf32>
    %5 = arith.addf %2, %4 : vector<16x32xf32>
    %c0_5 = arith.constant 0 : index
    %c0_6 = arith.constant 0 : index
    %6 = vector.load %arg5[%c0_5, %c0_6] : memref<16x32xf32, #tpu.memory_space<vmem>>, vector<16x32xf32>
    %7 = arith.addf %5, %6 : vector<16x32xf32>
    %c0_7 = arith.constant 0 : index
    %c0_8 = arith.constant 0 : index
    %8 = vector.load %arg6[%c0_7, %c0_8] : memref<16x32xf32, #tpu.memory_space<vmem>>, vector<16x32xf32>
    tpu.vector_store %arg6[%c0_7, %c0_8], %7 {strides = array<i32>} : memref<16x32xf32, #tpu.memory_space<vmem>>, vector<16x32xf32>,
    return
  }
  func.func @transform_0(%arg0: i32, %arg1: i32) -> (i32, i32) {
    %c0_i32 = arith.constant 0 : i32
    %c0_i32_0 = arith.constant 0 : i32
    return %arg0, %c0_i32 : i32, i32
  }
  func.func @transform_1(%arg0: i32, %arg1: i32) -> (i32, i32) {
    %c0_i32 = arith.constant 0 : i32
    %c0_i32_0 = arith.constant 0 : i32
    return %c0_i32, %arg1 : i32, i32
  }
  func.func @transform_2(%arg0: i32, %arg1: i32) -> (i32, i32) {
    %c0_i32 = arith.constant 0 : i32
    %c0_i32_0 = arith.constant 0 : i32
    return %c0_i32, %arg1 : i32, i32
  }
  func.func @transform_3(%arg0: i32, %arg1: i32) -> (i32, i32) {
    %c0_i32 = arith.constant 0 : i32
    return %arg0, %arg1 : i32, i32
  }
  func.func @transform_4(%arg0: i32, %arg1: i32) -> (i32, i32) {
    %c0_i32 = arith.constant 0 : i32
    return %arg0, %arg1 : i32, i32
  }
}

module attributes {stable_mosaic.version = 11 : i64} {
  func.func @_fused_matmul_kernel(%arg0: i32, %arg1: i32, %arg2: memref<16x128xbf16, #tpu.memory_space<vmem>>, %arg3: memref<128x32xbf16, #tpu.memory_space<vmem>>, %arg4: memref<1x32xf32, #tpu.memory_space<vmem>>, %arg5: memref<16x32xf32, #tpu.memory_space<vmem>>, %arg6: memref<16x32xf32, #tpu.memory_space<vmem>>) attributes {dimension_semantics = [#tpu.dimension_semantics<parallel>, #tpu.dimension_semantics<parallel>], iteration_bounds = array<i64: 1, 1>, scalar_prefetch = 0 : i64, scratch_operands = 0 : i64, tpu.core_type = #tpu.core_type<tc>, window_params = [{transform_indices = @transform_0, window_bounds = array<i64: 16, 128>}, {transform_indices = @transform_1, window_bounds = array<i64: 128, 32>}, {transform_indices = @transform_2, window_bounds = array<i64: 1, 32>}, {transform_indices = @transform_3, window_bounds = array<i64: 16, 32>}, {transform_indices = @transform_4, window_bounds = array<i64: 16, 32>}]} {
    %c0 = arith.constant 0 : index
    %c0_0 = arith.constant 0 : index
    %0 = vector.load %arg2[%c0, %c0_0] : memref<16x128xbf16, #tpu.memory_space<vmem>>, vector<16x128xbf16>
    %c0_1 = arith.constant 0 : index
    %c0_2 = arith.constant 0 : index
    %1 = vector.load %arg3[%c0_1, %c0_2] : memref<128x32xbf16, #tpu.memory_space<vmem>>, vector<128x32xbf16>
    %cst = arith.constant dense<0.000000e+00> : vector<16x32xf32>
    %2 = tpu.matmul %0, %1, %cst {dimension_numbers = #tpu.dot_dimension_numbers<[1], [0], [0], [1], [0, 0, 1, 1], [], []>} : vector<16x128xbf16>, vector<128x32xbf16>, vector<16x32xf32> -> vector<16x32xf32>
    %c0_3 = arith.constant 0 : index
    %c0_4 = arith.constant 0 : index
    %3 = vector.load %arg4[%c0_3, %c0_4] : memref<1x32xf32, #tpu.memory_space<vmem>>, vector<1x32xf32>
    %4 = vector.broadcast %3 : vector<1x32xf32> to vector<16x32xf32>
    %5 = arith.addf %2, %4 : vector<16x32xf32>
    %c0_5 = arith.constant 0 : index
    %c0_6 = arith.constant 0 : index
    %6 = vector.load %arg5[%c0_5, %c0_6] : memref<16x32xf32, #tpu.memory_space<vmem>>, vector<16x32xf32>
    %7 = arith.addf %5, %6 : vector<16x32xf32>
    %c0_7 = arith.constant 0 : index
    %c0_8 = arith.constant 0 : index
    %8 = vector.load %arg6[%c0_7, %c0_8] : memref<16x32xf32, #tpu.memory_space<vmem>>, vector<16x32xf32>
    tpu.vector_store %arg6[%c0_7, %c0_8], %7 {strides = array<i32>} : memref<16x32xf32, #tpu.memory_space<vmem>>, vector<16x32xf32>,
    return
  }
  func.func @transform_0(%arg0: i32, %arg1: i32) -> (i32, i32) {
    %c0_i32 = arith.constant 0 : i32
    %c0_i32_0 = arith.constant 0 : i32
    return %arg0, %c0_i32 : i32, i32
  }
  func.func @transform_1(%arg0: i32, %arg1: i32) -> (i32, i32) {
    %c0_i32 = arith.constant 0 : i32
    %c0_i32_0 = arith.constant 0 : i32
    return %c0_i32, %arg1 : i32, i32
  }
  func.func @transform_2(%arg0: i32, %arg1: i32) -> (i32, i32) {
    %c0_i32 = arith.constant 0 : i32
    %c0_i32_0 = arith.constant 0 : i32
    return %c0_i32, %arg1 : i32, i32
  }
  func.func @transform_3(%arg0: i32, %arg1: i32) -> (i32, i32) {
    %c0_i32 = arith.constant 0 : i32
    return %arg0, %arg1 : i32, i32
  }
  func.func @transform_4(%arg0: i32, %arg1: i32) -> (i32, i32) {
    %c0_i32 = arith.constant 0 : i32
    return %arg0, %arg1 : i32, i32
  }
}

module attributes {stable_mosaic.version = 11 : i64} {
  func.func @_fused_matmul_kernel(%arg0: i32, %arg1: i32, %arg2: memref<16x32xf32, #tpu.memory_space<vmem>>, %arg3: memref<32x128xbf16, #tpu.memory_space<vmem>>, %arg4: memref<1x128xf32, #tpu.memory_space<vmem>>, %arg5: memref<1x32xf32, #tpu.memory_space<vmem>>, %arg6: memref<1x32xf32, #tpu.memory_space<vmem>>, %arg7: memref<16x128xbf16, #tpu.memory_space<vmem>>) attributes {dimension_semantics = [#tpu.dimension_semantics<parallel>, #tpu.dimension_semantics<parallel>], iteration_bounds = array<i64: 1, 1>, scalar_prefetch = 0 : i64, scratch_operands = 0 : i64, tpu.core_type = #tpu.core_type<tc>, window_params = [{transform_indices = @transform_0, window_bounds = array<i64: 16, 32>}, {transform_indices = @transform_1, window_bounds = array<i64: 32, 128>}, {transform_indices = @transform_2, window_bounds = array<i64: 1, 128>}, {pipeline_mode = #tpu.pipeline_mode<synchronous>, transform_indices = @transform_3, window_bounds = array<i64: 1, 32>}, {pipeline_mode = #tpu.pipeline_mode<synchronous>, transform_indices = @transform_4, window_bounds = array<i64: 1, 32>}, {transform_indices = @transform_5, window_bounds = array<i64: 16, 128>}]} {
    %c0 = arith.constant 0 : index
    %c0_0 = arith.constant 0 : index
    %0 = vector.load %arg2[%c0, %c0_0] : memref<16x32xf32, #tpu.memory_space<vmem>>, vector<16x32xf32>
    %cst = arith.constant dense<0.000000e+00> : vector<16xf32>
    %1 = vector.multi_reduction <add>, %0, %cst [1] : vector<16x32xf32> to vector<16xf32>
    %2 = vector.shape_cast %1 : vector<16xf32> to vector<16x1xf32>
    %cst_1 = arith.constant 3.200000e+01 : f32
    %3 = vector.broadcast %cst_1 : f32 to vector<16x1xf32>
    %4 = arith.divf %2, %3 : vector<16x1xf32>
    %5 = vector.broadcast %4 : vector<16x1xf32> to vector<16x32xf32>
    %6 = arith.subf %0, %5 : vector<16x32xf32>
    %7 = arith.mulf %6, %6 : vector<16x32xf32>
    %cst_2 = arith.constant dense<0.000000e+00> : vector<16xf32>
    %8 = vector.multi_reduction <add>, %7, %cst_2 [1] : vector<16x32xf32> to vector<16xf32>
    %9 = vector.shape_cast %8 : vector<16xf32> to vector<16x1xf32>
    %cst_3 = arith.constant 3.200000e+01 : f32
    %10 = vector.broadcast %cst_3 : f32 to vector<16x1xf32>
    %11 = arith.divf %9, %10 : vector<16x1xf32>
    %cst_4 = arith.constant 9.99999974E-6 : f32
    %12 = vector.broadcast %cst_4 : f32 to vector<16x1xf32>
    %13 = arith.addf %11, %12 : vector<16x1xf32>
    %14 = math.rsqrt %13 : vector<16x1xf32>
    %15 = vector.broadcast %14 : vector<16x1xf32> to vector<16x32xf32>
    %16 = arith.mulf %6, %15 : vector<16x32xf32>
    %c0_5 = arith.constant 0 : index
    %c0_6 = arith.constant 0 : index
    %17 = vector.load %arg5[%c0_5, %c0_6] : memref<1x32xf32, #tpu.memory_space<vmem>>, vector<1x32xf32>
    %18 = vector.broadcast %17 : vector<1x32xf32> to vector<16x32xf32>
    %19 = arith.mulf %16, %18 : vector<16x32xf32>
    %c0_7 = arith.constant 0 : index
    %c0_8 = arith.constant 0 : index
    %20 = vector.load %arg6[%c0_7, %c0_8] : memref<1x32xf32, #tpu.memory_space<vmem>>, vector<1x32xf32>
    %21 = vector.broadcast %20 : vector<1x32xf32> to vector<16x32xf32>
    %22 = arith.addf %19, %21 : vector<16x32xf32>
    %23 = arith.truncf %22 : vector<16x32xf32> to vector<16x32xbf16>
    %c0_9 = arith.constant 0 : index
    %c0_10 = arith.constant 0 : index
    %24 = vector.load %arg3[%c0_9, %c0_10] : memref<32x128xbf16, #tpu.memory_space<vmem>>, vector<32x128xbf16>
    %cst_11 = arith.constant dense<0.000000e+00> : vector<16x128xf32>
    %25 = tpu.matmul %23, %24, %cst_11 {dimension_numbers = #tpu.dot_dimension_numbers<[1], [0], [0], [1], [0, 0, 1, 1], [], []>} : vector<16x32xbf16>, vector<32x128xbf16>, vector<16x128xf32> -> vector<16x128xf32>
    %c0_12 = arith.constant 0 : index
    %c0_13 = arith.constant 0 : index
    %26 = vector.load %arg4[%c0_12, %c0_13] : memref<1x128xf32, #tpu.memory_space<vmem>>, vector<1x128xf32>
    %27 = vector.broadcast %26 : vector<1x128xf32> to vector<16x128xf32>
    %28 = arith.addf %25, %27 : vector<16x128xf32>
    %cst_14 = arith.constant 5.000000e-01 : f32
    %29 = vector.broadcast %cst_14 : f32 to vector<16x128xf32>
    %30 = arith.mulf %29, %28 : vector<16x128xf32>
    %cst_15 = arith.constant 0.707106769 : f32
    %31 = vector.broadcast %cst_15 : f32 to vector<16x128xf32>
    %32 = arith.mulf %28, %31 : vector<16x128xf32>
    %cst_16 = arith.constant 0.000000e+00 : f32
    %33 = vector.broadcast %cst_16 : f32 to vector<16x128xf32>
    %34 = arith.cmpf olt, %32, %33 : vector<16x128xf32>
    %cst_17 = arith.constant -1.000000e+00 : f32
    %cst_18 = arith.constant 1.000000e+00 : f32
    %35 = vector.broadcast %cst_17 : f32 to vector<16x128xf32>
    %36 = vector.broadcast %cst_18 : f32 to vector<16x128xf32>
    %37 = arith.select %34, %35, %36 : vector<16x128xi1>, vector<16x128xf32>
    %38 = math.absf %32 : vector<16x128xf32>
    %cst_19 = arith.constant 0.327591091 : f32
    %39 = vector.broadcast %cst_19 : f32 to vector<16x128xf32>
    %40 = arith.mulf %39, %38 : vector<16x128xf32>
    %cst_20 = arith.constant 1.000000e+00 : f32
    %41 = vector.broadcast %cst_20 : f32 to vector<16x128xf32>
    %42 = arith.addf %41, %40 : vector<16x128xf32>
    %cst_21 = arith.constant 1.000000e+00 : f32
    %43 = vector.broadcast %cst_21 : f32 to vector<16x128xf32>
    %44 = arith.divf %43, %42 : vector<16x128xf32>
    %cst_22 = arith.constant 1.06140542 : f32
    %45 = vector.broadcast %cst_22 : f32 to vector<16x128xf32>
    %46 = arith.mulf %45, %44 : vector<16x128xf32>
    %cst_23 = arith.constant -1.45315206 : f32
    %47 = vector.broadcast %cst_23 : f32 to vector<16x128xf32>
    %48 = arith.addf %46, %47 : vector<16x128xf32>
    %49 = arith.mulf %48, %44 : vector<16x128xf32>
    %cst_24 = arith.constant 1.42141378 : f32
    %50 = vector.broadcast %cst_24 : f32 to vector<16x128xf32>
    %51 = arith.addf %49, %50 : vector<16x128xf32>
    %52 = arith.mulf %51, %44 : vector<16x128xf32>
    %cst_25 = arith.constant -0.284496725 : f32
    %53 = vector.broadcast %cst_25 : f32 to vector<16x128xf32>
    %54 = arith.addf %52, %53 : vector<16x128xf32>
    %55 = arith.mulf %54, %44 : vector<16x128xf32>
    %cst_26 = arith.constant 0.254829586 : f32
    %56 = vector.broadcast %cst_26 : f32 to vector<16x128xf32>
    %57 = arith.addf %55, %56 : vector<16x128xf32>
    %58 = arith.mulf %57, %44 : vector<16x128xf32>
    %cst_27 = arith.constant 0.000000e+00 : f32
    %59 = vector.broadcast %cst_27 : f32 to vector<16x128xf32>
    %60 = arith.subf %59, %38 : vector<16x128xf32>
    %61 = arith.mulf %60, %38 : vector<16x128xf32>
    %62 = math.exp %61 : vector<16x128xf32>
    %63 = arith.mulf %58, %62 : vector<16x128xf32>
    %cst_28 = arith.constant 1.000000e+00 : f32
    %64 = vector.broadcast %cst_28 : f32 to vector<16x128xf32>
    %65 = arith.subf %64, %63 : vector<16x128xf32>
    %66 = arith.mulf %37, %65 : vector<16x128xf32>
    %cst_29 = arith.constant 1.000000e+00 : f32
    %67 = vector.broadcast %cst_29 : f32 to vector<16x128xf32>
    %68 = arith.addf %67, %66 : vector<16x128xf32>
    %69 = arith.mulf %30, %68 : vector<16x128xf32>
    %70 = arith.truncf %69 : vector<16x128xf32> to vector<16x128xbf16>
    %c0_30 = arith.constant 0 : index
    %c0_31 = arith.constant 0 : index
    %71 = vector.load %arg7[%c0_30, %c0_31] : memref<16x128xbf16, #tpu.memory_space<vmem>>, vector<16x128xbf16>
    tpu.vector_store %arg7[%c0_30, %c0_31], %70 {strides = array<i32>} : memref<16x128xbf16, #tpu.memory_space<vmem>>, vector<16x128xbf16>,
    return
  }
  func.func @transform_0(%arg0: i32, %arg1: i32) -> (i32, i32) {
    %c0_i32 = arith.constant 0 : i32
    %c0_i32_0 = arith.constant 0 : i32
    return %arg0, %c0_i32 : i32, i32
  }
  func.func @transform_1(%arg0: i32, %arg1: i32) -> (i32, i32) {
    %c0_i32 = arith.constant 0 : i32
    %c0_i32_0 = arith.constant 0 : i32
    return %c0_i32, %arg1 : i32, i32
  }
  func.func @transform_2(%arg0: i32, %arg1: i32) -> (i32, i32) {
    %c0_i32 = arith.constant 0 : i32
    %c0_i32_0 = arith.constant 0 : i32
    return %c0_i32, %arg1 : i32, i32
  }
  func.func @transform_3(%arg0: i32, %arg1: i32) -> (i32, i32) {
    %c0_i32 = arith.constant 0 : i32
    %c0_i32_0 = arith.constant 0 : i32
    %c0_i32_1 = arith.constant 0 : i32
    return %c0_i32, %c0_i32_0 : i32, i32
  }
  func.func @transform_4(%arg0: i32, %arg1: i32) -> (i32, i32) {
    %c0_i32 = arith.constant 0 : i32
    %c0_i32_0 = arith.constant 0 : i32
    %c0_i32_1 = arith.constant 0 : i32
    return %c0_i32, %c0_i32_0 : i32, i32
  }
  func.func @transform_5(%arg0: i32, %arg1: i32) -> (i32, i32) {
    %c0_i32 = arith.constant 0 : i32
    return %arg0, %arg1 : i32, i32
  }
}

module attributes {stable_mosaic.version = 11 : i64} {
  func.func @_fused_matmul_kernel(%arg0: i32, %arg1: i32, %arg2: memref<8x32xf32, #tpu.memory_space<vmem>>, %arg3: memref<32x64xbf16, #tpu.memory_space<vmem>>, %arg4: memref<1x32xf32, #tpu.memory_space<vmem>>, %arg5: memref<1x32xf32, #tpu.memory_space<vmem>>, %arg6: memref<1x64xf32, #tpu.memory_space<vmem>>, %arg7: memref<1x64xf32, #tpu.memory_space<vmem>>, %arg8: memref<8x64xbf16, #tpu.memory_space<vmem>>) attributes {dimension_semantics = [#tpu.dimension_semantics<parallel>, #tpu.dimension_semantics<parallel>], iteration_bounds = array<i64: 1, 1>, scalar_prefetch = 0 : i64, scratch_operands = 0 : i64, tpu.core_type = #tpu.core_type<tc>, window_params = [{transform_indices = @transform_0, window_bounds = array<i64: 8, 32>}, {transform_indices = @transform_1, window_bounds = array<i64: 32, 64>}, {pipeline_mode = #tpu.pipeline_mode<synchronous>, transform_indices = @transform_2, window_bounds = array<i64: 1, 32>}, {pipeline_mode = #tpu.pipeline_mode<synchronous>, transform_indices = @transform_3, window_bounds = array<i64: 1, 32>}, {transform_indices = @transform_4, window_bounds = array<i64: 1, 64>}, {transform_indices = @transform_5, window_bounds = array<i64: 1, 64>}, {transform_indices = @transform_6, window_bounds = array<i64: 8, 64>}]} {
    %c0 = arith.constant 0 : index
    %c0_0 = arith.constant 0 : index
    %0 = vector.load %arg2[%c0, %c0_0] : memref<8x32xf32, #tpu.memory_space<vmem>>, vector<8x32xf32>
    %cst = arith.constant dense<0.000000e+00> : vector<8xf32>
    %1 = vector.multi_reduction <add>, %0, %cst [1] : vector<8x32xf32> to vector<8xf32>
    %2 = vector.shape_cast %1 : vector<8xf32> to vector<8x1xf32>
    %cst_1 = arith.constant 3.200000e+01 : f32
    %3 = vector.broadcast %cst_1 : f32 to vector<8x1xf32>
    %4 = arith.divf %2, %3 : vector<8x1xf32>
    %5 = vector.broadcast %4 : vector<8x1xf32> to vector<8x32xf32>
    %6 = arith.subf %0, %5 : vector<8x32xf32>
    %7 = arith.mulf %6, %6 : vector<8x32xf32>
    %cst_2 = arith.constant dense<0.000000e+00> : vector<8xf32>
    %8 = vector.multi_reduction <add>, %7, %cst_2 [1] : vector<8x32xf32> to vector<8xf32>
    %9 = vector.shape_cast %8 : vector<8xf32> to vector<8x1xf32>
    %cst_3 = arith.constant 3.200000e+01 : f32
    %10 = vector.broadcast %cst_3 : f32 to vector<8x1xf32>
    %11 = arith.divf %9, %10 : vector<8x1xf32>
    %cst_4 = arith.constant 9.99999974E-6 : f32
    %12 = vector.broadcast %cst_4 : f32 to vector<8x1xf32>
    %13 = arith.addf %11, %12 : vector<8x1xf32>
    %14 = math.rsqrt %13 : vector<8x1xf32>
    %15 = vector.broadcast %14 : vector<8x1xf32> to vector<8x32xf32>
    %16 = arith.mulf %6, %15 : vector<8x32xf32>
    %c0_5 = arith.constant 0 : index
    %c0_6 = arith.constant 0 : index
    %17 = vector.load %arg4[%c0_5, %c0_6] : memref<1x32xf32, #tpu.memory_space<vmem>>, vector<1x32xf32>
    %18 = vector.broadcast %17 : vector<1x32xf32> to vector<8x32xf32>
    %19 = arith.mulf %16, %18 : vector<8x32xf32>
    %c0_7 = arith.constant 0 : index
    %c0_8 = arith.constant 0 : index
    %20 = vector.load %arg5[%c0_7, %c0_8] : memref<1x32xf32, #tpu.memory_space<vmem>>, vector<1x32xf32>
    %21 = vector.broadcast %20 : vector<1x32xf32> to vector<8x32xf32>
    %22 = arith.addf %19, %21 : vector<8x32xf32>
    %23 = arith.truncf %22 : vector<8x32xf32> to vector<8x32xbf16>
    %c0_9 = arith.constant 0 : index
    %c0_10 = arith.constant 0 : index
    %24 = vector.load %arg3[%c0_9, %c0_10] : memref<32x64xbf16, #tpu.memory_space<vmem>>, vector<32x64xbf16>
    %cst_11 = arith.constant dense<0.000000e+00> : vector<8x64xf32>
    %25 = tpu.matmul %23, %24, %cst_11 {dimension_numbers = #tpu.dot_dimension_numbers<[1], [0], [0], [1], [0, 0, 1, 1], [], []>} : vector<8x32xbf16>, vector<32x64xbf16>, vector<8x64xf32> -> vector<8x64xf32>
    %cst_12 = arith.constant dense<0.000000e+00> : vector<8xf32>
    %26 = vector.multi_reduction <add>, %25, %cst_12 [1] : vector<8x64xf32> to vector<8xf32>
    %27 = vector.shape_cast %26 : vector<8xf32> to vector<8x1xf32>
    %cst_13 = arith.constant 6.400000e+01 : f32
    %28 = vector.broadcast %cst_13 : f32 to vector<8x1xf32>
    %29 = arith.divf %27, %28 : vector<8x1xf32>
    %30 = vector.broadcast %29 : vector<8x1xf32> to vector<8x64xf32>
    %31 = arith.subf %25, %30 : vector<8x64xf32>
    %32 = arith.mulf %31, %31 : vector<8x64xf32>
    %cst_14 = arith.constant dense<0.000000e+00> : vector<8xf32>
    %33 = vector.multi_reduction <add>, %32, %cst_14 [1] : vector<8x64xf32> to vector<8xf32>
    %34 = vector.shape_cast %33 : vector<8xf32> to vector<8x1xf32>
    %cst_15 = arith.constant 6.400000e+01 : f32
    %35 = vector.broadcast %cst_15 : f32 to vector<8x1xf32>
    %36 = arith.divf %34, %35 : vector<8x1xf32>
    %cst_16 = arith.constant 9.99999997E-7 : f32
    %37 = vector.broadcast %cst_16 : f32 to vector<8x1xf32>
    %38 = arith.addf %36, %37 : vector<8x1xf32>
    %39 = math.rsqrt %38 : vector<8x1xf32>
    %40 = vector.broadcast %39 : vector<8x1xf32> to vector<8x64xf32>
    %41 = arith.mulf %31, %40 : vector<8x64xf32>
    %c0_17 = arith.constant 0 : index
    %c0_18 = arith.constant 0 : index
    %42 = vector.load %arg6[%c0_17, %c0_18] : memref<1x64xf32, #tpu.memory_space<vmem>>, vector<1x64xf32>
    %43 = vector.broadcast %42 : vector<1x64xf32> to vector<8x64xf32>
    %44 = arith.mulf %41, %43 : vector<8x64xf32>
    %c0_19 = arith.constant 0 : index
    %c0_20 = arith.constant 0 : index
    %45 = vector.load %arg7[%c0_19, %c0_20] : memref<1x64xf32, #tpu.memory_space<vmem>>, vector<1x64xf32>
    %46 = vector.broadcast %45 : vector<1x64xf32> to vector<8x64xf32>
    %47 = arith.addf %44, %46 : vector<8x64xf32>
    %48 = arith.truncf %47 : vector<8x64xf32> to vector<8x64xbf16>
    %c0_21 = arith.constant 0 : index
    %c0_22 = arith.constant 0 : index
    %49 = vector.load %arg8[%c0_21, %c0_22] : memref<8x64xbf16, #tpu.memory_space<vmem>>, vector<8x64xbf16>
    tpu.vector_store %arg8[%c0_21, %c0_22], %48 {strides = array<i32>} : memref<8x64xbf16, #tpu.memory_space<vmem>>, vector<8x64xbf16>,
    return
  }
  func.func @transform_0(%arg0: i32, %arg1: i32) -> (i32, i32) {
    %c0_i32 = arith.constant 0 : i32
    %c0_i32_0 = arith.constant 0 : i32
    return %arg0, %c0_i32 : i32, i32
  }
  func.func @transform_1(%arg0: i32, %arg1: i32) -> (i32, i32) {
    %c0_i32 = arith.constant 0 : i32
    %c0_i32_0 = arith.constant 0 : i32
    return %c0_i32, %arg1 : i32, i32
  }
  func.func @transform_2(%arg0: i32, %arg1: i32) -> (i32, i32) {
    %c0_i32 = arith.constant 0 : i32
    %c0_i32_0 = arith.constant 0 : i32
    %c0_i32_1 = arith.constant 0 : i32
    return %c0_i32, %c0_i32_0 : i32, i32
  }
  func.func @transform_3(%arg0: i32, %arg1: i32) -> (i32, i32) {
    %c0_i32 = arith.constant 0 : i32
    %c0_i32_0 = arith.constant 0 : i32
    %c0_i32_1 = arith.constant 0 : i32
    return %c0_i32, %c0_i32_0 : i32, i32
  }
  func.func @transform_4(%arg0: i32, %arg1: i32) -> (i32, i32) {
    %c0_i32 = arith.constant 0 : i32
    %c0_i32_0 = arith.constant 0 : i32
    return %c0_i32, %arg1 : i32, i32
  }
  func.func @transform_5(%arg0: i32, %arg1: i32) -> (i32, i32) {
    %c0_i32 = arith.constant 0 : i32
    %c0_i32_0 = arith.constant 0 : i32
    return %c0_i32, %arg1 : i32, i32
  }
  func.func @transform_6(%arg0: i32, %arg1: i32) -> (i32, i32) {
    %c0_i32 = arith.constant 0 : i32
    return %arg0, %arg1 : i32, i32
  }
}

module attributes {stable_mosaic.version = 11 : i64} {
  func.func @_neck_conv2_kernel(%arg0: i32, %arg1: i32, %arg2: memref<1x8x192xbf16, #tpu.memory_space<vmem>>, %arg3: memref<3x192x64xbf16, #tpu.memory_space<vmem>>, %arg4: memref<1x64xf32, #tpu.memory_space<vmem>>, %arg5: memref<1x64xf32, #tpu.memory_space<vmem>>, %arg6: memref<1x2x2x64xf32, #tpu.memory_space<vmem>>) attributes {dimension_semantics = [#tpu.dimension_semantics<parallel>, #tpu.dimension_semantics<parallel>], iteration_bounds = array<i64: 2, 1>, scalar_prefetch = 0 : i64, scratch_operands = 0 : i64, tpu.core_type = #tpu.core_type<tc>, window_params = [{transform_indices = @transform_0, window_bounds = array<i64: 1, 8, 192>}, {pipeline_mode = #tpu.pipeline_mode<synchronous>, transform_indices = @transform_1, window_bounds = array<i64: 3, 192, 64>}, {pipeline_mode = #tpu.pipeline_mode<synchronous>, transform_indices = @transform_2, window_bounds = array<i64: 1, 64>}, {pipeline_mode = #tpu.pipeline_mode<synchronous>, transform_indices = @transform_3, window_bounds = array<i64: 1, 64>}, {transform_indices = @transform_4, window_bounds = array<i64: 1, 2, 2, 64>}]} {
    %c0 = arith.constant 0 : index
    %c0_0 = arith.constant 0 : index
    %c0_1 = arith.constant 0 : index
    %0 = vector.load %arg2[%c0, %c0_0, %c0_1] : memref<1x8x192xbf16, #tpu.memory_space<vmem>>, vector<1x8x192xbf16>
    %1 = vector.shape_cast %0 : vector<1x8x192xbf16> to vector<8x192xbf16>
    %c0_2 = arith.constant 0 : index
    %c0_3 = arith.constant 0 : index
    %c0_4 = arith.constant 0 : index
    %2 = vector.load %arg3[%c0_2, %c0_3, %c0_4] : memref<3x192x64xbf16, #tpu.memory_space<vmem>>, vector<1x192x64xbf16>
    %3 = vector.shape_cast %2 : vector<1x192x64xbf16> to vector<192x64xbf16>
    %cst = arith.constant dense<0.000000e+00> : vector<8x64xf32>
    %4 = tpu.matmul %1, %3, %cst {dimension_numbers = #tpu.dot_dimension_numbers<[1], [0], [0], [1], [0, 0, 1, 1], [], []>} : vector<8x192xbf16>, vector<192x64xbf16>, vector<8x64xf32> -> vector<8x64xf32>
    %c1 = arith.constant 1 : index
    %c0_5 = arith.constant 0 : index
    %c0_6 = arith.constant 0 : index
    %5 = vector.load %arg3[%c1, %c0_5, %c0_6] : memref<3x192x64xbf16, #tpu.memory_space<vmem>>, vector<1x192x64xbf16>
    %6 = vector.shape_cast %5 : vector<1x192x64xbf16> to vector<192x64xbf16>
    %cst_7 = arith.constant dense<0.000000e+00> : vector<8x64xf32>
    %7 = tpu.matmul %1, %6, %cst_7 {dimension_numbers = #tpu.dot_dimension_numbers<[1], [0], [0], [1], [0, 0, 1, 1], [], []>} : vector<8x192xbf16>, vector<192x64xbf16>, vector<8x64xf32> -> vector<8x64xf32>
    %c2 = arith.constant 2 : index
    %c0_8 = arith.constant 0 : index
    %c0_9 = arith.constant 0 : index
    %8 = vector.load %arg3[%c2, %c0_8, %c0_9] : memref<3x192x64xbf16, #tpu.memory_space<vmem>>, vector<1x192x64xbf16>
    %9 = vector.shape_cast %8 : vector<1x192x64xbf16> to vector<192x64xbf16>
    %cst_10 = arith.constant dense<0.000000e+00> : vector<8x64xf32>
    %10 = tpu.matmul %1, %9, %cst_10 {dimension_numbers = #tpu.dot_dimension_numbers<[1], [0], [0], [1], [0, 0, 1, 1], [], []>} : vector<8x192xbf16>, vector<192x64xbf16>, vector<8x64xf32> -> vector<8x64xf32>
    %c0_11 = arith.constant 0 : index
    %c0_12 = arith.constant 0 : index
    %11 = vector.load %arg4[%c0_11, %c0_12] : memref<1x64xf32, #tpu.memory_space<vmem>>, vector<1x64xf32>
    %c0_13 = arith.constant 0 : index
    %c0_14 = arith.constant 0 : index
    %12 = vector.load %arg5[%c0_13, %c0_14] : memref<1x64xf32, #tpu.memory_space<vmem>>, vector<1x64xf32>
    %13 = vector.extract_strided_slice %4 {offsets = [0, 0], sizes = [2, 64], strides = [1, 1]} : vector<8x64xf32> to vector<2x64xf32>
    %14 = vector.extract_strided_slice %7 {offsets = [1, 0], sizes = [2, 64], strides = [1, 1]} : vector<8x64xf32> to vector<2x64xf32>
    %15 = arith.addf %13, %14 : vector<2x64xf32>
    %16 = vector.extract_strided_slice %10 {offsets = [2, 0], sizes = [2, 64], strides = [1, 1]} : vector<8x64xf32> to vector<2x64xf32>
    %17 = arith.addf %15, %16 : vector<2x64xf32>
    %cst_15 = arith.constant dense<0.000000e+00> : vector<2xf32>
    %18 = vector.multi_reduction <add>, %17, %cst_15 [1] : vector<2x64xf32> to vector<2xf32>
    %19 = vector.shape_cast %18 : vector<2xf32> to vector<2x1xf32>
    %cst_16 = arith.constant 6.400000e+01 : f32
    %20 = vector.broadcast %cst_16 : f32 to vector<2x1xf32>
    %21 = arith.divf %19, %20 : vector<2x1xf32>
    %22 = vector.broadcast %21 : vector<2x1xf32> to vector<2x64xf32>
    %23 = arith.subf %17, %22 : vector<2x64xf32>
    %24 = arith.mulf %23, %23 : vector<2x64xf32>
    %cst_17 = arith.constant dense<0.000000e+00> : vector<2xf32>
    %25 = vector.multi_reduction <add>, %24, %cst_17 [1] : vector<2x64xf32> to vector<2xf32>
    %26 = vector.shape_cast %25 : vector<2xf32> to vector<2x1xf32>
    %cst_18 = arith.constant 6.400000e+01 : f32
    %27 = vector.broadcast %cst_18 : f32 to vector<2x1xf32>
    %28 = arith.divf %26, %27 : vector<2x1xf32>
    %cst_19 = arith.constant 9.99999997E-7 : f32
    %29 = vector.broadcast %cst_19 : f32 to vector<2x1xf32>
    %30 = arith.addf %28, %29 : vector<2x1xf32>
    %31 = math.rsqrt %30 : vector<2x1xf32>
    %32 = vector.broadcast %31 : vector<2x1xf32> to vector<2x64xf32>
    %33 = arith.mulf %23, %32 : vector<2x64xf32>
    %34 = vector.broadcast %11 : vector<1x64xf32> to vector<2x64xf32>
    %35 = arith.mulf %33, %34 : vector<2x64xf32>
    %36 = vector.broadcast %12 : vector<1x64xf32> to vector<2x64xf32>
    %37 = arith.addf %35, %36 : vector<2x64xf32>
    %c0_20 = arith.constant 0 : index
    %c0_21 = arith.constant 0 : index
    %c0_22 = arith.constant 0 : index
    %c0_23 = arith.constant 0 : index
    %38 = vector.load %arg6[%c0_20, %c0_21, %c0_22, %c0_23] : memref<1x2x2x64xf32, #tpu.memory_space<vmem>>, vector<1x1x2x64xf32>
    %39 = vector.shape_cast %38 : vector<1x1x2x64xf32> to vector<2x64xf32>
    %40 = vector.shape_cast %37 : vector<2x64xf32> to vector<1x1x2x64xf32>
    tpu.vector_store %arg6[%c0_20, %c0_21, %c0_22, %c0_23], %40 {strides = array<i32>} : memref<1x2x2x64xf32, #tpu.memory_space<vmem>>, vector<1x1x2x64xf32>,
    %41 = vector.extract_strided_slice %4 {offsets = [4, 0], sizes = [2, 64], strides = [1, 1]} : vector<8x64xf32> to vector<2x64xf32>
    %42 = vector.extract_strided_slice %7 {offsets = [5, 0], sizes = [2, 64], strides = [1, 1]} : vector<8x64xf32> to vector<2x64xf32>
    %43 = arith.addf %41, %42 : vector<2x64xf32>
    %44 = vector.extract_strided_slice %10 {offsets = [6, 0], sizes = [2, 64], strides = [1, 1]} : vector<8x64xf32> to vector<2x64xf32>
    %45 = arith.addf %43, %44 : vector<2x64xf32>
    %cst_24 = arith.constant dense<0.000000e+00> : vector<2xf32>
    %46 = vector.multi_reduction <add>, %45, %cst_24 [1] : vector<2x64xf32> to vector<2xf32>
    %47 = vector.shape_cast %46 : vector<2xf32> to vector<2x1xf32>
    %cst_25 = arith.constant 6.400000e+01 : f32
    %48 = vector.broadcast %cst_25 : f32 to vector<2x1xf32>
    %49 = arith.divf %47, %48 : vector<2x1xf32>
    %50 = vector.broadcast %49 : vector<2x1xf32> to vector<2x64xf32>
    %51 = arith.subf %45, %50 : vector<2x64xf32>
    %52 = arith.mulf %51, %51 : vector<2x64xf32>
    %cst_26 = arith.constant dense<0.000000e+00> : vector<2xf32>
    %53 = vector.multi_reduction <add>, %52, %cst_26 [1] : vector<2x64xf32> to vector<2xf32>
    %54 = vector.shape_cast %53 : vector<2xf32> to vector<2x1xf32>
    %cst_27 = arith.constant 6.400000e+01 : f32
    %55 = vector.broadcast %cst_27 : f32 to vector<2x1xf32>
    %56 = arith.divf %54, %55 : vector<2x1xf32>
    %cst_28 = arith.constant 9.99999997E-7 : f32
    %57 = vector.broadcast %cst_28 : f32 to vector<2x1xf32>
    %58 = arith.addf %56, %57 : vector<2x1xf32>
    %59 = math.rsqrt %58 : vector<2x1xf32>
    %60 = vector.broadcast %59 : vector<2x1xf32> to vector<2x64xf32>
    %61 = arith.mulf %51, %60 : vector<2x64xf32>
    %62 = vector.broadcast %11 : vector<1x64xf32> to vector<2x64xf32>
    %63 = arith.mulf %61, %62 : vector<2x64xf32>
    %64 = vector.broadcast %12 : vector<1x64xf32> to vector<2x64xf32>
    %65 = arith.addf %63, %64 : vector<2x64xf32>
    %c0_29 = arith.constant 0 : index
    %c1_30 = arith.constant 1 : index
    %c0_31 = arith.constant 0 : index
    %c0_32 = arith.constant 0 : index
    %66 = vector.load %arg6[%c0_29, %c1_30, %c0_31, %c0_32] : memref<1x2x2x64xf32, #tpu.memory_space<vmem>>, vector<1x1x2x64xf32>
    %67 = vector.shape_cast %66 : vector<1x1x2x64xf32> to vector<2x64xf32>
    %68 = vector.shape_cast %65 : vector<2x64xf32> to vector<1x1x2x64xf32>
    tpu.vector_store %arg6[%c0_29, %c1_30, %c0_31, %c0_32], %68 {strides = array<i32>} : memref<1x2x2x64xf32, #tpu.memory_space<vmem>>, vector<1x1x2x64xf32>,
    return
  }
  func.func @transform_0(%arg0: i32, %arg1: i32) -> (i32, i32, i32) {
    %c0_i32 = arith.constant 0 : i32
    %c0_i32_0 = arith.constant 0 : i32
    return %arg0, %arg1, %c0_i32 : i32, i32, i32
  }
  func.func @transform_1(%arg0: i32, %arg1: i32) -> (i32, i32, i32) {
    %c0_i32 = arith.constant 0 : i32
    %c0_i32_0 = arith.constant 0 : i32
    %c0_i32_1 = arith.constant 0 : i32
    %c0_i32_2 = arith.constant 0 : i32
    return %c0_i32, %c0_i32_0, %c0_i32_1 : i32, i32, i32
  }
  func.func @transform_2(%arg0: i32, %arg1: i32) -> (i32, i32) {
    %c0_i32 = arith.constant 0 : i32
    %c0_i32_0 = arith.constant 0 : i32
    %c0_i32_1 = arith.constant 0 : i32
    return %c0_i32, %c0_i32_0 : i32, i32
  }
  func.func @transform_3(%arg0: i32, %arg1: i32) -> (i32, i32) {
    %c0_i32 = arith.constant 0 : i32
    %c0_i32_0 = arith.constant 0 : i32
    %c0_i32_1 = arith.constant 0 : i32
    return %c0_i32, %c0_i32_0 : i32, i32
  }
  func.func @transform_4(%arg0: i32, %arg1: i32) -> (i32, i32, i32, i32) {
    %c0_i32 = arith.constant 0 : i32
    %c0_i32_0 = arith.constant 0 : i32
    %c0_i32_1 = arith.constant 0 : i32
    return %arg0, %arg1, %c0_i32, %c0_i32_0 : i32, i32, i32, i32
  }
}

</mosaic_0001>

<bundles_post_ra>
// kernel: image_embedding_mae.13
= control target key start
LH: loop header
LB: loop body
LE: loop exit
PB: predicated region body
PF: predicated region fallthrough
CT: control target
= control target key end

     0   :  { %vm56_vm0 = vcmask 523264   ;;  %vm75_vm1 = vcmask 261120   ;;  %s152_s1 = inlined_call_operand.vmem [shape: bf16[64,32], index: 1, kind: input, shape index: {}]   ;;  %s153_s2 = inlined_call_operand.vmem [shape: f32[1,32], index: 2, kind: input, shape index: {}]   ;;  %s154_s0 = inlined_call_operand.vmem [shape: f32[8,64], index: 0, kind: input, shape index: {}]   ;;  %s155_s3 = inlined_call_operand.vmem [shape: f32[8,32], index: 3, kind: input, shape index: {}]   ;;  %s156_s4 = inlined_call_operand.vmem [shape: f32[8,32], index: 4, kind: output, shape index: {}]  }
   0x1   :  { %v101_v0 = vld [vmem:[%s152_s1 + $0x18] sm:$0xff]  ;;  %v100_v1 = vld [vmem:[%s152_s1 + $0x10] sm:$0xff]  ;;  %v99_v2 = vld [vmem:[%s152_s1 + $0x8] sm:$0xff] }
   0x2   :  { %64 = vmatpush.bf16.msra.mxu0 %v101_v0  ;;  %v98_v3 = vld [vmem:[%s152_s1] sm:$0xff] }
   0x3   :  { %v18_v4 = vld [vmem:[%s154_s0] sm:$0xff] }
   0x4   :  { %v19_v5 = vpack.c.bf16 %v18_v4, %v18_v4  ;;  %v102_v6 = vld [vmem:[%s153_s2] ss:$0 sm:$0xff] }
   0x5   :  { %v73_v8 = vld [vmem:[%s155_s3] sm:$0xff] }
   0x6   :  { %65 = vmatpush.bf16.msra.mxu0 %v100_v1 }
   0xa   :  { %66 = vmatpush.bf16.msra.mxu0 %v99_v2 }
   0xe   :  { %67 = vmatpush.bf16.msra.mxu0 %v98_v3 }
  0x11   :  { %97 = vmatmul.msk.bf16.vlgmr.msra.gmra.mxu0 %vm56_vm0, %v19_v5 }
  0x8e   :  { %v69_v7 = vpop.f32.mrf.mxu0 }
  0x8f   :  { %v70_v9 = vadd.f32 %v102_v6, %v69_v7 }
  0x91   :  { %v74_v10 = vadd.f32 %v73_v8, %v70_v9 }
  0x93   :  { %76 = vst.msk [vmem:[%s156_s4] sm:$0xff] %vm75_vm1, %v74_v10 }
  0x96   :  { %v71_v11 = vpop.f32.mrf.mxu0 }

// kernel: image_embedding_mae.14
= control target key start
LH: loop header
LB: loop body
LE: loop exit
PB: predicated region body
PF: predicated region fallthrough
CT: control target
= control target key end

     0   :  { %vm23_vm0 = vcmask 261120   ;;  %v155_v4 = vmov 32.0   ;;  %vm127_vm8 = vcmask 781312   ;;  %s218_s0 = inlined_call_operand.vmem [shape: f32[16,32], index: 0, kind: input, shape index: {}]   ;;  %s219_s3 = inlined_call_operand.vmem [shape: f32[1,32], index: 3, kind: input, shape index: {}]   ;;  %s220_s4 = inlined_call_operand.vmem [shape: f32[1,32], index: 4, kind: input, shape index: {}]   ;;  %s221_s2 = inlined_call_operand.vmem [shape: f32[1,96], index: 2, kind: input, shape index: {}]   ;;  %s222_s1 = inlined_call_operand.vmem [shape: bf16[32,96], index: 1, kind: input, shape index: {}]   ;;  %s223_s5 = inlined_call_operand.vmem [shape: bf16[16,96], index: 5, kind: output, shape index: {}]  }
   0x1   :  { %v21_v0 = vld [vmem:[%s218_s0] sm:$0xff]  ;;  %v22_v2 = vld [vmem:[%s218_s0 + $0x8] sm:$0xff]  ;;  %149 = vrcp.f32 %v155_v4 }
   0x2   :  { %v24_v1 = vsel %vm23_vm0, %v21_v0, 0.0  ;;  %v27_v3 = vsel %vm23_vm0, %v22_v2, 0.0  ;;  %v144_v21 = vld [vmem:[%s222_s1 + $0x8] sm:$0xff]  ;;  %v143_v23 = vld [vmem:[%s222_s1] sm:$0xff] }
   0x3   :  { %25 = vadd.xlane.f32.xlu0 %v24_v1  ;;  %117 = vmatpush.bf16.msra.mxu0 %v144_v21  ;;  %v146_v42 = vld [vmem:[%s219_s3] ss:$0 sm:$0xff] }
   0x4   :  { %v147_v47 = vld [vmem:[%s220_s4] ss:$0 sm:$0xff] }
   0x5   :  { %v148_v52 = vld [vmem:[%s221_s2] ss:$0 sm:$0xff] }
   0x7   :  { %v150_v5 = vpop.eup %149  ;;  %118 = vmatpush.bf16.msra.mxu0 %v143_v23 }
   0x8   :  { %v31_v6 = vmul.f32 32.0, %v150_v5  ;;  %vm35_vm1 = vweird.f32 %v150_v5 }
   0xa   :  { %v32_v7 = vsub.f32 1.0, %v31_v6 }
   0xb   :  { %28 = vadd.xlane.f32.xlu0 %v27_v3 }
   0xc   :  { %v33_v8 = vmul.f32 %v150_v5, %v32_v7 }
   0xe   :  { %v34_v9 = vadd.f32 %v150_v5, %v33_v8 }
  0x10   :  { %v36_v10 = vsel %vm35_vm1, %v150_v5, %v34_v9 }
  0x76   :  { %v26_v11 = vpop.xlane.xlu0 %25 }
  0x77   :  { %v37_v12 = vmul.f32 %v36_v10, %v26_v11 }
  0x79   :  { %v39_v13 = vsub.f32 %v21_v0, %v37_v12 }
  0x7b   :  { %v41_v14 = vmul.f32 %v39_v13, %v39_v13 }
  0x7d   :  { %v43_v15 = vsel %vm23_vm0, %v41_v14, 0.0 }
  0x7e   :  { %44 = vadd.xlane.f32.xlu1 %v43_v15  ;;  %v29_v16 = vpop.xlane.xlu0 %28 }
  0x7f   :  { %v38_v17 = vmul.f32 %v36_v10, %v29_v16 }
  0x81   :  { %v40_v18 = vsub.f32 %v22_v2, %v38_v17 }
  0x83   :  { %v42_v19 = vmul.f32 %v40_v18, %v40_v18 }
  0x85   :  { %v46_v20 = vsel %vm23_vm0, %v42_v19, 0.0 }
  0x86   :  { %47 = vadd.xlane.f32.xlu1 %v46_v20 }
  0xf1   :  { %v45_v22 = vpop.xlane.xlu1 %44 }
  0xf2   :  { %v49_v24 = vmul.f32 %v45_v22, %v36_v10 }
  0xf4   :  { %v51_v25 = vadd.f32 1e-05, %v49_v24 }
  0xf6   :  { %151 = vrsqrt.f32 %v51_v25  ;;  %vm59_vm3 = vweird.f32 %v51_v25 }
  0xf9   :  { %v48_v26 = vpop.xlane.xlu1 %47 }
  0xfa   :  { %v50_v27 = vmul.f32 %v48_v26, %v36_v10 }
  0xfc   :  { %v152_v28 = vpop.eup %151  ;;  %v52_v29 = vadd.f32 1e-05, %v50_v27 }
  0xfd   :  { %v54_v30 = vmul.f32 %v152_v28, %v51_v25  ;;  %vm60_vm2 = vweird.f32 %v152_v28 }
  0xfe   :  { %153 = vrsqrt.f32 %v52_v29  ;;  %vm61_vm4 = vmor %vm59_vm3, %vm60_vm2  ;;  %vm69_vm6 = vweird.f32 %v52_v29 }
  0xff   :  { %v55_v31 = vmul.f32 %v152_v28, %v54_v30 }
 0x101   :  { %v56_v32 = vmul.f32 0.5, %v55_v31 }
 0x103   :  { %v57_v33 = vsub.f32 1.5, %v56_v32 }
 0x104   :  { %v154_v34 = vpop.eup %153 }
 0x105   :  { %v58_v35 = vmul.f32 %v152_v28, %v57_v33  ;;  %v64_v36 = vmul.f32 %v154_v34, %v52_v29  ;;  %vm70_vm5 = vweird.f32 %v154_v34 }
 0x106   :  { %vm71_vm7 = vmor %vm69_vm6, %vm70_vm5 }
 0x107   :  { %v65_v37 = vmul.f32 %v154_v34, %v64_v36  ;;  %v62_v38 = vsel %vm61_vm4, %v152_v28, %v58_v35 }
 0x108   :  { %v73_v41 = vmul.f32 %v62_v38, %v39_v13 }
 0x109   :  { %v66_v39 = vmul.f32 0.5, %v65_v37 }
 0x10a   :  { %v79_v46 = vmul.f32 %v146_v42, %v73_v41 }
 0x10b   :  { %v67_v40 = vsub.f32 1.5, %v66_v39 }
 0x10c   :  { %v85_v49 = vadd.f32 %v147_v47, %v79_v46 }
 0x10d   :  { %v68_v43 = vmul.f32 %v154_v34, %v67_v40 }
 0x10f   :  { %v72_v44 = vsel %vm71_vm7, %v154_v34, %v68_v43 }
 0x110   :  { %v74_v45 = vmul.f32 %v72_v44, %v40_v18 }
 0x112   :  { %v80_v48 = vmul.f32 %v146_v42, %v74_v45 }
 0x114   :  { %v86_v50 = vadd.f32 %v147_v47, %v80_v48 }
 0x116   :  { %v87_v51 = vpack.c.bf16 %v86_v50, %v85_v49 }
 0x118   :  { %142 = vmatmul.msk.bf16.vlgmr.msra.gmra.mxu0 %vm23_vm0, %v87_v51 }
 0x195   :  { %v120_v53 = vpop.f32.mrf.mxu0 }
 0x196   :  { %v121_v54 = vadd.f32 %v148_v52, %v120_v53 }
 0x198   :  { %v125_v55 = vpack.c.bf16 %v121_v54, %v121_v54 }
 0x19a   :  { %128 = vst.msk [vmem:[%s223_s5] sm:$0xf] %vm127_vm8, %v125_v55 }
 0x19d   :  { %v122_v56 = vpop.f32.mrf.mxu0 }
 0x19e   :  { %v123_v57 = vadd.f32 %v148_v52, %v122_v56 }
 0x1a0   :  { %v126_v58 = vpack.c.bf16 %v123_v57, %v123_v57 }
 0x1a2   :  { %129 = vst.msk [vmem:[%s223_s5 + $0x4] sm:$0xf] %vm127_vm8, %v126_v58 }

// kernel: image_embedding_mae.16
= control target key start
LH: loop header
LB: loop body
LE: loop exit
PB: predicated region body
PF: predicated region fallthrough
CT: control target
= control target key end

     0   :  { %vm45_vm0 = vcmask 261120   ;;  %s139_s1 = inlined_call_operand.vmem [shape: bf16[32,32], index: 1, kind: input, shape index: {}]   ;;  %s140_s2 = inlined_call_operand.vmem [shape: f32[1,32], index: 2, kind: input, shape index: {}]   ;;  %s141_s0 = inlined_call_operand.vmem [shape: bf16[16,32], index: 0, kind: input, shape index: {}]   ;;  %s142_s3 = inlined_call_operand.vmem [shape: f32[16,32], index: 3, kind: input, shape index: {}]   ;;  %s143_s4 = inlined_call_operand.vmem [shape: f32[16,32], index: 4, kind: output, shape index: {}]  }
   0x1   :  { %v88_v0 = vld [vmem:[%s139_s1 + $0x8] sm:$0xff]  ;;  %v87_v1 = vld [vmem:[%s139_s1] sm:$0xff] }
   0x2   :  { %55 = vmatpush.bf16.msra.mxu0 %v88_v0  ;;  %v86_v2 = vld [vmem:[%s141_s0] sm:$0xff]  ;;  %v64_v9 = vld [vmem:[%s142_s3 + $0x8] sm:$0xff] }
   0x3   :  { %v89_v3 = vld [vmem:[%s140_s2] ss:$0 sm:$0xff] }
   0x4   :  { %v63_v5 = vld [vmem:[%s142_s3] sm:$0xff] }
   0x6   :  { %56 = vmatpush.bf16.msra.mxu0 %v87_v1 }
   0x9   :  { %85 = vmatmul.msk.bf16.vlgmr.msra.gmra.mxu0 %vm45_vm0, %v86_v2 }
  0x86   :  { %v58_v4 = vpop.f32.mrf.mxu0 }
  0x87   :  { %v59_v6 = vadd.f32 %v89_v3, %v58_v4 }
  0x89   :  { %v65_v7 = vadd.f32 %v63_v5, %v59_v6 }
  0x8b   :  { %67 = vst.msk [vmem:[%s143_s4] sm:$0xff] %vm45_vm0, %v65_v7 }
  0x8e   :  { %v60_v8 = vpop.f32.mrf.mxu0 }
  0x8f   :  { %v61_v10 = vadd.f32 %v89_v3, %v60_v8 }
  0x91   :  { %v66_v11 = vadd.f32 %v64_v9, %v61_v10 }
  0x93   :  { %68 = vst.msk [vmem:[%s143_s4 + $0x8] sm:$0xff] %vm45_vm0, %v66_v11 }

// kernel: image_embedding_mae.18
= control target key start
LH: loop header
LB: loop body
LE: loop exit
PB: predicated region body
PF: predicated region fallthrough
CT: control target
= control target key end

     0   :  { %vm111_vm0 = vcmask 261120   ;;  %s231_s1 = inlined_call_operand.vmem [shape: bf16[128,32], index: 1, kind: input, shape index: {}]   ;;  %s232_s2 = inlined_call_operand.vmem [shape: f32[1,32], index: 2, kind: input, shape index: {}]   ;;  %s233_s0 = inlined_call_operand.vmem [shape: bf16[16,128], index: 0, kind: input, shape index: {}]   ;;  %s234_s3 = inlined_call_operand.vmem [shape: f32[16,32], index: 3, kind: input, shape index: {}]   ;;  %s235_s4 = inlined_call_operand.vmem [shape: f32[16,32], index: 4, kind: output, shape index: {}]  }
   0x1   :  { %v162_v0 = vld [vmem:[%s231_s1 + $0x38] sm:$0xff]  ;;  %v161_v1 = vld [vmem:[%s231_s1 + $0x30] sm:$0xff]  ;;  %v160_v2 = vld [vmem:[%s231_s1 + $0x28] sm:$0xff] }
   0x2   :  { %93 = vmatpush.bf16.msra.mxu0 %v162_v0  ;;  %v159_v3 = vld [vmem:[%s231_s1 + $0x20] sm:$0xff]  ;;  %v158_v4 = vld [vmem:[%s231_s1 + $0x18] sm:$0xff]  ;;  %v157_v5 = vld [vmem:[%s231_s1 + $0x10] sm:$0xff] }
   0x3   :  { %v156_v6 = vld [vmem:[%s231_s1 + $0x8] sm:$0xff]  ;;  %v155_v7 = vld [vmem:[%s231_s1] sm:$0xff] }
   0x4   :  { %v154_v8 = vld [vmem:[%s233_s0] sm:$0xff]  ;;  %v108_v15 = vld [vmem:[%s234_s3 + $0x8] sm:$0xff] }
   0x5   :  { %v163_v9 = vld [vmem:[%s232_s2] ss:$0 sm:$0xff] }
   0x6   :  { %94 = vmatpush.bf16.msra.mxu0 %v161_v1  ;;  %v107_v11 = vld [vmem:[%s234_s3] sm:$0xff] }
   0xa   :  { %95 = vmatpush.bf16.msra.mxu0 %v160_v2 }
   0xe   :  { %96 = vmatpush.bf16.msra.mxu0 %v159_v3 }
  0x12   :  { %97 = vmatpush.bf16.msra.mxu0 %v158_v4 }
  0x16   :  { %98 = vmatpush.bf16.msra.mxu0 %v157_v5 }
  0x1a   :  { %99 = vmatpush.bf16.msra.mxu0 %v156_v6 }
  0x1e   :  { %100 = vmatpush.bf16.msra.mxu0 %v155_v7 }
  0x21   :  { %101 = vmatmul.bf16.vlgmr.msra.gmra.mxu0 %v154_v8 }
  0x9e   :  { %v102_v10 = vpop.f32.mrf.mxu0 }
  0x9f   :  { %v103_v12 = vadd.f32 %v163_v9, %v102_v10 }
  0xa1   :  { %v109_v13 = vadd.f32 %v107_v11, %v103_v12 }
  0xa3   :  { %112 = vst.msk [vmem:[%s235_s4] sm:$0xff] %vm111_vm0, %v109_v13 }
  0xa6   :  { %v104_v14 = vpop.f32.mrf.mxu0 }
  0xa7   :  { %v105_v16 = vadd.f32 %v163_v9, %v104_v14 }
  0xa9   :  { %v110_v17 = vadd.f32 %v108_v15, %v105_v16 }
  0xab   :  { %113 = vst.msk [vmem:[%s235_s4 + $0x8] sm:$0xff] %vm111_vm0, %v110_v17 }

// kernel: image_embedding_mae.17
= control target key start
LH: loop header
LB: loop body
LE: loop exit
PB: predicated region body
PF: predicated region fallthrough
CT: control target
= control target key end

     0   :  { %vm23_vm0 = vcmask 261120   ;;  %v248_v4 = vmov 32.0   ;;  %s325_s0 = inlined_call_operand.vmem [shape: f32[16,32], index: 0, kind: input, shape index: {}]   ;;  %s326_s3 = inlined_call_operand.vmem [shape: f32[1,32], index: 3, kind: input, shape index: {}]   ;;  %s327_s4 = inlined_call_operand.vmem [shape: f32[1,32], index: 4, kind: input, shape index: {}]   ;;  %s328_s2 = inlined_call_operand.vmem [shape: f32[1,128], index: 2, kind: input, shape index: {}]   ;;  %s329_s1 = inlined_call_operand.vmem [shape: bf16[32,128], index: 1, kind: input, shape index: {}]   ;;  %s330_s5 = inlined_call_operand.vmem [shape: bf16[16,128], index: 5, kind: output, shape index: {}]  }
   0x1   :  { %v21_v0 = vld [vmem:[%s325_s0] sm:$0xff]  ;;  %v22_v2 = vld [vmem:[%s325_s0 + $0x8] sm:$0xff]  ;;  %234 = vrcp.f32 %v248_v4 }
   0x2   :  { %v24_v1 = vsel %vm23_vm0, %v21_v0, 0.0  ;;  %v27_v3 = vsel %vm23_vm0, %v22_v2, 0.0  ;;  %v223_v21 = vld [vmem:[%s329_s1 + $0x8] sm:$0xff]  ;;  %v222_v23 = vld [vmem:[%s329_s1] sm:$0xff] }
   0x3   :  { %25 = vadd.xlane.f32.xlu0 %v24_v1  ;;  %117 = vmatpush.bf16.msra.mxu0 %v223_v21  ;;  %v231_v42 = vld [vmem:[%s326_s3] ss:$0 sm:$0xff] }
   0x4   :  { %v232_v47 = vld [vmem:[%s327_s4] ss:$0 sm:$0xff] }
   0x5   :  { %v233_v52 = vld [vmem:[%s328_s2] ss:$0 sm:$0xff] }
   0x7   :  { %v235_v5 = vpop.eup %234  ;;  %118 = vmatpush.bf16.msra.mxu0 %v222_v23 }
   0x8   :  { %v31_v6 = vmul.f32 32.0, %v235_v5  ;;  %vm35_vm1 = vweird.f32 %v235_v5 }
   0xa   :  { %v32_v7 = vsub.f32 1.0, %v31_v6 }
   0xb   :  { %28 = vadd.xlane.f32.xlu0 %v27_v3 }
   0xc   :  { %v33_v8 = vmul.f32 %v235_v5, %v32_v7 }
   0xe   :  { %v34_v9 = vadd.f32 %v235_v5, %v33_v8 }
  0x10   :  { %v36_v10 = vsel %vm35_vm1, %v235_v5, %v34_v9 }
  0x76   :  { %v26_v11 = vpop.xlane.xlu0 %25 }
  0x77   :  { %v37_v12 = vmul.f32 %v36_v10, %v26_v11 }
  0x79   :  { %v39_v13 = vsub.f32 %v21_v0, %v37_v12 }
  0x7b   :  { %v41_v14 = vmul.f32 %v39_v13, %v39_v13 }
  0x7d   :  { %v43_v15 = vsel %vm23_vm0, %v41_v14, 0.0 }
  0x7e   :  { %44 = vadd.xlane.f32.xlu1 %v43_v15  ;;  %v29_v16 = vpop.xlane.xlu0 %28 }
  0x7f   :  { %v38_v17 = vmul.f32 %v36_v10, %v29_v16 }
  0x81   :  { %v40_v18 = vsub.f32 %v22_v2, %v38_v17 }
  0x83   :  { %v42_v19 = vmul.f32 %v40_v18, %v40_v18 }
  0x85   :  { %v46_v20 = vsel %vm23_vm0, %v42_v19, 0.0 }
  0x86   :  { %47 = vadd.xlane.f32.xlu1 %v46_v20 }
  0xf1   :  { %v45_v22 = vpop.xlane.xlu1 %44 }
  0xf2   :  { %v49_v24 = vmul.f32 %v45_v22, %v36_v10 }
  0xf4   :  { %v51_v25 = vadd.f32 1e-05, %v49_v24 }
  0xf6   :  { %236 = vrsqrt.f32 %v51_v25  ;;  %vm59_vm3 = vweird.f32 %v51_v25 }
  0xf9   :  { %v48_v26 = vpop.xlane.xlu1 %47 }
  0xfa   :  { %v50_v27 = vmul.f32 %v48_v26, %v36_v10 }
  0xfc   :  { %v237_v28 = vpop.eup %236  ;;  %v52_v29 = vadd.f32 1e-05, %v50_v27 }
  0xfd   :  { %v54_v30 = vmul.f32 %v237_v28, %v51_v25  ;;  %vm60_vm2 = vweird.f32 %v237_v28 }
  0xfe   :  { %238 = vrsqrt.f32 %v52_v29  ;;  %vm61_vm4 = vmor %vm59_vm3, %vm60_vm2  ;;  %vm69_vm6 = vweird.f32 %v52_v29 }
  0xff   :  { %v55_v31 = vmul.f32 %v237_v28, %v54_v30 }
 0x101   :  { %v56_v32 = vmul.f32 0.5, %v55_v31 }
 0x103   :  { %v57_v33 = vsub.f32 1.5, %v56_v32 }
 0x104   :  { %v239_v34 = vpop.eup %238 }
 0x105   :  { %v58_v35 = vmul.f32 %v237_v28, %v57_v33  ;;  %v64_v36 = vmul.f32 %v239_v34, %v52_v29  ;;  %vm70_vm5 = vweird.f32 %v239_v34 }
 0x106   :  { %vm71_vm7 = vmor %vm69_vm6, %vm70_vm5 }
 0x107   :  { %v65_v37 = vmul.f32 %v239_v34, %v64_v36  ;;  %v62_v38 = vsel %vm61_vm4, %v237_v28, %v58_v35 }
 0x108   :  { %v73_v41 = vmul.f32 %v62_v38, %v39_v13 }
 0x109   :  { %v66_v39 = vmul.f32 0.5, %v65_v37 }
 0x10a   :  { %v79_v46 = vmul.f32 %v231_v42, %v73_v41 }
 0x10b   :  { %v67_v40 = vsub.f32 1.5, %v66_v39 }
 0x10c   :  { %v85_v49 = vadd.f32 %v232_v47, %v79_v46 }
 0x10d   :  { %v68_v43 = vmul.f32 %v239_v34, %v67_v40 }
 0x10f   :  { %v72_v44 = vsel %vm71_vm7, %v239_v34, %v68_v43 }
 0x110   :  { %v74_v45 = vmul.f32 %v72_v44, %v40_v18 }
 0x112   :  { %v80_v48 = vmul.f32 %v231_v42, %v74_v45 }
 0x114   :  { %v86_v50 = vadd.f32 %v232_v47, %v80_v48 }
 0x116   :  { %v87_v51 = vpack.c.bf16 %v86_v50, %v85_v49  ;;  %v249_v49 = vmov 1.0  }
 0x118   :  { %221 = vmatmul.msk.bf16.vlgmr.msra.gmra.mxu0 %vm23_vm0, %v87_v51 }
 0x195   :  { %v120_v53 = vpop.f32.mrf.mxu0 }
 0x196   :  { %v306_v54 = vadd.f32 %v233_v52, %v120_v53 }
 0x198   :  { %v309_v55 = vmul.f32 0.70710677, %v306_v54 }
 0x19a   :  { %v133_v56 = vand.u32 2147483647, %v309_v55  ;;  %vm129_vm0 = vcmp.lt.f32.partialorder %v309_v55, 0.0 }
 0x19b   :  { %v131_v50 = vsel %vm129_vm0, -1.0, %v249_v49 }
 0x19c   :  { %v135_v57 = vmul.f32 0.3275911, %v133_v56  ;;  %v187_v14 = vsub.f32 0.0, %v133_v56 }
 0x19d   :  { %v122_v58 = vpop.f32.mrf.mxu0 }
 0x19e   :  { %v137_v59 = vadd.f32 1.0, %v135_v57  ;;  %v312_v60 = vadd.f32 %v233_v52, %v122_v58  ;;  %v189_v21 = vmul.f32 %v187_v14, %v133_v56 }
 0x1a0   :  { %240 = vrcp.f32 %v137_v59  ;;  %v315_v61 = vmul.f32 0.70710677, %v312_v60  ;;  %v150_v4 = vand.u32 2147483648, %v137_v59  ;;  %v148_v6 = vand.u32 2147483647, %v137_v59 }
 0x1a1   :  { %vm144_vm9 = vweird.f32 %v137_v59  ;;  %v191_v27 = vmul.f32 1.442695, %v189_v21 }
 0x1a2   :  { %v134_v62 = vand.u32 2147483647, %v315_v61  ;;  %v151_v8 = vor.u32 1.1754944e-38, %v150_v4  ;;  %vm149_vm11 = vcmp.eq.f32.partialorder %v148_v6, 8.507059e+37  ;;  %vm130_vm1 = vcmp.lt.f32.partialorder %v315_v61, 0.0 }
 0x1a3   :  { %v132_v56 = vsel %vm130_vm1, -1.0, %v249_v49 }
 0x1a4   :  { %v136_v63 = vmul.f32 0.3275911, %v134_v62  ;;  %v188_v29 = vsub.f32 0.0, %v134_v62 }
 0x1a6   :  { %v241_v0 = vpop.eup %240  ;;  %v138_v2 = vadd.f32 1.0, %v136_v63  ;;  %v190_v34 = vmul.f32 %v188_v29, %v134_v62  ;;  %v126_v62 = vmul.f32 0.5, %v312_v60 }
 0x1a7   :  { %v140_v1 = vmul.f32 %v241_v0, %v137_v59  ;;  %vm145_vm8 = vweird.f32 %v241_v0  ;;  %v125_v59 = vmul.f32 0.5, %v306_v54 }
 0x1a8   :  { %242 = vrcp.f32 %v138_v2  ;;  %vm146_vm10 = vmor %vm144_vm9, %vm145_vm8  ;;  %v165_v17 = vand.u32 2147483648, %v138_v2  ;;  %v163_v19 = vand.u32 2147483647, %v138_v2  ;;  %vm159_vm13 = vweird.f32 %v138_v2 }
 0x1a9   :  { %v141_v3 = vsub.f32 1.0, %v140_v1  ;;  %244 = vpow2.f32 %v191_v27  ;;  %v193_v39 = vmul.f32 1.442695, %v190_v34 }
 0x1aa   :  { %v166_v24 = vor.u32 1.1754944e-38, %v165_v17  ;;  %vm164_vm15 = vcmp.eq.f32.partialorder %v163_v19, 8.507059e+37 }
 0x1ab   :  { %v142_v5 = vmul.f32 %v241_v0, %v141_v3  ;;  %246 = vpow2.f32 %v193_v39 }
 0x1ad   :  { %v143_v7 = vadd.f32 %v241_v0, %v142_v5 }
 0x1ae   :  { %v243_v9 = vpop.eup %242 }
 0x1af   :  { %v147_v10 = vsel %vm146_vm10, %v241_v0, %v143_v7  ;;  %v155_v12 = vmul.f32 %v243_v9, %v138_v2  ;;  %vm160_vm12 = vweird.f32 %v243_v9  ;;  %v245_v41 = vpop.eup %244 }
 0x1b0   :  { %v152_v11 = vsel %vm149_vm11, %v151_v8, %v147_v10  ;;  %vm161_vm14 = vmor %vm159_vm13, %vm160_vm12 }
 0x1b1   :  { %v169_v13 = vmul.f32 1.0614054, %v152_v11  ;;  %v156_v15 = vsub.f32 1.0, %v155_v12  ;;  %v247_v48 = vpop.eup %246 }
 0x1b3   :  { %v171_v16 = vadd.f32 -1.4531521, %v169_v13  ;;  %v157_v18 = vmul.f32 %v243_v9, %v156_v15 }
 0x1b5   :  { %v173_v20 = vmul.f32 %v171_v16, %v152_v11  ;;  %v158_v22 = vadd.f32 %v243_v9, %v157_v18 }
 0x1b7   :  { %v175_v23 = vadd.f32 1.4214138, %v173_v20  ;;  %v162_v25 = vsel %vm161_vm14, %v243_v9, %v158_v22 }
 0x1b8   :  { %v167_v28 = vsel %vm164_vm15, %v166_v24, %v162_v25 }
 0x1b9   :  { %v177_v26 = vmul.f32 %v175_v23, %v152_v11  ;;  %v170_v30 = vmul.f32 1.0614054, %v167_v28 }
 0x1bb   :  { %v179_v31 = vadd.f32 -0.28449672, %v177_v26  ;;  %v172_v32 = vadd.f32 -1.4531521, %v170_v30 }
 0x1bd   :  { %v181_v33 = vmul.f32 %v179_v31, %v152_v11  ;;  %v174_v35 = vmul.f32 %v172_v32, %v167_v28 }
 0x1bf   :  { %v183_v36 = vadd.f32 0.2548296, %v181_v33  ;;  %v176_v37 = vadd.f32 1.4214138, %v174_v35 }
 0x1c1   :  { %v185_v38 = vmul.f32 %v183_v36, %v152_v11  ;;  %v178_v40 = vmul.f32 %v176_v37, %v167_v28 }
 0x1c3   :  { %v195_v42 = vmul.f32 %v245_v41, %v185_v38  ;;  %v180_v43 = vadd.f32 -0.28449672, %v178_v40 }
 0x1c5   :  { %v182_v44 = vmul.f32 %v180_v43, %v167_v28  ;;  %v197_v45 = vsub.f32 1.0, %v195_v42 }
 0x1c7   :  { %v184_v46 = vadd.f32 0.2548296, %v182_v44  ;;  %v199_v51 = vmul.f32 %v197_v45, %v131_v50 }
 0x1c9   :  { %v186_v47 = vmul.f32 %v184_v46, %v167_v28  ;;  %v201_v57 = vadd.f32 1.0, %v199_v51 }
 0x1cb   :  { %v196_v52 = vmul.f32 %v247_v48, %v186_v47  ;;  %v203_v55 = vmul.f32 %v201_v57, %v125_v59 }
 0x1cd   :  { %v198_v53 = vsub.f32 1.0, %v196_v52 }
 0x1cf   :  { %v200_v58 = vmul.f32 %v198_v53, %v132_v56 }
 0x1d1   :  { %v202_v63 = vadd.f32 1.0, %v200_v58 }
 0x1d3   :  { %v204_v0 = vmul.f32 %v202_v63, %v126_v62 }
 0x1d5   :  { %v227_v1 = vpack.c.bf16 %v204_v0, %v203_v55 }
 0x1d7   :  { %228 = vst [vmem:[%s330_s5] sm:$0xff] %v227_v1  }

// kernel: image_embedding_mae.24
= control target key start
LH: loop header
LB: loop body
LE: loop exit
PB: predicated region body
PF: predicated region fallthrough
CT: control target
= control target key end

     0   :  { %vm25_vm0 = vcmask 261120   ;;  %v170_v2 = vmov 32.0   ;;  %vm98_vm5 = vcmask 523264   ;;  %v171_v35 = vmov 64.0   ;;  %s236_s0 = inlined_call_operand.vmem [shape: f32[8,32], index: 0, kind: input, shape index: {}]   ;;  %s237_s2 = inlined_call_operand.vmem [shape: f32[1,32], index: 2, kind: input, shape index: {}]   ;;  %s238_s3 = inlined_call_operand.vmem [shape: f32[1,32], index: 3, kind: input, shape index: {}]   ;;  %s239_s1 = inlined_call_operand.vmem [shape: bf16[32,64], index: 1, kind: input, shape index: {}]   ;;  %s240_s4 = inlined_call_operand.vmem [shape: f32[1,64], index: 4, kind: input, shape index: {}]   ;;  %s241_s5 = inlined_call_operand.vmem [shape: f32[1,64], index: 5, kind: input, shape index: {}]   ;;  %s242_s6 = inlined_call_operand.vmem [shape: bf16[8,64], index: 6, kind: output, shape index: {}]  }
   0x1   :  { %v24_v0 = vld [vmem:[%s236_s0] sm:$0xff]  ;;  %162 = vrcp.f32 %v170_v2  ;;  %v155_v14 = vld [vmem:[%s239_s1 + $0x8] sm:$0xff]  ;;  %vm139_vm10 = vcmask 519168  }
   0x2   :  { %v26_v1 = vsel %vm25_vm0, %v24_v0, 0.0  ;;  %91 = vmatpush.bf16.msra.mxu0 %v155_v14  ;;  %v154_v15 = vld [vmem:[%s239_s1] sm:$0xff] }
   0x3   :  { %27 = vadd.xlane.f32.xlu0 %v26_v1  ;;  %v158_v25 = vld [vmem:[%s237_s2] ss:$0 sm:$0xff] }
   0x4   :  { %v159_v28 = vld [vmem:[%s238_s3] ss:$0 sm:$0xff] }
   0x5   :  { %v160_v56 = vld [vmem:[%s240_s4] ss:$0 sm:$0xff] }
   0x6   :  { %92 = vmatpush.bf16.msra.mxu0 %v154_v15  ;;  %v161_v58 = vld [vmem:[%s241_s5] ss:$0 sm:$0xff] }
   0x7   :  { %v163_v3 = vpop.eup %162 }
   0x8   :  { %v30_v4 = vmul.f32 32.0, %v163_v3  ;;  %vm34_vm1 = vweird.f32 %v163_v3 }
   0xa   :  { %v31_v5 = vsub.f32 1.0, %v30_v4 }
   0xc   :  { %v32_v6 = vmul.f32 %v163_v3, %v31_v5 }
   0xe   :  { %v33_v7 = vadd.f32 %v163_v3, %v32_v6 }
  0x10   :  { %v35_v8 = vsel %vm34_vm1, %v163_v3, %v33_v7 }
  0x76   :  { %v28_v9 = vpop.xlane.xlu0 %27 }
  0x77   :  { %v36_v10 = vmul.f32 %v35_v8, %v28_v9 }
  0x79   :  { %v37_v11 = vsub.f32 %v24_v0, %v36_v10 }
  0x7b   :  { %v38_v12 = vmul.f32 %v37_v11, %v37_v11 }
  0x7d   :  { %v39_v13 = vsel %vm25_vm0, %v38_v12, 0.0 }
  0x7e   :  { %40 = vadd.xlane.f32.xlu0 %v39_v13 }
  0xf1   :  { %v41_v16 = vpop.xlane.xlu0 %40 }
  0xf2   :  { %v42_v17 = vmul.f32 %v41_v16, %v35_v8 }
  0xf4   :  { %v43_v18 = vadd.f32 1e-05, %v42_v17 }
  0xf6   :  { %164 = vrsqrt.f32 %v43_v18  ;;  %vm50_vm3 = vweird.f32 %v43_v18 }
  0xf7   :  { %166 = vrcp.f32 %v171_v35 }
  0xfc   :  { %v165_v19 = vpop.eup %164 }
  0xfd   :  { %v45_v20 = vmul.f32 %v165_v19, %v43_v18  ;;  %vm51_vm2 = vweird.f32 %v165_v19  ;;  %v167_v36 = vpop.eup %166 }
  0xfe   :  { %vm52_vm4 = vmor %vm50_vm3, %vm51_vm2  ;;  %v103_v37 = vmul.f32 64.0, %v167_v36  ;;  %vm107_vm6 = vweird.f32 %v167_v36 }
  0xff   :  { %v46_v21 = vmul.f32 %v165_v19, %v45_v20 }
 0x100   :  { %v104_v38 = vsub.f32 1.0, %v103_v37 }
 0x101   :  { %v47_v22 = vmul.f32 0.5, %v46_v21 }
 0x102   :  { %v105_v39 = vmul.f32 %v167_v36, %v104_v38 }
 0x103   :  { %v48_v23 = vsub.f32 1.5, %v47_v22 }
 0x104   :  { %v106_v40 = vadd.f32 %v167_v36, %v105_v39 }
 0x105   :  { %v49_v24 = vmul.f32 %v165_v19, %v48_v23 }
 0x106   :  { %v108_v41 = vsel %vm107_vm6, %v167_v36, %v106_v40 }
 0x107   :  { %v53_v26 = vsel %vm52_vm4, %v165_v19, %v49_v24 }
 0x108   :  { %v54_v27 = vmul.f32 %v53_v26, %v37_v11 }
 0x10a   :  { %v59_v29 = vmul.f32 %v158_v25, %v54_v27 }
 0x10c   :  { %v64_v30 = vadd.f32 %v159_v28, %v59_v29 }
 0x10e   :  { %v65_v31 = vpack.c.bf16 %v64_v30, %v64_v30 }
 0x110   :  { %153 = vmatmul.msk.bf16.vlgmr.msra.gmra.mxu0 %vm25_vm0, %v65_v31 }
 0x18d   :  { %v94_v32 = vpop.f32.mrf.mxu0 }
 0x18e   :  { %v99_v33 = vsel %vm98_vm5, %v94_v32, 0.0 }
 0x18f   :  { %100 = vadd.xlane.f32.xlu1 %v99_v33 }
 0x195   :  { %v96_v34 = vpop.f32.mrf.mxu0 }
 0x202   :  { %v101_v42 = vpop.xlane.xlu1 %100 }
 0x203   :  { %v109_v43 = vmul.f32 %v108_v41, %v101_v42 }
 0x205   :  { %v110_v44 = vsub.f32 %v94_v32, %v109_v43 }
 0x207   :  { %v111_v45 = vmul.f32 %v110_v44, %v110_v44 }
 0x209   :  { %v112_v46 = vsel %vm98_vm5, %v111_v45, 0.0 }
 0x20a   :  { %113 = vadd.xlane.f32.xlu1 %v112_v46 }
 0x27d   :  { %v114_v47 = vpop.xlane.xlu1 %113 }
 0x27e   :  { %v115_v48 = vmul.f32 %v114_v47, %v108_v41 }
 0x280   :  { %v116_v49 = vadd.f32 1e-06, %v115_v48 }
 0x282   :  { %168 = vrsqrt.f32 %v116_v49  ;;  %vm123_vm8 = vweird.f32 %v116_v49 }
 0x288   :  { %v169_v50 = vpop.eup %168 }
 0x289   :  { %v118_v51 = vmul.f32 %v169_v50, %v116_v49  ;;  %vm124_vm7 = vweird.f32 %v169_v50 }
 0x28a   :  { %vm125_vm9 = vmor %vm123_vm8, %vm124_vm7 }
 0x28b   :  { %v119_v52 = vmul.f32 %v169_v50, %v118_v51 }
 0x28d   :  { %v120_v53 = vmul.f32 0.5, %v119_v52 }
 0x28f   :  { %v121_v54 = vsub.f32 1.5, %v120_v53 }
 0x291   :  { %v122_v55 = vmul.f32 %v169_v50, %v121_v54 }
 0x293   :  { %v126_v57 = vsel %vm125_vm9, %v169_v50, %v122_v55 }
 0x294   :  { %v127_v59 = vmul.f32 %v126_v57, %v110_v44 }
 0x296   :  { %v132_v60 = vmul.f32 %v160_v56, %v127_v59 }
 0x298   :  { %v137_v61 = vadd.f32 %v161_v58, %v132_v60 }
 0x29a   :  { %v138_v62 = vpack.c.bf16 %v137_v61, %v137_v61 }
 0x29c   :  { %140 = vst.msk [vmem:[%s242_s6] sm:$0xf] %vm139_vm10, %v138_v62 }

// kernel: image_embedding_mae.15
= control target key start
LH: loop header
LB: loop body
LE: loop exit
PB: predicated region body
PF: predicated region fallthrough
CT: control target
= control target key end

     0   :  { %s1385_s12 = smov 0   ;;  %s1387_s13 = smov 0   ;;  %s1701_s0 = inlined_call_operand.vmem [shape: bf16[2,8,3,2,16], index: 0, kind: input, shape index: {}, may-alias: {0,1,2}]   ;;  %s1702_s1 = inlined_call_operand.vmem [shape: bf16[2,8,3,2,16], index: 1, kind: input, shape index: {}, may-alias: {0,1,2}]   ;;  %s1703_s2 = inlined_call_operand.vmem [shape: bf16[2,8,3,2,16], index: 2, kind: input, shape index: {}, may-alias: {0,1,2}]   ;;  %s1704_s3 = inlined_call_operand.vmem [shape: bf16[2,8,32], index: 3, kind: output, shape index: {}]  }
   0x1   :  { %s1389_s14 = smov 0   ;;  %s1391_s15 = smov 0  }
   0x2   :  { %s1393_s16 = smov 0  }
   0x3 LB: > { %s39_s17 = sadd.s32 1, %s1355_s15  ;;  %p57_p1 = scmp.ne.s32.totalorder %s1347_s13, %s1343_s12  ;;  %s1359_s16 = sphi %s1393_s16, %s13_s16   ;;  %s1355_s15 = sphi %s1391_s15, %s1709_s15   ;;  %s1351_s14 = sphi %s1389_s14, %s1708_s14   ;;  %s1347_s13 = sphi %s1387_s13, %s1707_s13   ;;  %s1343_s12 = sphi %s1385_s12, %s1706_s12  }
   0x4   : > { %p41_p0 = scmp.ge.s32.totalorder %s39_s17, 2  ;;  %p58_p2 = scmp.eq.s32.totalorder %s1359_s16, 0 }
   0x5   : > { %s50_s20 = sadd.s32 1, %s1347_s13  ;;  %p1230_p5 = scmp.ge.s32.totalorder %s1359_s16, 2 }
   0x6   : > { %s1711_s17 = smov (%p41_p0, %s39_s17), 0  ;;  %p1416_p3 = por %p58_p2, %p57_p1 }
   0x7   : > { %s43_s19 = ssub.s32 %s1355_s15, %s1711_s17  ;;  %177 = sbr.rel (%p1230_p5) target bundleno = 51 (0x33), region = 16 }
   0x8   : > { %p48_p4 = scmp.eq.s32.totalorder %s43_s19, 0 }
   0xa   : > { %s1424_s21 = scalar_select %p48_p4, %s1347_s13, %s50_s20  }
   0xc   : > { %180 = sbr.rel (!%p1416_p3) target bundleno = 25 (0x19), region = 20  ;;  %s182_s22 = sand.u32 (%p1416_p3), 1, %s1347_s13  }
   0xd   : > { %s1261_s23 = smul.u32 (%p1416_p3), 24, %s1355_s15  ;;  %s1231_s24 = sshll.u32 (%p1416_p3), %s182_s22, 3 }
   0xe   : > { %s184_s28 = scalar_lea.vmem (%p1416_p3), [#allocation5], %s1231_s24 }
   0xf   : > { %s190_s27 = scalar_lea.vmem (%p1416_p3), %s1701_s0, %s1261_s23 }
  0x10   : > { %v207_v0 = vld [vmem:[%s190_s27] sm:$0x1] (%p1416_p3)  ;;  %v209_v1 = vld [vmem:[%s190_s27 + $0x3] sm:$0x1] (%p1416_p3)  ;;  %v211_v2 = vld [vmem:[%s190_s27 + $0x6] sm:$0x1] (%p1416_p3) }
  0x11   : > { %208 = vst [vmem:[%s184_s28] sm:$0x1] %v207_v0  ;;  %v213_v3 = vld [vmem:[%s190_s27 + $0x9] sm:$0x1]  ;;  %v215_v4 = vld [vmem:[%s190_s27 + $0xc] sm:$0x1] }
  0x12   : > { %210 = vst [vmem:[%s184_s28 + $0x1] sm:$0x1] %v209_v1  ;;  %v217_v5 = vld [vmem:[%s190_s27 + $0xf] sm:$0x1]  ;;  %v219_v6 = vld [vmem:[%s190_s27 + $0x12] sm:$0x1] }
  0x13   : > { %212 = vst [vmem:[%s184_s28 + $0x2] sm:$0x1] %v211_v2  ;;  %v221_v7 = vld [vmem:[%s190_s27 + $0x15] sm:$0x1] }
  0x14   : > { %214 = vst [vmem:[%s184_s28 + $0x3] sm:$0x1] %v213_v3 }
  0x15   : > { %216 = vst [vmem:[%s184_s28 + $0x4] sm:$0x1] %v215_v4 }
  0x16   : > { %218 = vst [vmem:[%s184_s28 + $0x5] sm:$0x1] %v217_v5 }
  0x17   : > { %220 = vst [vmem:[%s184_s28 + $0x6] sm:$0x1] %v219_v6 }
  0x18   : > { %222 = vst [vmem:[%s184_s28 + $0x7] sm:$0x1] %v221_v7 }
  0x19 PF: > { %262 = sbr.rel (!%p1416_p3) target bundleno = 38 (0x26), region = 61  ;;  %s264_s29 = sand.u32 (%p1416_p3), 1, %s1347_s13  }
  0x1a   : > { %s1129_s30 = smul.u32 (%p1416_p3), 24, %s1355_s15  ;;  %s1232_s4 = sshll.u32 (%p1416_p3), %s264_s29, 3 }
  0x1b   : > { %s266_s8 = scalar_lea.vmem (%p1416_p3), [#allocation6], %s1232_s4 }
  0x1c   : > { %s1131_s7 = scalar_lea.vmem (%p1416_p3), %s1702_s1, %s1129_s30 }
  0x1d   : > { %v1233_v8 = vld [vmem:[%s1131_s7 + $0x1] sm:$0x1] (%p1416_p3)  ;;  %v1234_v9 = vld [vmem:[%s1131_s7 + $0x4] sm:$0x1] (%p1416_p3)  ;;  %v1235_v10 = vld [vmem:[%s1131_s7 + $0x7] sm:$0x1] (%p1416_p3) }
  0x1e   : > { %291 = vst [vmem:[%s266_s8] sm:$0x1] %v1233_v8  ;;  %v1236_v11 = vld [vmem:[%s1131_s7 + $0xa] sm:$0x1]  ;;  %v1237_v12 = vld [vmem:[%s1131_s7 + $0xd] sm:$0x1] }
  0x1f   : > { %293 = vst [vmem:[%s266_s8 + $0x1] sm:$0x1] %v1234_v9  ;;  %v1238_v13 = vld [vmem:[%s1131_s7 + $0x10] sm:$0x1]  ;;  %v1239_v14 = vld [vmem:[%s1131_s7 + $0x13] sm:$0x1] }
  0x20   : > { %295 = vst [vmem:[%s266_s8 + $0x2] sm:$0x1] %v1235_v10  ;;  %v1240_v15 = vld [vmem:[%s1131_s7 + $0x16] sm:$0x1] }
  0x21   : > { %297 = vst [vmem:[%s266_s8 + $0x3] sm:$0x1] %v1236_v11 }
  0x22   : > { %299 = vst [vmem:[%s266_s8 + $0x4] sm:$0x1] %v1237_v12 }
  0x23   : > { %301 = vst [vmem:[%s266_s8 + $0x5] sm:$0x1] %v1238_v13 }
  0x24   : > { %303 = vst [vmem:[%s266_s8 + $0x6] sm:$0x1] %v1239_v14 }
  0x25   : > { %305 = vst [vmem:[%s266_s8 + $0x7] sm:$0x1] %v1240_v15 }
  0x26 PF: > { %345 = sbr.rel (!%p1416_p3) target bundleno = 51 (0x33), region = 102  ;;  %s347_s9 = sand.u32 (%p1416_p3), 1, %s1347_s13  }
  0x27   : > { %s1137_s10 = smul.u32 (%p1416_p3), 24, %s1355_s15  ;;  %s1241_s11 = sshll.u32 (%p1416_p3), %s347_s9, 3 }
  0x28   : > { %s349_s23 = scalar_lea.vmem (%p1416_p3), [#allocation7], %s1241_s11 }
  0x29   : > { %s1139_s22 = scalar_lea.vmem (%p1416_p3), %s1703_s2, %s1137_s10 }
  0x2a   : > { %v1242_v16 = vld [vmem:[%s1139_s22 + $0x2] sm:$0x1] (%p1416_p3)  ;;  %v1243_v17 = vld [vmem:[%s1139_s22 + $0x5] sm:$0x1] (%p1416_p3)  ;;  %v1244_v18 = vld [vmem:[%s1139_s22 + $0x8] sm:$0x1] (%p1416_p3) }
  0x2b   : > { %374 = vst [vmem:[%s349_s23] sm:$0x1] %v1242_v16  ;;  %v1245_v19 = vld [vmem:[%s1139_s22 + $0xb] sm:$0x1]  ;;  %v1246_v20 = vld [vmem:[%s1139_s22 + $0xe] sm:$0x1] }
  0x2c   : > { %376 = vst [vmem:[%s349_s23 + $0x1] sm:$0x1] %v1243_v17  ;;  %v1247_v21 = vld [vmem:[%s1139_s22 + $0x11] sm:$0x1]  ;;  %v1248_v22 = vld [vmem:[%s1139_s22 + $0x14] sm:$0x1] }
  0x2d   : > { %378 = vst [vmem:[%s349_s23 + $0x2] sm:$0x1] %v1244_v18  ;;  %v1249_v23 = vld [vmem:[%s1139_s22 + $0x17] sm:$0x1] }
  0x2e   : > { %380 = vst [vmem:[%s349_s23 + $0x3] sm:$0x1] %v1245_v19 }
  0x2f   : > { %382 = vst [vmem:[%s349_s23 + $0x4] sm:$0x1] %v1246_v20 }
  0x30   : > { %384 = vst [vmem:[%s349_s23 + $0x5] sm:$0x1] %v1247_v21 }
  0x31   : > { %386 = vst [vmem:[%s349_s23 + $0x6] sm:$0x1] %v1248_v22 }
  0x32   : > { %388 = vst [vmem:[%s349_s23 + $0x7] sm:$0x1] %v1249_v23 }
  0x33 PF: > { %p1250_p6 = scmp.ge.s32.totalorder %s1359_s16, 1  ;;  %p427_p7 = scmp.lt.s32.totalorder %s1359_s16, 3 }
  0x35   : > { %p428_p8 = pnand %p1250_p6, %p427_p7 }
  0x36   : > { %s434_s18 = sand.u32 (!%p428_p8), 1, %s1343_s12   ;;  %s1364_s27 = smov (!%p428_p8), 16  }
  0x37   : > { %431 = sbr.rel (%p428_p8) target bundleno = 1146 (0x47a), region = 143  ;;  %s1451_s24 = sshll.u32 (!%p428_p8), %s434_s18, 3 }
  0x38   : > { %s1454_s25 = scalar_lea.vmem (!%p428_p8), [#allocation5], %s1451_s24  ;;  %s1473_s12 = scalar_lea.vmem (!%p428_p8), [#allocation6], %s1451_s24 }
  0x39   : > { %s1496_s26 = scalar_lea.vmem (!%p428_p8), [#allocation7], %s1451_s24  ;;  %p489_p9 = scmp.lt.s32.totalorder (!%p428_p8), %s1351_s14, 1 }
  0x3c   : > { %v518_v24 = vld [vmem:[%s1454_s25] sm:$0x1]  ;;  %v519_v25 = vld [vmem:[%s1454_s25 + $0x1] sm:$0x1]  ;;  %v520_v27 = vld [vmem:[%s1454_s25 + $0x2] sm:$0x1] }
  0x3d   : > { %543 = vst [vmem:[#allocation1] ss:$9 sm:$0xff] %v518_v24  ;;  %v521_v29 = vld [vmem:[%s1454_s25 + $0x3] sm:$0x1]  ;;  %v522_v31 = vld [vmem:[%s1454_s25 + $0x4] sm:$0x1] }
  0x3e   : > { %v523_v33 = vld [vmem:[%s1454_s25 + $0x5] sm:$0x1]  ;;  %v524_v35 = vld [vmem:[%s1454_s25 + $0x6] sm:$0x1]  ;;  %v525_v37 = vld [vmem:[%s1454_s25 + $0x7] sm:$0x1] }
  0x3f   : > { %v526_v39 = vld [vmem:[%s1473_s12] sm:$0x1]  ;;  %v527_v41 = vld [vmem:[%s1473_s12 + $0x1] sm:$0x1]  ;;  %v528_v43 = vld [vmem:[%s1473_s12 + $0x2] sm:$0x1] }
  0x40   : > { %v529_v45 = vld [vmem:[%s1473_s12 + $0x3] sm:$0x1]  ;;  %v530_v47 = vld [vmem:[%s1473_s12 + $0x4] sm:$0x1]  ;;  %v531_v49 = vld [vmem:[%s1473_s12 + $0x5] sm:$0x1] }
  0x41   : > { %v532_v52 = vld [vmem:[%s1473_s12 + $0x6] sm:$0x1]  ;;  %vm583_vm0 = vcmask 1041409   ;;  %vm586_vm1 = vcmask 1042434   ;;  %v533_v3 = vld [vmem:[%s1473_s12 + $0x7] sm:$0x1] }
  0x42   : > { %vm589_vm2 = vcmask 1043459   ;;  %vm592_vm3 = vcmask 1044484   ;;  %vm595_vm4 = vcmask 1045509   ;;  %v534_v20 = vld [vmem:[%s1496_s26] sm:$0x1]  ;;  %vm598_vm5 = vcmask 1046534  }
  0x43   : > { %vm601_vm6 = vcmask 1047559   ;;  %vm509_vm7 = vcmask 130048   ;;  %vm504_vm8 = vcmask 7168   ;;  %vm682_vm9 = vcmask 64512   ;;  %s1713_s14 = smov (!%p489_p9, %s1351_s14), 1 }
  0x44   : > { %v1458_v26 = vld [vmem:[#allocation1] sm:$0xf]  ;;  %vm772_vm11 = vcmask 1043456   ;;  %s1254_s28 = sshll.u32 %s1713_s14, 2  ;;  %vm1085_vm12 = vcmask 257024  }
  0x45   : > { %547 = vst [vmem:[#allocation1] ss:$9 sm:$0xff] %v519_v25  ;;  %v574_v62 = vunpack.c.l.b16 %v1458_v26  ;;  %s498_s4 = scalar_lea.vmem %s1704_s3, %s1254_s28 }
  0x4c   : > { %v548_v28 = vld [vmem:[#allocation1] sm:$0xf] }
  0x4d   : > { %551 = vst [vmem:[#allocation1] ss:$9 sm:$0xff] %v520_v27  ;;  %v575_v56 = vunpack.c.l.b16 %v548_v28 }
  0x4f   : > { %v582_v63 = vrot.slane %v575_v56, 7  ;;  %v793_v56 = vld [vmem:[%s1454_s25 + $0x1] sm:$0x1] }
  0x51   : > { %v584_v7 = vsel %vm583_vm0, %v582_v63, %v574_v62  ;;  %v796_v62 = vld [vmem:[%s1454_s25 + $0x4] sm:$0x1] }
  0x54   : > { %v552_v30 = vld [vmem:[#allocation1] sm:$0xf] }
  0x55   : > { %555 = vst [vmem:[#allocation1] ss:$9 sm:$0xff] %v521_v29  ;;  %v576_v60 = vunpack.c.l.b16 %v552_v30 }
  0x57   : > { %v585_v5 = vrot.slane %v576_v60, 6  ;;  %v795_v60 = vld [vmem:[%s1454_s25 + $0x3] sm:$0x1] }
  0x59   : > { %v587_v14 = vsel %vm586_vm1, %v585_v5, %v584_v7 }
  0x5c   : > { %v556_v32 = vld [vmem:[#allocation1] sm:$0xf] }
  0x5d   : > { %559 = vst [vmem:[#allocation1] ss:$9 sm:$0xff] %v522_v31  ;;  %v577_v2 = vunpack.c.l.b16 %v556_v32 }
  0x5f   : > { %v588_v12 = vrot.slane %v577_v2, 5  ;;  %v798_v2 = vld [vmem:[%s1454_s25 + $0x6] sm:$0x1] }
  0x61   : > { %v590_v19 = vsel %vm589_vm2, %v588_v12, %v587_v14  ;;  %v803_v12 = vld [vmem:[%s1473_s12 + $0x3] sm:$0x1]  ;;  %v804_v14 = vld [vmem:[%s1473_s12 + $0x4] sm:$0x1] }
  0x64   : > { %v1464_v34 = vld [vmem:[#allocation1] sm:$0xf] }
  0x65   : > { %563 = vst [vmem:[#allocation1] ss:$9 sm:$0xff] %v523_v33  ;;  %v578_v10 = vunpack.c.l.b16 %v1464_v34 }
  0x67   : > { %v591_v18 = vrot.slane %v578_v10, 4  ;;  %v802_v10 = vld [vmem:[%s1473_s12 + $0x2] sm:$0x1] }
  0x69   : > { %v593_v26 = vsel %vm592_vm3, %v591_v18, %v590_v19  ;;  %v806_v19 = vld [vmem:[%s1473_s12 + $0x6] sm:$0x1] }
  0x6c   : > { %v1467_v36 = vld [vmem:[#allocation1] sm:$0xf] }
  0x6d   : > { %567 = vst [vmem:[#allocation1] ss:$9 sm:$0xff] %v524_v35  ;;  %v579_v16 = vunpack.c.l.b16 %v1467_v36  ;;  %v535_v35 = vld [vmem:[%s1496_s26 + $0x1] sm:$0x1] }
  0x6f   : > { %v594_v24 = vrot.slane %v579_v16, 3  ;;  %v805_v16 = vld [vmem:[%s1473_s12 + $0x5] sm:$0x1] }
  0x71   : > { %v596_v32 = vsel %vm595_vm4, %v594_v24, %v593_v26  ;;  %v513_v24 = vlaneseq }
  0x74   : > { %v1470_v38 = vld [vmem:[#allocation1] sm:$0xf] }
  0x75   : > { %571 = vst [vmem:[#allocation1] ss:$9 sm:$0xff] %v525_v37  ;;  %v580_v22 = vunpack.c.l.b16 %v1470_v38 }
  0x77   : > { %v597_v30 = vrot.slane %v580_v22, 2 }
  0x79   : > { %v599_v37 = vsel %vm598_vm5, %v597_v30, %v596_v32  ;;  %v1361_v32 = vmov -inf  }
  0x7a   : > { %505 = vst.msk [vmem:[#allocation2] sm:$0xff] %vm504_vm8, %v1361_v32 }
  0x7b   : > { %506 = vst.msk [vmem:[#allocation2 + $0x8] sm:$0xff] %vm504_vm8, %v1361_v32 }
  0x7c   : > { %v1476_v40 = vld [vmem:[#allocation1] sm:$0xf] }
  0x7d   : > { %605 = vst [vmem:[#allocation1] ss:$9 sm:$0xff] %v526_v39  ;;  %v581_v28 = vunpack.c.l.b16 %v1476_v40 }
  0x7f   : > { %v600_v34 = vrot.slane %v581_v28, 1 }
  0x81   : > { %v602_v40 = vsel %vm601_vm6, %v600_v34, %v599_v37 }
  0x84   : > { %v606_v42 = vld [vmem:[#allocation1] sm:$0xf] }
  0x85   : > { %609 = vst [vmem:[#allocation1] ss:$9 sm:$0xff] %v527_v41  ;;  %v636_v54 = vunpack.c.l.b16 %v606_v42  ;;  %v603_v41 = vpack.c.b16 %v602_v40, %v602_v40  ;;  %v536_v42 = vld [vmem:[%s1496_s26 + $0x2] sm:$0x1] }
  0x8c   : > { %v610_v44 = vld [vmem:[#allocation1] sm:$0xf] }
  0x8d   : > { %613 = vst [vmem:[#allocation1] ss:$9 sm:$0xff] %v528_v43  ;;  %v637_v51 = vunpack.c.l.b16 %v610_v44  ;;  %v537_v44 = vld [vmem:[%s1496_s26 + $0x3] sm:$0x1] }
  0x8f   : > { %v644_v55 = vrot.slane %v637_v51, 7 }
  0x91   : > { %v645_v61 = vsel %vm583_vm0, %v644_v55, %v636_v54  ;;  %v792_v54 = vld [vmem:[%s1454_s25] sm:$0x1] }
  0x94   : > { %v614_v46 = vld [vmem:[#allocation1] sm:$0xf] }
  0x95   : > { %617 = vst [vmem:[#allocation1] ss:$9 sm:$0xff] %v529_v45  ;;  %v638_v53 = vunpack.c.l.b16 %v614_v46  ;;  %v538_v46 = vld [vmem:[%s1496_s26 + $0x4] sm:$0x1] }
  0x97   : > { %v646_v59 = vrot.slane %v638_v53, 6 }
  0x99   : > { %v647_v4 = vsel %vm586_vm1, %v646_v59, %v645_v61 }
  0x9c   : > { %v618_v48 = vld [vmem:[#allocation1] sm:$0xf] }
  0x9d   : > { %621 = vst [vmem:[#allocation1] ss:$9 sm:$0xff] %v530_v47  ;;  %v639_v58 = vunpack.c.l.b16 %v618_v48  ;;  %v539_v48 = vld [vmem:[%s1496_s26 + $0x5] sm:$0x1] }
  0x9f   : > { %v648_v1 = vrot.slane %v639_v58, 5  ;;  %v794_v58 = vld [vmem:[%s1454_s25 + $0x2] sm:$0x1] }
  0xa1   : > { %v649_v11 = vsel %vm589_vm2, %v648_v1, %v647_v4  ;;  %v799_v4 = vld [vmem:[%s1454_s25 + $0x7] sm:$0x1] }
  0xa4   : > { %v622_v50 = vld [vmem:[#allocation1] sm:$0xf] }
  0xa5   : > { %625 = vst [vmem:[#allocation1] ss:$9 sm:$0xff] %v531_v49  ;;  %v640_v0 = vunpack.c.l.b16 %v622_v50  ;;  %v540_v50 = vld [vmem:[%s1496_s26 + $0x6] sm:$0x1] }
  0xa7   : > { %v650_v9 = vrot.slane %v640_v0, 4  ;;  %v797_v0 = vld [vmem:[%s1454_s25 + $0x5] sm:$0x1] }
  0xa9   : > { %v651_v17 = vsel %vm592_vm3, %v650_v9, %v649_v11 }
  0xac   : > { %v626_v57 = vld [vmem:[#allocation1] sm:$0xf] }
  0xad   : > { %629 = vst [vmem:[#allocation1] ss:$9 sm:$0xff] %v532_v52  ;;  %v641_v6 = vunpack.c.l.b16 %v626_v57  ;;  %v541_v52 = vld [vmem:[%s1496_s26 + $0x7] sm:$0x1] }
  0xaf   : > { %v652_v15 = vrot.slane %v641_v6, 3  ;;  %v800_v6 = vld [vmem:[%s1473_s12] sm:$0x1] }
  0xb1   : > { %v653_v23 = vsel %vm595_vm4, %v652_v15, %v651_v17 }
  0xb4   : > { %v630_v8 = vld [vmem:[#allocation1] sm:$0xf] }
  0xb5   : > { %633 = vst [vmem:[#allocation1] ss:$9 sm:$0xff] %v533_v3  ;;  %v642_v13 = vunpack.c.l.b16 %v630_v8  ;;  %v801_v8 = vld [vmem:[%s1473_s12 + $0x1] sm:$0x1] }
  0xb7   : > { %v654_v21 = vrot.slane %v642_v13, 2 }
  0xb9   : > { %v655_v29 = vsel %vm598_vm5, %v654_v21, %v653_v23 }
  0xbc   : > { %v634_v25 = vld [vmem:[#allocation1] sm:$0xf] }
  0xbd   : > { %v643_v27 = vunpack.c.l.b16 %v634_v25  ;;  %715 = vst [vmem:[#allocation1] ss:$9 sm:$0xff] %v534_v20 }
  0xbf   : > { %v656_v31 = vrot.slane %v643_v27, 1 }
  0xc1   : > { %v657_v33 = vsel %vm601_vm6, %v656_v31, %v655_v29  ;;  %v1562_v29 = vand.u32 127, %v513_v24 }
  0xc2   : > { %v658_v36 = vpack.c.b16 %v657_v33, %v657_v33 }
  0xc3   : > { %vm517_vm10 = vcmp.lt.s32.totalorder %v1562_v29, 5 }
  0xc4   : > { %v664_v38 = vsel %vm509_vm7, %v658_v36, 0  ;;  %v1509_v39 = vld [vmem:[#allocation1] sm:$0xf] }
  0xc5   : > { %673 = vmatpush.bf16.xpose.msra.mxu0 %v664_v38  ;;  %719 = vst [vmem:[#allocation1] ss:$9 sm:$0xff] %v535_v35 }
  0xcc   : > { %1255 = vmatmul.msk.bf16.vlgmr.msra.gmra.mxu0 %vm509_vm7, %v603_v41  ;;  %v1514_v43 = vld [vmem:[#allocation1] sm:$0xf] }
  0xcd   : > { %723 = vst [vmem:[#allocation1] ss:$9 sm:$0xff] %v536_v42  ;;  %v807_v42 = vld [vmem:[%s1473_s12 + $0x7] sm:$0x1] }
  0xd4   : > { %v1517_v45 = vld [vmem:[#allocation1] sm:$0xf] }
  0xd5   : > { %727 = vst [vmem:[#allocation1] ss:$9 sm:$0xff] %v537_v44 }
  0xdc   : > { %v1520_v47 = vld [vmem:[#allocation1] sm:$0xf] }
  0xdd   : > { %731 = vst [vmem:[#allocation1] ss:$9 sm:$0xff] %v538_v46 }
  0xe4   : > { %v1523_v49 = vld [vmem:[#allocation1] sm:$0xf] }
  0xe5   : > { %735 = vst [vmem:[#allocation1] ss:$9 sm:$0xff] %v539_v48 }
  0xec   : > { %v1526_v51 = vld [vmem:[#allocation1] sm:$0xf] }
  0xed   : > { %739 = vst [vmem:[#allocation1] ss:$9 sm:$0xff] %v540_v50 }
  0xf4   : > { %v1529_v53 = vld [vmem:[#allocation1] sm:$0xf] }
  0xf5   : > { %743 = vst [vmem:[#allocation1] ss:$9 sm:$0xff] %v541_v52  ;;  %v752_v29 = vunpack.c.l.b16 %v1529_v53 }
  0xfc   : > { %v1532_v55 = vld [vmem:[#allocation1] sm:$0xf] }
  0xfd   : > { %817 = vst [vmem:[#allocation1] ss:$9 sm:$0xff] %v792_v54 }
 0x104   : > { %v818_v57 = vld [vmem:[#allocation1] sm:$0xf] }
 0x105   : > { %821 = vst [vmem:[#allocation1] ss:$9 sm:$0xff] %v793_v56  ;;  %v848_v23 = vunpack.c.l.b16 %v818_v57 }
 0x107   : > { %v856_v35 = vrot.slane %v848_v23, 1  ;;  %v1597_v23 = vld [vmem:[#allocation2] sm:$0xff] }
 0x10c   : > { %v1536_v59 = vld [vmem:[#allocation1] sm:$0xf] }
 0x10d   : > { %825 = vst [vmem:[#allocation1] ss:$9 sm:$0xff] %v794_v58  ;;  %v849_v34 = vunpack.c.l.b16 %v1536_v59 }
 0x10f   : > { %v857_v50 = vsel %vm583_vm0, %v849_v34, %v856_v35  ;;  %v747_v34 = vunpack.c.l.b16 %v1514_v43  ;;  %v748_v35 = vunpack.c.l.b16 %v1517_v45  ;;  %v764_v45 = vrot.slane %v752_v29, 2 }
 0x114   : > { %v1539_v61 = vld [vmem:[#allocation1] sm:$0xf] }
 0x115   : > { %829 = vst [vmem:[#allocation1] ss:$9 sm:$0xff] %v795_v60  ;;  %v850_v31 = vunpack.c.l.b16 %v1539_v61 }
 0x117   : > { %v858_v46 = vrot.slane %v850_v31, 7 }
 0x119   : > { %v859_v61 = vsel %vm586_vm1, %v858_v46, %v857_v50 }
 0x11c   : > { %v1542_v63 = vld [vmem:[#allocation1] sm:$0xf] }
 0x11d   : > { %833 = vst [vmem:[#allocation1] ss:$9 sm:$0xff] %v796_v62  ;;  %v851_v40 = vunpack.c.l.b16 %v1542_v63 }
 0x11f   : > { %v860_v59 = vrot.slane %v851_v40, 6  ;;  %v751_v40 = vunpack.c.l.b16 %v1526_v51 }
 0x121   : > { %v762_v50 = vrot.slane %v751_v40, 3 }
 0x124   : > { %v1545_v1 = vld [vmem:[#allocation1] sm:$0xf] }
 0x125   : > { %837 = vst [vmem:[#allocation1] ss:$9 sm:$0xff] %v797_v0  ;;  %v852_v56 = vunpack.c.l.b16 %v1545_v1 }
 0x12c   : > { %v1548_v3 = vld [vmem:[#allocation1] sm:$0xf] }
 0x12d   : > { %841 = vst [vmem:[#allocation1] ss:$9 sm:$0xff] %v798_v2  ;;  %v853_v63 = vunpack.c.l.b16 %v1548_v3  ;;  %v862_v2 = vrot.slane %v852_v56, 5 }
 0x134   : > { %v1551_v5 = vld [vmem:[#allocation1] sm:$0xf] }
 0x135   : > { %845 = vst [vmem:[#allocation1] ss:$9 sm:$0xff] %v799_v4  ;;  %v861_v4 = vsel %vm589_vm2, %v860_v59, %v859_v61 }
 0x13c   : > { %v1554_v7 = vld [vmem:[#allocation1] sm:$0xf] }
 0x13d   : > { %872 = vst [vmem:[#allocation1] ss:$9 sm:$0xff] %v800_v6 }
 0x144   : > { %v873_v9 = vld [vmem:[#allocation1] sm:$0xf] }
 0x145   : > { %876 = vst [vmem:[#allocation1] ss:$9 sm:$0xff] %v801_v8  ;;  %v903_v18 = vunpack.c.l.b16 %v873_v9  ;;  %v854_v8 = vunpack.c.l.b16 %v1551_v5  ;;  %v864_v9 = vrot.slane %v853_v63, 4 }
 0x147   : > { %v911_v22 = vrot.slane %v903_v18, 1  ;;  %v866_v3 = vrot.slane %v854_v8, 3 }
 0x149   : > { %v675_v26 = vpop.f32.mrf.mxu0 }
 0x14a   : > { %v679_v28 = vmul.f32 0.25, %v675_v26 }
 0x14c   : > { %v877_v11 = vld [vmem:[#allocation1] sm:$0xf]  ;;  %v1572_v37 = vsel %vm517_vm10, %v679_v28, -1e+30 }
 0x14d   : > { %880 = vst [vmem:[#allocation1] ss:$9 sm:$0xff] %v802_v10  ;;  %v904_v21 = vunpack.c.l.b16 %v877_v11  ;;  %v683_v41 = vsel %vm682_vm9, %v1572_v37, -inf  ;;  %v863_v11 = vsel %vm592_vm3, %v862_v2, %v861_v4  ;;  %v808_v4 = vld [vmem:[%s1496_s26] sm:$0x1] }
 0x14e   : > { %684 = vmax.xlane.f32.xlu1 %v683_v41  ;;  %v753_v41 = vunpack.c.l.b16 %v1532_v55 }
 0x14f   : > { %v912_v33 = vsel %vm583_vm0, %v904_v21, %v911_v22 }
 0x151   : > { %v677_v57 = vpop.f32.mrf.mxu0 }
 0x154   : > { %v881_v13 = vld [vmem:[#allocation1] sm:$0xf] }
 0x155   : > { %884 = vst [vmem:[#allocation1] ss:$9 sm:$0xff] %v803_v12  ;;  %v905_v20 = vunpack.c.l.b16 %v881_v13  ;;  %v855_v13 = vunpack.c.l.b16 %v1554_v7  ;;  %v1362_v7 = vmov 0  }
 0x156   : > { %1307 = vset.pattern.permute.xlu1 %v1362_v7  ;;  %1306 = vset.pattern.permute.xlu0 %v1362_v7 }
 0x157   : > { %v913_v30 = vrot.slane %v905_v20, 7  ;;  %v868_v18 = vrot.slane %v855_v13, 2  ;;  %1308 = vset.pattern.permute.xlu2 %v1362_v7 }
 0x159   : > { %v914_v44 = vsel %vm586_vm1, %v913_v30, %v912_v33  ;;  %v746_v33 = vunpack.c.l.b16 %v1509_v39 }
 0x15c   : > { %v885_v15 = vld [vmem:[#allocation1] sm:$0xf] }
 0x15d   : > { %888 = vst [vmem:[#allocation1] ss:$9 sm:$0xff] %v804_v14  ;;  %v906_v27 = vunpack.c.l.b16 %v885_v15 }
 0x15f   : > { %v915_v38 = vrot.slane %v906_v27, 6 }
 0x161   : > { %v916_v58 = vsel %vm589_vm2, %v915_v38, %v914_v44  ;;  %v750_v38 = vunpack.c.l.b16 %v1523_v49  ;;  %v756_v44 = vrot.slane %v748_v35, 6 }
 0x164   : > { %v889_v17 = vld [vmem:[#allocation1] sm:$0xf] }
 0x165   : > { %892 = vst [vmem:[#allocation1] ss:$9 sm:$0xff] %v805_v16  ;;  %v907_v36 = vunpack.c.l.b16 %v889_v17  ;;  %v865_v16 = vsel %vm595_vm4, %v864_v9, %v863_v11 }
 0x166   : > { %v867_v5 = vsel %vm598_vm5, %v866_v3, %v865_v16 }
 0x167   : > { %v917_v54 = vrot.slane %v907_v36, 5  ;;  %v869_v21 = vsel %vm601_vm6, %v868_v18, %v867_v5  ;;  %v749_v36 = vunpack.c.l.b16 %v1520_v47 }
 0x168   : > { %v870_v22 = vpack.c.b16 %v869_v21, %v869_v21 }
 0x169   : > { %v918_v0 = vsel %vm592_vm3, %v917_v54, %v916_v58  ;;  %v758_v46 = vrot.slane %v749_v36, 5 }
 0x16c   : > { %v893_v25 = vld [vmem:[#allocation1] sm:$0xf] }
 0x16d   : > { %896 = vst [vmem:[#allocation1] ss:$9 sm:$0xff] %v806_v19  ;;  %v908_v48 = vunpack.c.l.b16 %v893_v25 }
 0x16f   : > { %v919_v62 = vrot.slane %v908_v48, 4  ;;  %v760_v48 = vrot.slane %v750_v38, 4 }
 0x171   : > { %v920_v1 = vsel %vm595_vm4, %v919_v62, %v918_v0  ;;  %v1363_v62 = vmov 0.0  }
 0x172   : > { %508 = vst.msk [vmem:[#allocation3 + $0x8] sm:$0xff] %vm504_vm8, %v1363_v62 }
 0x173   : > { %511 = vst.msk [vmem:[#allocation4 + $0x8] sm:$0xff] %vm509_vm7, %v1363_v62 }
 0x174   : > { %v897_v52 = vld [vmem:[#allocation1] sm:$0xf]  ;;  %507 = vst.msk [vmem:[#allocation3] sm:$0xff] %vm504_vm8, %v1363_v62 }
 0x175   : > { %900 = vst [vmem:[#allocation1] ss:$9 sm:$0xff] %v807_v42  ;;  %v909_v60 = vunpack.c.l.b16 %v897_v52  ;;  %v754_v42 = vrot.slane %v747_v34, 7  ;;  %v766_v52 = vrot.slane %v753_v41, 1 }
 0x176   : > { %510 = vst.msk [vmem:[#allocation4] sm:$0xff] %vm509_vm7, %v1363_v62 }
 0x177   : > { %v921_v6 = vrot.slane %v909_v60, 3  ;;  %v755_v39 = vsel %vm583_vm0, %v754_v42, %v746_v33 }
 0x178   : > { %v757_v43 = vsel %vm586_vm1, %v756_v44, %v755_v39 }
 0x179   : > { %v922_v14 = vsel %vm598_vm5, %v921_v6, %v920_v1  ;;  %v759_v47 = vsel %vm589_vm2, %v758_v46, %v757_v43  ;;  %v809_v6 = vld [vmem:[%s1496_s26 + $0x1] sm:$0x1]  ;;  %v810_v1 = vld [vmem:[%s1496_s26 + $0x2] sm:$0x1] }
 0x17a   : > { %v761_v49 = vsel %vm592_vm3, %v760_v48, %v759_v47 }
 0x17b   : > { %v763_v51 = vsel %vm595_vm4, %v762_v50, %v761_v49 }
 0x17c   : > { %v901_v10 = vld [vmem:[#allocation1] sm:$0xf]  ;;  %v765_v53 = vsel %vm598_vm5, %v764_v45, %v763_v51 }
 0x17d   : > { %v910_v12 = vunpack.c.l.b16 %v901_v10  ;;  %v767_v55 = vsel %vm601_vm6, %v766_v52, %v765_v53  ;;  %982 = vst [vmem:[#allocation1] ss:$9 sm:$0xff] %v808_v4  ;;  %v811_v10 = vld [vmem:[%s1496_s26 + $0x3] sm:$0x1] }
 0x17e   : > { %v768_v54 = vpack.c.b16 %v767_v55, %v767_v55 }
 0x17f   : > { %v923_v15 = vrot.slane %v910_v12, 2  ;;  %v812_v12 = vld [vmem:[%s1496_s26 + $0x4] sm:$0x1] }
 0x180   : > { %v774_v56 = vsel %vm772_vm11, %v768_v54, 0 }
 0x181   : > { %v924_v17 = vsel %vm601_vm6, %v923_v15, %v922_v14  ;;  %783 = vmatpush.bf16.msra.mxu1 %v774_v56  ;;  %v813_v14 = vld [vmem:[%s1496_s26 + $0x5] sm:$0x1]  ;;  %v814_v15 = vld [vmem:[%s1496_s26 + $0x6] sm:$0x1] }
 0x182   : > { %v925_v19 = vpack.c.b16 %v924_v17, %v924_v17  ;;  %v815_v17 = vld [vmem:[%s1496_s26 + $0x7] sm:$0x1] }
 0x184   : > { %v930_v20 = vsel %vm509_vm7, %v925_v19, 0  ;;  %v983_v8 = vld [vmem:[#allocation1] sm:$0xf] }
 0x185   : > { %939 = vmatpush.bf16.xpose.msra.mxu2 %v930_v20  ;;  %986 = vst [vmem:[#allocation1] ss:$9 sm:$0xff] %v809_v6  ;;  %v1013_v19 = vunpack.c.l.b16 %v983_v8 }
 0x18c   : > { %1257 = vmatmul.msk.bf16.vlgmr.msra.gmra.mxu2 %vm509_vm7, %v870_v22  ;;  %v987_v9 = vld [vmem:[#allocation1] sm:$0xf]  ;;  %v1021_v22 = vrot.slane %v1013_v19, 1 }
 0x18d   : > { %990 = vst [vmem:[#allocation1] ss:$9 sm:$0xff] %v810_v1  ;;  %v1014_v20 = vunpack.c.l.b16 %v987_v9 }
 0x194   : > { %v991_v11 = vld [vmem:[#allocation1] sm:$0xf] }
 0x195   : > { %994 = vst [vmem:[#allocation1] ss:$9 sm:$0xff] %v811_v10  ;;  %v1015_v5 = vunpack.c.l.b16 %v991_v11  ;;  %v706_v10 = vld [vmem:[#allocation4] sm:$0xff] }
 0x19c   : > { %v995_v13 = vld [vmem:[#allocation1] sm:$0xf] }
 0x19d   : > { %998 = vst [vmem:[#allocation1] ss:$9 sm:$0xff] %v812_v12  ;;  %v1016_v21 = vunpack.c.l.b16 %v995_v13 }
 0x1a4   : > { %v999_v3 = vld [vmem:[#allocation1] sm:$0xf] }
 0x1a5   : > { %1002 = vst [vmem:[#allocation1] ss:$9 sm:$0xff] %v813_v14  ;;  %v1017_v7 = vunpack.c.l.b16 %v999_v3 }
 0x1a7   : > { %v1027_v35 = vrot.slane %v1017_v7, 5 }
 0x1ac   : > { %v1003_v16 = vld [vmem:[#allocation1] sm:$0xf] }
 0x1ad   : > { %1006 = vst [vmem:[#allocation1] ss:$9 sm:$0xff] %v814_v15 }
 0x1b4   : > { %v1007_v18 = vld [vmem:[#allocation1] sm:$0xf] }
 0x1b5   : > { %1010 = vst [vmem:[#allocation1] ss:$9 sm:$0xff] %v815_v17  ;;  %v1019_v33 = vunpack.c.l.b16 %v1007_v18 }
 0x1b7   : > { %v1031_v41 = vrot.slane %v1019_v33, 3 }
 0x1c1   : > { %v685_v24 = vpop.xlane.xlu1 %684 }
 0x1c2   : > { %v1600_v25 = vmax.f32 %v1597_v23, %v685_v24  ;;  %v1023_v24 = vrot.slane %v1015_v5, 7 }
 0x1c4   : > { %v687_v26 = vsub.f32 %v1597_v23, %v1600_v25  ;;  %791 = vst.msk [vmem:[#allocation2] sm:$0xff] %vm504_vm8, %v1600_v25  ;;  %692 = vperm.xlu1 %1307, %v1600_v25   ;;  %v973_v23 = vld [vmem:[#allocation4 + $0x8] sm:$0xff] }
 0x20f   : > { %v941_v27 = vpop.f32.mrf.mxu2 }
 0x210   : > { %v945_v28 = vmul.f32 0.25, %v941_v27  ;;  %v1018_v27 = vunpack.c.l.b16 %v1003_v16 }
 0x212   : > { %v1609_v30 = vsel %vm517_vm10, %v945_v28, -1e+30  ;;  %v1022_v28 = vsel %vm583_vm0, %v1014_v20, %v1021_v22  ;;  %v1029_v40 = vrot.slane %v1018_v27, 4 }
 0x213   : > { %v949_v31 = vsel %vm682_vm9, %v1609_v30, -inf  ;;  %v1024_v34 = vsel %vm586_vm1, %v1023_v24, %v1022_v28 }
 0x214   : > { %950 = vmax.xlane.f32.xlu0 %v949_v31  ;;  %v1025_v31 = vrot.slane %v1016_v21, 6 }
 0x216   : > { %v1026_v38 = vsel %vm589_vm2, %v1025_v31, %v1024_v34 }
 0x217   : > { %v943_v32 = vpop.f32.mrf.mxu2  ;;  %v1028_v29 = vsel %vm592_vm3, %v1027_v35, %v1026_v38 }
 0x218   : > { %v1011_v32 = vld [vmem:[#allocation1] sm:$0xf]  ;;  %v1030_v42 = vsel %vm595_vm4, %v1029_v40, %v1028_v29 }
 0x219   : > { %v1020_v36 = vunpack.c.l.b16 %v1011_v32  ;;  %v1032_v46 = vsel %vm598_vm5, %v1031_v41, %v1030_v42 }
 0x21b   : > { %v1033_v44 = vrot.slane %v1020_v36, 2 }
 0x21d   : > { %v1034_v48 = vsel %vm601_vm6, %v1033_v44, %v1032_v46 }
 0x21e   : > { %v1035_v39 = vpack.c.b16 %v1034_v48, %v1034_v48 }
 0x220   : > { %v1040_v43 = vsel %vm772_vm11, %v1035_v39, 0 }
 0x221   : > { %1049 = vmatpush.bf16.msra.mxu3 %v1040_v43 }
 0x236   : > { %v693_v57 = vpop.permute.xlu1 %692 }
 0x237   : > { %v695_v58 = vsub.f32 %v1572_v37, %v693_v57  ;;  %v1639_v37 = vld [vmem:[#allocation2 + $0x8] sm:$0xff] }
 0x239   : > { %v696_v59 = vmul.f32 1.442695, %v695_v58 }
 0x23b   : > { %1309 = vpow2.f32 %v696_v59  ;;  %v965_v59 = vld [vmem:[#allocation3 + $0x8] sm:$0xff] }
 0x241   : > { %v1630_v60 = vpop.eup %1309 }
 0x242   : > { %v713_v61 = vpack.c.bf16 %v1630_v60, %v1630_v60  ;;  %v700_v54 = vsel %vm682_vm9, %v1630_v60, 0.0  ;;  %v698_v60 = vld [vmem:[#allocation3] sm:$0xff] }
 0x244   : > { %1256 = vmatmul.msk.bf16.vlgmr.msra.gmra.mxu1 %vm682_vm9, %v713_v61 }
 0x287   : > { %v951_v63 = vpop.xlane.xlu0 %950 }
 0x288   : > { %v1642_v0 = vmax.f32 %v1639_v37, %v951_v63 }
 0x28a   : > { %v953_v2 = vsub.f32 %v1639_v37, %v1642_v0  ;;  %1057 = vst.msk [vmem:[#allocation2 + $0x8] sm:$0xff] %vm504_vm8, %v1642_v0  ;;  %958 = vperm.xlu0 %1306, %v1642_v0  }
 0x28c   : > { %v954_v56 = vmul.f32 1.442695, %v953_v2 }
 0x2c1   : > { %v785_v50 = vpop.f32.mrf.mxu1 }
 0x2c9   : > { %v787_v45 = vpop.f32.mrf.mxu1 }
 0x2fc   : > { %v959_v47 = vpop.permute.xlu0 %958 }
 0x2fd   : > { %v961_v52 = vsub.f32 %v1609_v30, %v959_v47  ;;  %v688_v30 = vmul.f32 1.442695, %v687_v26 }
 0x2ff   : > { %v962_v49 = vmul.f32 1.442695, %v961_v52 }
 0x301   : > { %1311 = vpow2.f32 %v962_v49 }
 0x302   : > { %1313 = vpow2.f32 %v954_v56 }
 0x303   : > { %1315 = vpow2.f32 %v688_v30 }
 0x307   : > { %v1312_v51 = vpop.eup %1311 }
 0x308   : > { %v967_v53 = vsel %vm682_vm9, %v1312_v51, 0.0  ;;  %v980_v55 = vpack.c.bf16 %v1312_v51, %v1312_v51  ;;  %v1314_v57 = vpop.eup %1313 }
 0x309   : > { %968 = vadd.xlane.f32.xlu2 %v967_v53  ;;  %v1316_v58 = vpop.eup %1315  ;;  %v966_v61 = vmul.f32 %v1314_v57, %v965_v59 }
 0x30a   : > { %1258 = vmatmul.msk.bf16.vlgmr.msra.gmra.mxu3 %vm682_vm9, %v980_v55  ;;  %v699_v4 = vmul.f32 %v1316_v58, %v698_v60 }
 0x311   : > { %701 = vadd.xlane.f32.xlu2 %v700_v54 }
 0x329   : > { %976 = vperm.xlu2 %1308, %v1314_v57  }
 0x331   : > { %709 = vperm.xlu2 %1308, %v1316_v58  }
 0x37c   : > { %v969_v62 = vpop.xlane.xlu2 %968 }
 0x37d   : > { %v970_v63 = vadd.f32 %v969_v62, %v966_v61 }
 0x37f   : > { %971 = vst.msk [vmem:[#allocation3 + $0x8] sm:$0xff] %vm504_vm8, %v970_v63 }
 0x384   : > { %v702_v37 = vpop.xlane.xlu2 %701 }
 0x385   : > { %v703_v0 = vadd.f32 %v702_v37, %v699_v4 }
 0x386   : > { %v1070_v2 = vld [vmem:[#allocation3 + $0x8] sm:$0xff] }
 0x387   : > { %705 = vst.msk [vmem:[#allocation3] sm:$0xff] %vm504_vm8, %v703_v0  ;;  %1317 = vrcp.f32 %v1070_v2 }
 0x38c   : > { %v977_v25 = vpop.permute.xlu2 %976 }
 0x38d   : > { %v1318_v26 = vpop.eup %1317  ;;  %v979_v6 = vmul.f32 %v977_v25, %v973_v23  ;;  %v1051_v8 = vpop.f32.mrf.mxu3 }
 0x38e   : > { %1075 = vperm.xlu1 %1307, %v1318_v26   ;;  %v1061_v1 = vld [vmem:[#allocation3] sm:$0xff] }
 0x38f   : > { %v1055_v9 = vadd.f32 %v1051_v8, %v979_v6  ;;  %1319 = vrcp.f32 %v1061_v1 }
 0x391   : > { %1056 = vst.msk [vmem:[#allocation4 + $0x8] sm:$0xff] %vm509_vm7, %v1055_v9 }
 0x394   : > { %v710_v11 = vpop.permute.xlu2 %709 }
 0x395   : > { %v1320_v12 = vpop.eup %1319  ;;  %v712_v13 = vmul.f32 %v710_v11, %v706_v10  ;;  %v1053_v14 = vpop.f32.mrf.mxu3 }
 0x396   : > { %1066 = vperm.xlu1 %1307, %v1320_v12  }
 0x397   : > { %v789_v3 = vadd.f32 %v785_v50, %v712_v13 }
 0x398   : > { %v1072_v15 = vld [vmem:[#allocation4 + $0x8] sm:$0xff] }
 0x399   : > { %790 = vst.msk [vmem:[#allocation4] sm:$0xff] %vm509_vm7, %v789_v3 }
 0x3a0   : > { %v1063_v19 = vld [vmem:[#allocation4] sm:$0xff] }
 0x400   : > { %v1076_v16 = vpop.permute.xlu1 %1075 }
 0x401   : > { %v1078_v17 = vmul.f32 %v1076_v16, %v1072_v15 }
 0x403   : > { %1080 = vrot.lane.b32.xlu0 %v1078_v17, %s1364_s27 }
 0x408   : > { %v1067_v18 = vpop.permute.xlu1 %1066 }
 0x409   : > { %v1069_v5 = vmul.f32 %v1067_v18, %v1063_v19 }
 0x475   : > { %v1081_v20 = vpop.permute.xlu0 %1080 }
 0x476   : > { %v1083_v21 = vsel %vm509_vm7, %v1069_v5, %v1081_v20 }
 0x477   : > { %v1084_v22 = vpack.c.bf16 %v1083_v21, %v1083_v21 }
 0x479   : > { %1086 = vst.msk [vmem:[%s498_s4] sm:$0xf] %vm1085_vm12, %v1084_v22 }
 0x47a PF: > { %s13_s16 = sadd.s32 1, %s1359_s16   ;;  %s1706_s12 = smov %s1347_s13 }
 0x47b   : > { %p10_p10 = scmp.ge.s32.totalorder %s13_s16, 4   ;;  %s1707_s13 = smov %s1424_s21 }
 0x47c   : > { %s1708_s14 = smov %s1355_s15  ;;  %s1709_s15 = smov %s1711_s17 }
 0x47d   :  { %12 = sbr.rel (!%p10_p10) target bundleno = 3 (0x3), region = 217 }

// kernel: image_embedding_mae.25
= control target key start
LH: loop header
LB: loop body
LE: loop exit
PB: predicated region body
PF: predicated region fallthrough
CT: control target
= control target key end

     0   :  { %9 = vsyncpa [#allocation3], 0  ;;  %s1422_s0 = inlined_call_operand.vmem [shape: bf16[2,8,192], index: 0, kind: input, shape index: {}]   ;;  %s1423_s1 = inlined_call_operand.vmem [shape: bf16[3,192,64], index: 1, kind: input, shape index: {}]   ;;  %s1424_s2 = inlined_call_operand.vmem [shape: f32[1,64], index: 2, kind: input, shape index: {}]   ;;  %s1425_s3 = inlined_call_operand.vmem [shape: f32[1,64], index: 3, kind: input, shape index: {}]   ;;  %s1426_s4 = inlined_call_operand.hbm [shape: f32[2,2,2,64], index: 4, kind: output, shape index: {}]  }
   0x1   :  { %11 = vsyncpa [#allocation3 + $0x1], 0  ;;  %s1202_s15 = smov 0   ;;  %s1204_s16 = smov 0  }
   0x2   :  { %s1206_s17 = smov 0   ;;  %s1208_s18 = smov 0  }
   0x3   :  { %s1210_s19 = smov 0   ;;  %s1212_s20 = smov 0  }
   0x4 LB: > { %s781_s21 = sadd.s32 4294967295, %s1172_s20   ;;  %s782_s22 = sadd.s32 4294967294, %s1172_s20   ;;  %s1172_s20 = sphi %s1212_s20, %s17_s20   ;;  %s1168_s19 = sphi %s1210_s19, %s1433_s19   ;;  %s1164_s18 = sphi %s1208_s18, %s1432_s18   ;;  %s1160_s17 = sphi %s1206_s17, %s1431_s17   ;;  %s1156_s16 = sphi %s1204_s16, %s1430_s16   ;;  %s1152_s15 = sphi %s1202_s15, %s1429_s15  }
   0x5   : > { %s29_s23 = sadd.s32 1, %s1168_s19  ;;  %s129_s24 = sadd.s32 1, %s1160_s17 }
   0x6   : > { %p31_p0 = scmp.ge.s32.totalorder %s29_s23, 2  ;;  %p139_p1 = scmp.ne.s32.totalorder %s1160_s17, %s1156_s16 }
   0x7   : > { %p140_p2 = scmp.eq.s32.totalorder %s781_s21, 1  ;;  %p145_p3 = scmp.ne.s32.totalorder %s1156_s16, %s1152_s15 }
   0x8   : > { %s1435_s23 = smov (%p31_p0, %s29_s23), 0  ;;  %p146_p5 = scmp.eq.s32.totalorder %s782_s22, 1 }
   0x9   : > { %p1242_p4 = por %p140_p2, %p139_p1  ;;  %s124_s26 = ssub.s32 %s1168_s19, %s1435_s23 }
   0xa   : > { %p785_p6 = scmp.ge.s32.totalorder %s1172_s20, 1  ;;  %p127_p7 = scmp.eq.s32.totalorder %s124_s26, 0 }
   0xb   : > { %p1249_p8 = por %p146_p5, %p145_p3  ;;  %p185_p9 = scmp.lt.s32.totalorder %s1172_s20, 3 }
   0xc   : > { %s1255_s28 = scalar_select %p127_p7, %s1160_s17, %s129_s24  }
   0xd   : > { %p186_p10 = pnand %p785_p6, %p185_p9 }
   0xe   : > { %p215_p11 = scmp.lt.s32.totalorder (!%p186_p10), %s1164_s18, 1  ;;  %s212_s22 = sand.u32 (!%p186_p10), 1, %s1156_s16  }
   0xf   : > { %189 = sbr.rel (%p186_p10) target bundleno = 481 (0x1e1), region = 36  ;;  %s786_s5 = sshll.u32 (!%p186_p10), %s212_s22, 2 }
  0x10   : > { %s1027_s6 = sshll.u32 (!%p186_p10), %s1164_s18, 2  ;;  %s214_s10 = scalar_lea.vmem (!%p186_p10), [#allocation2], %s786_s5 }
  0x11   : > { %s695_s9 = scalar_lea.hbm (!%p186_p10), %s1426_s4, %s1027_s6  ;;  %s696_s11 = sshll.u32 (!%p186_p10), %s214_s10, 4  ;;  %s697_s11 = int_to_ptr.vmem [resolvable:$true] %s696_s11 }
  0x12   : > { %s698_s12 = sshll.u32 (!%p186_p10), %s695_s9, 4  ;;  %s1114_s26 = scalar_lea.hbm (!%p186_p10), %s1426_s4, 8  ;;  %s699_s12 = int_to_ptr.hbm [resolvable:$true] %s698_s12 }
  0x13   : > { %s1108_s13 = sshra.s32 (!%p186_p10), %s699_s12, 4  ;;  %s1109_s13 = int_to_ptr.hbm [resolvable:$true] %s1108_s13 }
  0x14   : > { %v998_v0 = vld [vmem:[%s1423_s1 + $0x38] sm:$0xff]  ;;  %v997_v4 = vld [vmem:[%s1423_s1 + $0x30] sm:$0xff]  ;;  %s216_s21 = scalar_select %p215_p11, %s1164_s18, 1  ;;  %v996_v8 = vld [vmem:[%s1423_s1 + $0x28] sm:$0xff]  ;;  %vm329_vm0 = vcmask 523264   ;;  %vm615_vm1 = vcmask 517120  }
  0x15   : > { %v1002_v1 = vld [vmem:[%s1423_s1 + $0x58] sm:$0xff]  ;;  %333 = vmatpush.bf16.msra.mxu0 %v998_v0  ;;  %v1001_v5 = vld [vmem:[%s1423_s1 + $0x50] sm:$0xff]  ;;  %v1000_v9 = vld [vmem:[%s1423_s1 + $0x48] sm:$0xff]  ;;  %vm654_vm2 = vcmask 521220   ;;  %v1174_v62 = vmov 64.0   ;;  %s682_s18 = scalar_lea.sflag [#allocation3], %s212_s22  ;;  %p1115_p1 = scmp.lt.s32.totalorder %s1109_s13, %s1426_s4 }
  0x16   : > { %v1010_v2 = vld [vmem:[%s1423_s1 + $0x98] sm:$0xff]  ;;  %350 = vmatpush.bf16.msra.mxu1 %v1002_v1  ;;  %v1009_v6 = vld [vmem:[%s1423_s1 + $0x90] sm:$0xff]  ;;  %s990_s30 = sshll.u32 %s216_s21, 3  ;;  %v1008_v10 = vld [vmem:[%s1423_s1 + $0x88] sm:$0xff]  ;;  %1088 = vrcp.f32 %v1174_v62  ;;  %s1110_s14 = scalar_lea.hbm %s1109_s13, 4 }
  0x17   : > { %v1014_v3 = vld [vmem:[%s1423_s1 + $0xb8] sm:$0xff]  ;;  %456 = vmatpush.bf16.msra.mxu2 %v1010_v2  ;;  %v1013_v7 = vld [vmem:[%s1423_s1 + $0xb0] sm:$0xff]  ;;  %s223_s7 = scalar_lea.vmem %s1422_s0, %s990_s30  ;;  %v1012_v11 = vld [vmem:[%s1423_s1 + $0xa8] sm:$0xff]  ;;  %p1111_p12 = scmp.ne.s32.totalorder %s1109_s13, %s1110_s14 }
  0x18   : > { %473 = vmatpush.bf16.msra.mxu3 %v1014_v3  ;;  %v226_v12 = vld [vmem:[%s223_s7] sm:$0xff]  ;;  %v1022_v18 = vld [vmem:[%s1423_s1 + $0xf8] sm:$0xff]  ;;  %v1021_v23 = vld [vmem:[%s1423_s1 + $0xf0] sm:$0xff]  ;;  %p1116_p2 = scmp.lt.s32.totalorder %s1114_s26, %s1110_s14 }
  0x19   : > { %334 = vmatpush.bf16.msra.mxu0 %v997_v4  ;;  %v995_v13 = vld [vmem:[%s1423_s1 + $0x20] sm:$0xff]  ;;  %v253_v15 = vunpack.c.h.b16 %v226_v12  ;;  %v1026_v19 = vld [vmem:[%s1423_s1 + $0x118] sm:$0xff]  ;;  %v1025_v24 = vld [vmem:[%s1423_s1 + $0x110] sm:$0xff]  ;;  %v252_v33 = vunpack.c.l.b16 %v226_v12  ;;  %p1112_p13 = pnand %p1111_p12, %p1242_p4 }
  0x1a   : > { %351 = vmatpush.bf16.msra.mxu1 %v1001_v5  ;;  %v999_v14 = vld [vmem:[%s1423_s1 + $0x40] sm:$0xff]  ;;  %v994_v21 = vld [vmem:[%s1423_s1 + $0x18] sm:$0xff]  ;;  %v993_v25 = vld [vmem:[%s1423_s1 + $0x10] sm:$0xff]  ;;  %p1117_p3 = por %p1116_p2, %p1115_p1 }
  0x1b   : > { %457 = vmatpush.bf16.msra.mxu2 %v1009_v6  ;;  %v1007_v16 = vld [vmem:[%s1423_s1 + $0x80] sm:$0xff]  ;;  %v255_v20 = vpack.c.b16 %v253_v15, %v253_v15  ;;  %v1006_v22 = vld [vmem:[%s1423_s1 + $0x78] sm:$0xff]  ;;  %v1005_v26 = vld [vmem:[%s1423_s1 + $0x70] sm:$0xff]  ;;  %v254_v37 = vpack.c.b16 %v252_v33, %v252_v33  ;;  %p1113_p0 = pneg %p1112_p13 }
  0x1c   : > { %474 = vmatpush.bf16.msra.mxu3 %v1013_v7  ;;  %v1011_v17 = vld [vmem:[%s1423_s1 + $0xa0] sm:$0xff]  ;;  %v1020_v27 = vld [vmem:[%s1423_s1 + $0xe8] sm:$0xff]  ;;  %v1018_v36 = vld [vmem:[%s1423_s1 + $0xd8] sm:$0xff]  ;;  %v1089_v63 = vpop.eup %1088 }
  0x1d   : > { %335 = vmatpush.bf16.msra.mxu0 %v996_v8  ;;  %v1024_v28 = vld [vmem:[%s1423_s1 + $0x108] sm:$0xff]  ;;  %v1019_v31 = vld [vmem:[%s1423_s1 + $0xe0] sm:$0xff]  ;;  %v1017_v38 = vld [vmem:[%s1423_s1 + $0xd0] sm:$0xff]  ;;  %v620_v0 = vmul.f32 64.0, %v1089_v63  ;;  %vm624_vm3 = vweird.f32 %v1089_v63  ;;  %p1118_p5 = pnand %p1117_p3, %p1113_p0 }
  0x1e   : > { %352 = vmatpush.bf16.msra.mxu1 %v1000_v9  ;;  %v992_v29 = vld [vmem:[%s1423_s1 + $0x8] sm:$0xff]  ;;  %v1023_v32 = vld [vmem:[%s1423_s1 + $0x100] sm:$0xff] }
  0x1f   : > { %458 = vmatpush.bf16.msra.mxu2 %v1008_v10  ;;  %v1004_v30 = vld [vmem:[%s1423_s1 + $0x68] sm:$0xff]  ;;  %v991_v34 = vld [vmem:[%s1423_s1] sm:$0xff]  ;;  %v621_v1 = vsub.f32 1.0, %v620_v0 }
  0x20   : > { %475 = vmatpush.bf16.msra.mxu3 %v1012_v11  ;;  %v1003_v35 = vld [vmem:[%s1423_s1 + $0x60] sm:$0xff]  ;;  %v1016_v39 = vld [vmem:[%s1423_s1 + $0xc8] sm:$0xff] }
  0x21   : > { %336 = vmatpush.bf16.msra.mxu0 %v995_v13  ;;  %v1015_v40 = vld [vmem:[%s1423_s1 + $0xc0] sm:$0xff]  ;;  %v622_v2 = vmul.f32 %v1089_v63, %v621_v1 }
  0x22   : > { %353 = vmatpush.bf16.msra.mxu1 %v999_v14 }
  0x23   : > { %459 = vmatpush.bf16.msra.mxu2 %v1007_v16  ;;  %v623_v3 = vadd.f32 %v1089_v63, %v622_v2 }
  0x24   : > { %476 = vmatpush.bf16.msra.mxu3 %v1011_v17 }
  0x25   : > { %837 = vmatmul.msk.bf16.vlgmr.msra.gmra.mxu1 %vm329_vm0, %v255_v20  ;;  %337 = vmatpush.bf16.msra.mxu0 %v994_v21  ;;  %v625_v4 = vsel %vm624_vm3, %v1089_v63, %v623_v3 }
  0x26   : > { %579 = vmatpush.bf16.msrb.mxu1 %v1022_v18 }
  0x27   : > { %910 = vmatmul.msk.bf16.vlgmr.msra.gmra.mxu3 %vm329_vm0, %v255_v20  ;;  %460 = vmatpush.bf16.msra.mxu2 %v1006_v22 }
  0x28   : > { %596 = vmatpush.bf16.msrb.mxu3 %v1026_v19 }
  0x29   : > { %338 = vmatpush.bf16.msra.mxu0 %v993_v25 }
  0x2a   : > { %580 = vmatpush.bf16.msrb.mxu1 %v1021_v23 }
  0x2b   : > { %461 = vmatpush.bf16.msra.mxu2 %v1005_v26 }
  0x2c   : > { %597 = vmatpush.bf16.msrb.mxu3 %v1025_v24 }
  0x2d   : > { %339 = vmatpush.bf16.msra.mxu0 %v992_v29  ;;  %v1086_v29 = vld [vmem:[%s1424_s2] ss:$0 sm:$0xff] }
  0x2e   : > { %581 = vmatpush.bf16.msrb.mxu1 %v1020_v27 }
  0x2f   : > { %462 = vmatpush.bf16.msra.mxu2 %v1004_v30 }
  0x30   : > { %598 = vmatpush.bf16.msrb.mxu3 %v1024_v28 }
  0x31   : > { %340 = vmatpush.bf16.msra.mxu0 %v991_v34 }
  0x32   : > { %582 = vmatpush.bf16.msrb.mxu1 %v1019_v31 }
  0x33   : > { %463 = vmatpush.bf16.msra.mxu2 %v1003_v35 }
  0x34   : > { %599 = vmatpush.bf16.msrb.mxu3 %v1023_v32  ;;  %341 = vmatmul.bf16.vlgmr.msra.gmra.mxu0 %v254_v37  ;;  %v1087_v32 = vld [vmem:[%s1425_s3] ss:$0 sm:$0xff] }
  0x36   : > { %583 = vmatpush.bf16.msrb.mxu1 %v1018_v36  ;;  %464 = vmatmul.bf16.vlgmr.msra.gmra.mxu2 %v254_v37 }
  0x37   : > { %983 = vmatmul.msk.bf16.vlgmr.msrb.gmra.mxu3 %vm329_vm0, %v255_v20 }
  0x3a   : > { %584 = vmatpush.bf16.msrb.mxu1 %v1017_v38 }
  0x3e   : > { %585 = vmatpush.bf16.msrb.mxu1 %v1016_v39 }
  0x42   : > { %586 = vmatpush.bf16.msrb.mxu1 %v1015_v40 }
  0x45   : > { %587 = vmatmul.bf16.vlgmr.msrb.gmra.mxu1 %v254_v37 }
  0xa2   : > { %v355_v41 = vpop.f32.mrf.mxu1 }
  0xaa   : > { %v478_v42 = vpop.f32.mrf.mxu3  ;;  %v357_v43 = vpop.f32.mrf.mxu1 }
  0xb1   : > { %v342_v45 = vpop.f32.mrf.mxu0 }
  0xb2   : > { %v480_v44 = vpop.f32.mrf.mxu3  ;;  %v356_v52 = vadd.f32 %v355_v41, %v342_v45 }
  0xb9   : > { %v465_v46 = vpop.f32.mrf.mxu2  ;;  %v344_v48 = vpop.f32.mrf.mxu0 }
  0xba   : > { %v601_v47 = vpop.f32.mrf.mxu3  ;;  %v479_v49 = vadd.f32 %v478_v42, %v465_v46 }
  0xbc   : > { %v608_v50 = vrot.slane %v479_v49, 1 }
  0xbe   : > { %v610_v56 = vadd.f32 %v608_v50, %v356_v52 }
  0xc1   : > { %v467_v54 = vpop.f32.mrf.mxu2 }
  0xc2   : > { %v588_v51 = vpop.f32.mrf.mxu1  ;;  %v603_v55 = vpop.f32.mrf.mxu3 }
  0xc3   : > { %v602_v53 = vadd.f32 %v601_v47, %v588_v51 }
  0xc5   : > { %v612_v57 = vrot.slane %v602_v53, 2 }
  0xc7   : > { %v614_v58 = vadd.f32 %v612_v57, %v610_v56 }
  0xc9   : > { %v616_v59 = vsel %vm615_vm1, %v614_v58, 0.0  ;;  %v655_v61 = vsel %vm654_vm2, %v614_v58, 0.0 }
  0xca   : > { %v590_v60 = vpop.f32.mrf.mxu1  ;;  %617 = vadd.xlane.f32.xlu0 %v616_v59 }
  0xd2   : > { %656 = vadd.xlane.f32.xlu0 %v655_v61 }
 0x13d   : > { %v618_v5 = vpop.xlane.xlu0 %617 }
 0x13e   : > { %v626_v6 = vmul.f32 %v625_v4, %v618_v5 }
 0x140   : > { %v627_v7 = vsub.f32 %v614_v58, %v626_v6 }
 0x142   : > { %v628_v8 = vmul.f32 %v627_v7, %v627_v7 }
 0x144   : > { %v629_v9 = vsel %vm615_vm1, %v628_v8, 0.0 }
 0x145   : > { %630 = vadd.xlane.f32.xlu1 %v629_v9  ;;  %v657_v10 = vpop.xlane.xlu0 %656 }
 0x146   : > { %v658_v11 = vmul.f32 %v657_v10, %v625_v4 }
 0x148   : > { %v659_v12 = vsub.f32 %v614_v58, %v658_v11 }
 0x14a   : > { %v660_v13 = vmul.f32 %v659_v12, %v659_v12 }
 0x14c   : > { %v661_v14 = vsel %vm654_vm2, %v660_v13, 0.0 }
 0x14d   : > { %662 = vadd.xlane.f32.xlu1 %v661_v14 }
 0x1b8   : > { %v631_v15 = vpop.xlane.xlu1 %630 }
 0x1b9   : > { %v632_v16 = vmul.f32 %v631_v15, %v625_v4 }
 0x1bb   : > { %v633_v17 = vadd.f32 1e-06, %v632_v16 }
 0x1bd   : > { %1090 = vrsqrt.f32 %v633_v17  ;;  %vm640_vm5 = vweird.f32 %v633_v17 }
 0x1c0   : > { %v663_v18 = vpop.xlane.xlu1 %662 }
 0x1c1   : > { %v664_v19 = vmul.f32 %v663_v18, %v625_v4 }
 0x1c3   : > { %v1091_v20 = vpop.eup %1090  ;;  %v665_v21 = vadd.f32 1e-06, %v664_v19 }
 0x1c4   : > { %v635_v22 = vmul.f32 %v1091_v20, %v633_v17  ;;  %vm641_vm4 = vweird.f32 %v1091_v20 }
 0x1c5   : > { %1092 = vrsqrt.f32 %v665_v21  ;;  %vm642_vm6 = vmor %vm640_vm5, %vm641_vm4  ;;  %vm672_vm8 = vweird.f32 %v665_v21 }
 0x1c6   : > { %v636_v23 = vmul.f32 %v1091_v20, %v635_v22 }
 0x1c8   : > { %v637_v24 = vmul.f32 0.5, %v636_v23 }
 0x1ca   : > { %v638_v25 = vsub.f32 1.5, %v637_v24 }
 0x1cb   : > { %v1093_v26 = vpop.eup %1092 }
 0x1cc   : > { %v639_v27 = vmul.f32 %v1091_v20, %v638_v25  ;;  %v667_v28 = vmul.f32 %v1093_v26, %v665_v21  ;;  %vm673_vm7 = vweird.f32 %v1093_v26 }
 0x1cd   : > { %vm674_vm9 = vmor %vm672_vm8, %vm673_vm7 }
 0x1ce   : > { %v643_v30 = vsel %vm642_vm6, %v1091_v20, %v639_v27  ;;  %v668_v31 = vmul.f32 %v1093_v26, %v667_v28 }
 0x1cf   : > { %v644_v33 = vmul.f32 %v643_v30, %v627_v7 }
 0x1d0   : > { %v669_v34 = vmul.f32 0.5, %v668_v31 }
 0x1d1   : > { %v648_v35 = vmul.f32 %v1086_v29, %v644_v33 }
 0x1d2   : > { %v670_v36 = vsub.f32 1.5, %v669_v34 }
 0x1d3   : > { %v652_v37 = vadd.f32 %v1087_v32, %v648_v35 }
 0x1d4   : > { %v671_v38 = vmul.f32 %v1093_v26, %v670_v36 }
 0x1d5   : > { %653 = vst.msk [vmem:[%s214_s10] sm:$0x3] %vm615_vm1, %v652_v37 }
 0x1d6   : > { %v675_v39 = vsel %vm674_vm9, %v1093_v26, %v671_v38 }
 0x1d7   : > { %v676_v40 = vmul.f32 %v675_v39, %v659_v12 }
 0x1d9   : > { %v677_v41 = vmul.f32 %v1086_v29, %v676_v40 }
 0x1db   : > { %v678_v42 = vadd.f32 %v1087_v32, %v677_v41 }
 0x1dd   : > { %984 = vst.msk [vmem:[%s214_s10 - $0x2] sm:$0x30] %vm654_vm2, %v678_v42 }
 0x1de   : > { %1121 = shalt.err (!%p1118_p5)
}
 0x1df   : > { %s1175_s22 = smov 32   ;;  %s1176_s5 = smov 2  }
 0x1e0   : > { %1028 = dma.vmem_to_hbm [thread:$0]  (%p1242_p4), %s697_s11, 64, %s699_s12, %s682_s18, %s1175_s22, %s1175_s22, %s1176_s5  }
 0x1e1 PF: > { %p1034_p6 = scmp.ge.s32.totalorder %s1172_s20, 2  ;;  %s713_s6 = sand.u32 1, %s1152_s15  }
 0x1e2   : > { %s714_s8 = scalar_lea.sflag [#allocation3], %s713_s6 }
 0x1e3   : > { %p1031_p7 = pnand %p1034_p6, %p1249_p8 }
 0x1e5   : > { %p1032_p9 = pneg %p1031_p7 }
 0x1e7   : > { %1147 = dma.done.wait (%p1032_p9), %s714_s8, 64  }
 0x1e8   : > { %1149 = vsyncadd (%p1032_p9), %s714_s8, 4294967232  ;;  %s17_s20 = sadd.s32 1, %s1172_s20   ;;  %s1429_s15 = smov %s1156_s16 }
 0x1e9   : > { %p14_p10 = scmp.ge.s32.totalorder %s17_s20, 4   ;;  %s1430_s16 = smov %s1160_s17 }
 0x1ea   : > { %s1431_s17 = smov %s1255_s28  ;;  %s1432_s18 = smov %s1168_s19 }
 0x1eb   : > { %s1433_s19 = smov %s1435_s23  ;;  %16 = sbr.rel (!%p14_p10) target bundleno = 4 (0x4), region = 74 }
 0x1f0   :  { %720 = vsyncpa [#allocation3], 1 }
 0x1f1   :  { %722 = vsyncpa [#allocation3 + $0x1], 1 }

</bundles_post_ra>
